<compile_context>
chip_gen: v6e
topology: v6e:2x2x1
jax: 0.10.0
libtpu: 0.0.40
codegen_flags: <defaults>
</compile_context>

<pallas_src>
import math
import functools

import jax
import jax.numpy as jnp
from jax.experimental import pallas as pl
from jax.experimental.pallas import tpu as pltpu

EPS = 1e-5             # torch.nn.LayerNorm default eps
TOK_MLP = 16           # tokens_mlp_dim   (hard-coded in the PyTorch module)
CH_MLP = 128           # channels_mlp_dim (hard-coded in the PyTorch module)
NUM_CLASSES = 10
NUM_CLASSES_PAD = 128  # classifier output padded to a full 128-lane vreg (unmasked stores)


def _layernorm(x, g, b):
    # torch.nn.LayerNorm: biased variance over the last axis
    mu = jnp.mean(x, axis=-1, keepdims=True)
    var = jnp.mean((x - mu) ** 2, axis=-1, keepdims=True)
    return (x - mu) * jax.lax.rsqrt(var + EPS) * g + b


def _gelu(x):
    # exact (erf-based) GELU, matching torch.nn.GELU() default
    return 0.5 * x * (1.0 + jax.scipy.special.erf(x * (1.0 / math.sqrt(2.0))))


def _mixer_kernel(depth,
                  xp_ref, wemb_ref,
                  ln1g_ref, ln1b_ref, tw1_ref, tb1_ref, tw2_ref, tb2_ref,
                  ln2g_ref, ln2b_ref, cw1_ref, cb1_ref, cw2_ref, cb2_ref,
                  lng_ref, lnb_ref, fcw_ref, fcb_ref,
                  out_ref):
    BT, P = xp_ref.shape                       # (BB*T, P) patch rows for this batch tile
    C = wemb_ref.shape[1]
    TOK, T = tw1_ref.shape[1], tw1_ref.shape[2]
    BB = BT // T

    # Patch embedding (the stride-ps conv as one big matmul): (BB*T, P) @ (P, C).
    # All matmuls use default MXU precision (bf16 single pass, f32 accumulate) per review.
    x = jnp.dot(xp_ref[...], wemb_ref[...], preferred_element_type=jnp.float32)

    for l in range(depth):                     # depth is static -> unrolled at trace time
        # ---- token mixing:  x + transpose(W2 @ gelu(W1 @ LN(x)^T + b1) + b2) ----
        y = _layernorm(x, ln1g_ref[l:l + 1, :], ln1b_ref[l:l + 1, :])         # (BB*T, C)
        y3 = y.reshape(BB, T, C)
        w1 = jnp.broadcast_to(tw1_ref[l][None], (BB, TOK, T))
        h3 = jnp.einsum("bjt,btc->bjc", w1, y3,
                        preferred_element_type=jnp.float32)                   # (BB, TOK, C)
        h3 = _gelu(h3 + tb1_ref[l][None])
        w2 = jnp.broadcast_to(tw2_ref[l][None], (BB, T, TOK))
        t3 = jnp.einsum("btj,bjc->btc", w2, h3,
                        preferred_element_type=jnp.float32) + tb2_ref[l][None]  # (BB, T, C)
        x = x + t3.reshape(BT, C)

        # ---- channel mixing: x + (gelu(LN(x) @ W1 + b1) @ W2 + b2) ----
        y = _layernorm(x, ln2g_ref[l:l + 1, :], ln2b_ref[l:l + 1, :])         # (BB*T, C)
        h = _gelu(jnp.dot(y, cw1_ref[l],
                          preferred_element_type=jnp.float32) + cb1_ref[l:l + 1, :])
        x = x + jnp.dot(h, cw2_ref[l],
                        preferred_element_type=jnp.float32) + cb2_ref[l:l + 1, :]

    # final LayerNorm -> mean over tokens -> classifier head (padded to 128 lanes)
    y = _layernorm(x, lng_ref[...], lnb_ref[...])                             # (BB*T, C)
    pooled = jnp.mean(y.reshape(BB, T, C), axis=1)                            # (BB, C)
    out_ref[0] = jnp.dot(pooled, fcw_ref[...],
                         preferred_element_type=jnp.float32) + fcb_ref[...]   # (BB, 128)


def _const_index_map(ndim):
    return lambda b: (0,) * ndim


def mlp_mixer_forward(images, params, *, patch_size, hidden_dim, depth, block_batch=128):
    B = images.shape[0]
    n = 28 // patch_size
    T, P, C = n * n, patch_size * patch_size, hidden_dim

    # glue: non-overlapping patches in row-major (i, j) token order — identical to
    # conv2d(stride=ps, no bias) -> flatten(2) -> transpose(1, 2).
    patches = images.reshape(B, 1, n, patch_size, n, patch_size)
    patches = patches.transpose(0, 2, 4, 1, 3, 5).reshape(B, T, P)

    # batch tiling: BB images per grid step (amortizes the ~600-cycle per-step overhead
    # and fills the MXU / 128-lane vregs).  Pad the batch up to a multiple of BB.
    BB = min(block_batch, B)
    G = pl.cdiv(B, BB)
    B_pad = G * BB
    if B_pad != B:
        patches = jnp.pad(patches, ((0, B_pad - B), (0, 0), (0, 0)))
    patches = patches.reshape(B_pad * T, P)      # rows grouped image-by-image

    # pad the classifier to 128 output lanes so the per-step store is lane-dense/unmasked
    fc_w = jnp.pad(params["fc_w"], ((0, 0), (0, NUM_CLASSES_PAD - NUM_CLASSES)))
    fc_b = jnp.pad(params["fc_b"], ((0, 0), (0, NUM_CLASSES_PAD - NUM_CLASSES)))

    ordered = [
        patches, params["w_emb"],
        params["ln1_g"], params["ln1_b"],
        params["tok_w1"], params["tok_b1"], params["tok_w2"], params["tok_b2"],
        params["ln2_g"], params["ln2_b"],
        params["ch_w1"], params["ch_b1"], params["ch_w2"], params["ch_b2"],
        params["ln_g"], params["ln_b"],
        fc_w, fc_b,
    ]

    in_specs = [pl.BlockSpec((BB * T, P), lambda b: (b, 0))]
    in_specs += [pl.BlockSpec(a.shape, _const_index_map(a.ndim)) for a in ordered[1:]]
    out_spec = pl.BlockSpec((1, BB, NUM_CLASSES_PAD), lambda b: (b, 0, 0))

    out = pl.pallas_call(
        functools.partial(_mixer_kernel, depth),
        out_shape=jax.ShapeDtypeStruct((G, BB, NUM_CLASSES_PAD), jnp.float32),
        grid=(G,),
        in_specs=in_specs,
        out_specs=out_spec,
        compiler_params=pltpu.CompilerParams(dimension_semantics=("parallel",)),
    )(*ordered)

    return out.reshape(B_pad, NUM_CLASSES_PAD)[:B, :NUM_CLASSES]


def init_params(key, patch_size, hidden_dim, depth):
    """Deterministic synthetic parameters (PyTorch-style uniform(-1/sqrt(fan_in), ...))."""
    n = 28 // patch_size
    T, P, C = n * n, patch_size * patch_size, hidden_dim

    keys = jax.random.split(key, 3 + 8 * depth)
    kidx = [0]

    def nxt():
        k = keys[kidx[0]]
        kidx[0] += 1
        return k

    def lin(fan_in, shape):
        bound = 1.0 / math.sqrt(fan_in)
        return jax.random.uniform(nxt(), shape, jnp.float32, -bound, bound)

    p = {}
    # conv weight (C, 1, ps, ps) flattened + transposed to (P, C) for right-mult
    p["w_emb"] = lin(P, (P, C))

    ln1_g, ln1_b, ln2_g, ln2_b = [], [], [], []
    tw1, tb1, tw2, tb2 = [], [], [], []
    cw1, cb1, cw2, cb2 = [], [], [], []
    for _ in range(depth):
        ln1_g.append(jnp.ones((C,), jnp.float32))
        ln1_b.append(jnp.zeros((C,), jnp.float32))
        # token-mix weights stored for LEFT multiplication (same orientation as torch W)
        tw1.append(lin(T, (TOK_MLP, T)))
        tb1.append(lin(T, (TOK_MLP, 1)))
        tw2.append(lin(TOK_MLP, (T, TOK_MLP)))
        tb2.append(lin(TOK_MLP, (T, 1)))
        ln2_g.append(jnp.ones((C,), jnp.float32))
        ln2_b.append(jnp.zeros((C,), jnp.float32))
        # channel-mix weights stored transposed for RIGHT multiplication
        cw1.append(lin(C, (C, CH_MLP)))
        cb1.append(lin(C, (CH_MLP,)))
        cw2.append(lin(CH_MLP, (CH_MLP, C)))
        cb2.append(lin(CH_MLP, (C,)))

    p["ln1_g"], p["ln1_b"] = jnp.stack(ln1_g), jnp.stack(ln1_b)
    p["tok_w1"], p["tok_b1"] = jnp.stack(tw1), jnp.stack(tb1)
    p["tok_w2"], p["tok_b2"] = jnp.stack(tw2), jnp.stack(tb2)
    p["ln2_g"], p["ln2_b"] = jnp.stack(ln2_g), jnp.stack(ln2_b)
    p["ch_w1"], p["ch_b1"] = jnp.stack(cw1), jnp.stack(cb1)
    p["ch_w2"], p["ch_b2"] = jnp.stack(cw2), jnp.stack(cb2)

    p["ln_g"] = jnp.ones((1, C), jnp.float32)
    p["ln_b"] = jnp.zeros((1, C), jnp.float32)
    p["fc_w"] = lin(C, (C, NUM_CLASSES))
    p["fc_b"] = lin(C, (1, NUM_CLASSES))
    return p


def reference_forward(images, params, *, patch_size, hidden_dim, depth):
    """Pure-JAX reference mirroring the PyTorch forward exactly (f32 / HIGHEST)."""
    B = images.shape[0]
    n = 28 // patch_size
    T, P, C = n * n, patch_size * patch_size, hidden_dim
    hp = jax.lax.Precision.HIGHEST

    patches = images.reshape(B, 1, n, patch_size, n, patch_size)
    patches = patches.transpose(0, 2, 4, 1, 3, 5).reshape(B, T, P)

    def ln(x, g, b):
        mu = x.mean(-1, keepdims=True)
        var = ((x - mu) ** 2).mean(-1, keepdims=True)
        return (x - mu) / jnp.sqrt(var + EPS) * g + b

    def gelu(x):
        return 0.5 * x * (1.0 + jax.scipy.special.erf(x / math.sqrt(2.0)))

    x = jnp.einsum("btp,pc->btc", patches, params["w_emb"], precision=hp)
    for l in range(depth):
        y = ln(x, params["ln1_g"][l], params["ln1_b"][l])
        h = gelu(jnp.einsum("jt,btc->bjc", params["tok_w1"][l], y, precision=hp)
                 + params["tok_b1"][l])
        h = jnp.einsum("tj,bjc->btc", params["tok_w2"][l], h, precision=hp) \
            + params["tok_b2"][l]
        x = x + h
        y = ln(x, params["ln2_g"][l], params["ln2_b"][l])
        h = gelu(jnp.einsum("btc,ck->btk", y, params["ch_w1"][l], precision=hp)
                 + params["ch_b1"][l])
        x = x + jnp.einsum("btk,kc->btc", h, params["ch_w2"][l], precision=hp) \
            + params["ch_b2"][l]
    y = ln(x, params["ln_g"][0], params["ln_b"][0])
    pooled = y.mean(axis=1)
    return jnp.einsum("bc,ck->bk", pooled, params["fc_w"], precision=hp) + params["fc_b"][0]


if __name__ == "__main__":
    patch_size, hidden_dim, depth = 7, 32, 2   # 28 % 7 == 0, depth > 1
    B = 8

    key = jax.random.PRNGKey(0)
    k_data, k_params = jax.random.split(key)
    images = jax.random.normal(k_data, (B, 1, 28, 28), jnp.float32)
    params = init_params(k_params, patch_size, hidden_dim, depth)

    out = mlp_mixer_forward(images, params,
                            patch_size=patch_size, hidden_dim=hidden_dim, depth=depth)
    out = jax.block_until_ready(out)

    ref = reference_forward(images, params,
                            patch_size=patch_size, hidden_dim=hidden_dim, depth=depth)

    # Kernel matmuls use default (single-pass bf16) MXU precision per the perf review,
    # while the reference is f32/HIGHEST — tolerance reflects the bf16 input rounding.
    assert out.shape == (B, NUM_CLASSES), out.shape
    assert jnp.allclose(out, ref, atol=2e-2, rtol=2e-2), (out, ref)

    # also exercise a multi-step grid with batch padding (6 images, 4 per step -> pad to 8)
    out2 = mlp_mixer_forward(images[:6], params,
                             patch_size=patch_size, hidden_dim=hidden_dim, depth=depth,
                             block_batch=4)
    out2 = jax.block_until_ready(out2)
    assert jnp.allclose(out2, ref[:6], atol=2e-2, rtol=2e-2), (out2, ref[:6])

    print("KERNEL_OK")
</pallas_src>

<mosaic_0001>
module attributes {stable_mosaic.version = 11 : i64} {
  func.func @_mixer_kernel(%arg0: i32, %arg1: memref<128x49xf32, #tpu.memory_space<vmem>>, %arg2: memref<49x32xf32, #tpu.memory_space<vmem>>, %arg3: memref<2x32xf32, #tpu.memory_space<vmem>>, %arg4: memref<2x32xf32, #tpu.memory_space<vmem>>, %arg5: memref<2x16x16xf32, #tpu.memory_space<vmem>>, %arg6: memref<2x16x1xf32, #tpu.memory_space<vmem>>, %arg7: memref<2x16x16xf32, #tpu.memory_space<vmem>>, %arg8: memref<2x16x1xf32, #tpu.memory_space<vmem>>, %arg9: memref<2x32xf32, #tpu.memory_space<vmem>>, %arg10: memref<2x32xf32, #tpu.memory_space<vmem>>, %arg11: memref<2x32x128xf32, #tpu.memory_space<vmem>>, %arg12: memref<2x128xf32, #tpu.memory_space<vmem>>, %arg13: memref<2x128x32xf32, #tpu.memory_space<vmem>>, %arg14: memref<2x32xf32, #tpu.memory_space<vmem>>, %arg15: memref<1x32xf32, #tpu.memory_space<vmem>>, %arg16: memref<1x32xf32, #tpu.memory_space<vmem>>, %arg17: memref<32x128xf32, #tpu.memory_space<vmem>>, %arg18: memref<1x128xf32, #tpu.memory_space<vmem>>, %arg19: memref<1x8x128xf32, #tpu.memory_space<vmem>>) attributes {dimension_semantics = [#tpu.dimension_semantics<parallel>], iteration_bounds = array<i64: 1>, scalar_prefetch = 0 : i64, scratch_operands = 0 : i64, tpu.core_type = #tpu.core_type<tc>, window_params = [{transform_indices = @transform_0, window_bounds = array<i64: 128, 49>}, {pipeline_mode = #tpu.pipeline_mode<synchronous>, transform_indices = @transform_1, window_bounds = array<i64: 49, 32>}, {pipeline_mode = #tpu.pipeline_mode<synchronous>, transform_indices = @transform_2, window_bounds = array<i64: 2, 32>}, {pipeline_mode = #tpu.pipeline_mode<synchronous>, transform_indices = @transform_3, window_bounds = array<i64: 2, 32>}, {pipeline_mode = #tpu.pipeline_mode<synchronous>, transform_indices = @transform_4, window_bounds = array<i64: 2, 16, 16>}, {pipeline_mode = #tpu.pipeline_mode<synchronous>, transform_indices = @transform_5, window_bounds = array<i64: 2, 16, 1>}, {pipeline_mode = #tpu.pipeline_mode<synchronous>, transform_indices = @transform_6, window_bounds = array<i64: 2, 16, 16>}, {pipeline_mode = #tpu.pipeline_mode<synchronous>, transform_indices = @transform_7, window_bounds = array<i64: 2, 16, 1>}, {pipeline_mode = #tpu.pipeline_mode<synchronous>, transform_indices = @transform_8, window_bounds = array<i64: 2, 32>}, {pipeline_mode = #tpu.pipeline_mode<synchronous>, transform_indices = @transform_9, window_bounds = array<i64: 2, 32>}, {pipeline_mode = #tpu.pipeline_mode<synchronous>, transform_indices = @transform_10, window_bounds = array<i64: 2, 32, 128>}, {pipeline_mode = #tpu.pipeline_mode<synchronous>, transform_indices = @transform_11, window_bounds = array<i64: 2, 128>}, {pipeline_mode = #tpu.pipeline_mode<synchronous>, transform_indices = @transform_12, window_bounds = array<i64: 2, 128, 32>}, {pipeline_mode = #tpu.pipeline_mode<synchronous>, transform_indices = @transform_13, window_bounds = array<i64: 2, 32>}, {pipeline_mode = #tpu.pipeline_mode<synchronous>, transform_indices = @transform_14, window_bounds = array<i64: 1, 32>}, {pipeline_mode = #tpu.pipeline_mode<synchronous>, transform_indices = @transform_15, window_bounds = array<i64: 1, 32>}, {pipeline_mode = #tpu.pipeline_mode<synchronous>, transform_indices = @transform_16, window_bounds = array<i64: 32, 128>}, {pipeline_mode = #tpu.pipeline_mode<synchronous>, transform_indices = @transform_17, window_bounds = array<i64: 1, 128>}, {transform_indices = @transform_18, window_bounds = array<i64: 1, 8, 128>}]} {
    %c0 = arith.constant 0 : index
    %c0_0 = arith.constant 0 : index
    %0 = vector.load %arg1[%c0, %c0_0] : memref<128x49xf32, #tpu.memory_space<vmem>>, vector<128x49xf32>
    %c0_1 = arith.constant 0 : index
    %c0_2 = arith.constant 0 : index
    %1 = vector.load %arg2[%c0_1, %c0_2] : memref<49x32xf32, #tpu.memory_space<vmem>>, vector<49x32xf32>
    %cst = arith.constant dense<0.000000e+00> : vector<128x32xf32>
    %2 = tpu.matmul %0, %1, %cst {dimension_numbers = #tpu.dot_dimension_numbers<[1], [0], [0], [1], [0, 0, 1, 1], [], []>} : vector<128x49xf32>, vector<49x32xf32>, vector<128x32xf32> -> vector<128x32xf32>
    %c0_3 = arith.constant 0 : index
    %c0_4 = arith.constant 0 : index
    %3 = vector.load %arg3[%c0_3, %c0_4] : memref<2x32xf32, #tpu.memory_space<vmem>>, vector<1x32xf32>
    %c0_5 = arith.constant 0 : index
    %c0_6 = arith.constant 0 : index
    %4 = vector.load %arg4[%c0_5, %c0_6] : memref<2x32xf32, #tpu.memory_space<vmem>>, vector<1x32xf32>
    %cst_7 = arith.constant dense<0.000000e+00> : vector<128xf32>
    %5 = vector.multi_reduction <add>, %2, %cst_7 [1] : vector<128x32xf32> to vector<128xf32>
    %6 = vector.shape_cast %5 : vector<128xf32> to vector<128x1xf32>
    %cst_8 = arith.constant 3.200000e+01 : f32
    %7 = vector.broadcast %cst_8 : f32 to vector<128x1xf32>
    %8 = arith.divf %6, %7 : vector<128x1xf32>
    %9 = vector.broadcast %8 : vector<128x1xf32> to vector<128x32xf32>
    %10 = arith.subf %2, %9 : vector<128x32xf32>
    %11 = arith.mulf %10, %10 : vector<128x32xf32>
    %cst_9 = arith.constant dense<0.000000e+00> : vector<128xf32>
    %12 = vector.multi_reduction <add>, %11, %cst_9 [1] : vector<128x32xf32> to vector<128xf32>
    %13 = vector.shape_cast %12 : vector<128xf32> to vector<128x1xf32>
    %cst_10 = arith.constant 3.200000e+01 : f32
    %14 = vector.broadcast %cst_10 : f32 to vector<128x1xf32>
    %15 = arith.divf %13, %14 : vector<128x1xf32>
    %16 = vector.broadcast %8 : vector<128x1xf32> to vector<128x32xf32>
    %17 = arith.subf %2, %16 : vector<128x32xf32>
    %cst_11 = arith.constant 9.99999974E-6 : f32
    %18 = vector.broadcast %cst_11 : f32 to vector<128x1xf32>
    %19 = arith.addf %15, %18 : vector<128x1xf32>
    %20 = math.rsqrt %19 : vector<128x1xf32>
    %21 = vector.broadcast %20 : vector<128x1xf32> to vector<128x32xf32>
    %22 = arith.mulf %17, %21 : vector<128x32xf32>
    %23 = vector.broadcast %3 : vector<1x32xf32> to vector<128x32xf32>
    %24 = arith.mulf %22, %23 : vector<128x32xf32>
    %25 = vector.broadcast %4 : vector<1x32xf32> to vector<128x32xf32>
    %26 = arith.addf %24, %25 : vector<128x32xf32>
    %27 = vector.shape_cast %26 : vector<128x32xf32> to vector<8x16x32xf32>
    %c0_12 = arith.constant 0 : index
    %c0_13 = arith.constant 0 : index
    %c0_14 = arith.constant 0 : index
    %28 = vector.load %arg5[%c0_12, %c0_13, %c0_14] : memref<2x16x16xf32, #tpu.memory_space<vmem>>, vector<1x16x16xf32>
    %29 = vector.shape_cast %28 : vector<1x16x16xf32> to vector<16x16xf32>
    %30 = vector.shape_cast %29 : vector<16x16xf32> to vector<1x16x16xf32>
    %31 = vector.shape_cast %30 : vector<1x16x16xf32> to vector<1x16x16xf32>
    %32 = vector.broadcast %31 : vector<1x16x16xf32> to vector<8x16x16xf32>
    "tpu.trace_start"() <{level = 10 : i32, message = "bjt,btc->bjc"}> : () -> ()
    %cst_15 = arith.constant dense<0.000000e+00> : vector<8x16x32xf32>
    %33 = tpu.matmul %32, %27, %cst_15 {dimension_numbers = #tpu.dot_dimension_numbers<[2], [1], [1], [2], [0, 0, 0, 1, 1, 2], [0], [0]>} : vector<8x16x16xf32>, vector<8x16x32xf32>, vector<8x16x32xf32> -> vector<8x16x32xf32>
    "tpu.trace_stop"() : () -> ()
    %c0_16 = arith.constant 0 : index
    %c0_17 = arith.constant 0 : index
    %c0_18 = arith.constant 0 : index
    %34 = vector.load %arg6[%c0_16, %c0_17, %c0_18] : memref<2x16x1xf32, #tpu.memory_space<vmem>>, vector<1x16x1xf32>
    %35 = vector.shape_cast %34 : vector<1x16x1xf32> to vector<16x1xf32>
    %36 = vector.shape_cast %35 : vector<16x1xf32> to vector<1x16x1xf32>
    %37 = vector.broadcast %36 : vector<1x16x1xf32> to vector<8x16x32xf32>
    %38 = arith.addf %33, %37 : vector<8x16x32xf32>
    %cst_19 = arith.constant 5.000000e-01 : f32
    %39 = vector.broadcast %cst_19 : f32 to vector<8x16x32xf32>
    %40 = arith.mulf %39, %38 : vector<8x16x32xf32>
    %cst_20 = arith.constant 0.707106769 : f32
    %41 = vector.broadcast %cst_20 : f32 to vector<8x16x32xf32>
    %42 = arith.mulf %38, %41 : vector<8x16x32xf32>
    %43 = math.erf %42 : vector<8x16x32xf32>
    %cst_21 = arith.constant 1.000000e+00 : f32
    %44 = vector.broadcast %cst_21 : f32 to vector<8x16x32xf32>
    %45 = arith.addf %44, %43 : vector<8x16x32xf32>
    %46 = arith.mulf %40, %45 : vector<8x16x32xf32>
    %c0_22 = arith.constant 0 : index
    %c0_23 = arith.constant 0 : index
    %c0_24 = arith.constant 0 : index
    %47 = vector.load %arg7[%c0_22, %c0_23, %c0_24] : memref<2x16x16xf32, #tpu.memory_space<vmem>>, vector<1x16x16xf32>
    %48 = vector.shape_cast %47 : vector<1x16x16xf32> to vector<16x16xf32>
    %49 = vector.shape_cast %48 : vector<16x16xf32> to vector<1x16x16xf32>
    %50 = vector.shape_cast %49 : vector<1x16x16xf32> to vector<1x16x16xf32>
    %51 = vector.broadcast %50 : vector<1x16x16xf32> to vector<8x16x16xf32>
    "tpu.trace_start"() <{level = 10 : i32, message = "btj,bjc->btc"}> : () -> ()
    %cst_25 = arith.constant dense<0.000000e+00> : vector<8x16x32xf32>
    %52 = tpu.matmul %51, %46, %cst_25 {dimension_numbers = #tpu.dot_dimension_numbers<[2], [1], [1], [2], [0, 0, 0, 1, 1, 2], [0], [0]>} : vector<8x16x16xf32>, vector<8x16x32xf32>, vector<8x16x32xf32> -> vector<8x16x32xf32>
    "tpu.trace_stop"() : () -> ()
    %c0_26 = arith.constant 0 : index
    %c0_27 = arith.constant 0 : index
    %c0_28 = arith.constant 0 : index
    %53 = vector.load %arg8[%c0_26, %c0_27, %c0_28] : memref<2x16x1xf32, #tpu.memory_space<vmem>>, vector<1x16x1xf32>
    %54 = vector.shape_cast %53 : vector<1x16x1xf32> to vector<16x1xf32>
    %55 = vector.shape_cast %54 : vector<16x1xf32> to vector<1x16x1xf32>
    %56 = vector.broadcast %55 : vector<1x16x1xf32> to vector<8x16x32xf32>
    %57 = arith.addf %52, %56 : vector<8x16x32xf32>
    %58 = vector.shape_cast %57 : vector<8x16x32xf32> to vector<128x32xf32>
    %59 = arith.addf %2, %58 : vector<128x32xf32>
    %c0_29 = arith.constant 0 : index
    %c0_30 = arith.constant 0 : index
    %60 = vector.load %arg9[%c0_29, %c0_30] : memref<2x32xf32, #tpu.memory_space<vmem>>, vector<1x32xf32>
    %c0_31 = arith.constant 0 : index
    %c0_32 = arith.constant 0 : index
    %61 = vector.load %arg10[%c0_31, %c0_32] : memref<2x32xf32, #tpu.memory_space<vmem>>, vector<1x32xf32>
    %cst_33 = arith.constant dense<0.000000e+00> : vector<128xf32>
    %62 = vector.multi_reduction <add>, %59, %cst_33 [1] : vector<128x32xf32> to vector<128xf32>
    %63 = vector.shape_cast %62 : vector<128xf32> to vector<128x1xf32>
    %cst_34 = arith.constant 3.200000e+01 : f32
    %64 = vector.broadcast %cst_34 : f32 to vector<128x1xf32>
    %65 = arith.divf %63, %64 : vector<128x1xf32>
    %66 = vector.broadcast %65 : vector<128x1xf32> to vector<128x32xf32>
    %67 = arith.subf %59, %66 : vector<128x32xf32>
    %68 = arith.mulf %67, %67 : vector<128x32xf32>
    %cst_35 = arith.constant dense<0.000000e+00> : vector<128xf32>
    %69 = vector.multi_reduction <add>, %68, %cst_35 [1] : vector<128x32xf32> to vector<128xf32>
    %70 = vector.shape_cast %69 : vector<128xf32> to vector<128x1xf32>
    %cst_36 = arith.constant 3.200000e+01 : f32
    %71 = vector.broadcast %cst_36 : f32 to vector<128x1xf32>
    %72 = arith.divf %70, %71 : vector<128x1xf32>
    %73 = vector.broadcast %65 : vector<128x1xf32> to vector<128x32xf32>
    %74 = arith.subf %59, %73 : vector<128x32xf32>
    %cst_37 = arith.constant 9.99999974E-6 : f32
    %75 = vector.broadcast %cst_37 : f32 to vector<128x1xf32>
    %76 = arith.addf %72, %75 : vector<128x1xf32>
    %77 = math.rsqrt %76 : vector<128x1xf32>
    %78 = vector.broadcast %77 : vector<128x1xf32> to vector<128x32xf32>
    %79 = arith.mulf %74, %78 : vector<128x32xf32>
    %80 = vector.broadcast %60 : vector<1x32xf32> to vector<128x32xf32>
    %81 = arith.mulf %79, %80 : vector<128x32xf32>
    %82 = vector.broadcast %61 : vector<1x32xf32> to vector<128x32xf32>
    %83 = arith.addf %81, %82 : vector<128x32xf32>
    %c0_38 = arith.constant 0 : index
    %c0_39 = arith.constant 0 : index
    %c0_40 = arith.constant 0 : index
    %84 = vector.load %arg11[%c0_38, %c0_39, %c0_40] : memref<2x32x128xf32, #tpu.memory_space<vmem>>, vector<1x32x128xf32>
    %85 = vector.shape_cast %84 : vector<1x32x128xf32> to vector<32x128xf32>
    %cst_41 = arith.constant dense<0.000000e+00> : vector<128x128xf32>
    %86 = tpu.matmul %83, %85, %cst_41 {dimension_numbers = #tpu.dot_dimension_numbers<[1], [0], [0], [1], [0, 0, 1, 1], [], []>} : vector<128x32xf32>, vector<32x128xf32>, vector<128x128xf32> -> vector<128x128xf32>
    %c0_42 = arith.constant 0 : index
    %c0_43 = arith.constant 0 : index
    %87 = vector.load %arg12[%c0_42, %c0_43] : memref<2x128xf32, #tpu.memory_space<vmem>>, vector<1x128xf32>
    %88 = vector.broadcast %87 : vector<1x128xf32> to vector<128x128xf32>
    %89 = arith.addf %86, %88 : vector<128x128xf32>
    %cst_44 = arith.constant 5.000000e-01 : f32
    %90 = vector.broadcast %cst_44 : f32 to vector<128x128xf32>
    %91 = arith.mulf %90, %89 : vector<128x128xf32>
    %cst_45 = arith.constant 0.707106769 : f32
    %92 = vector.broadcast %cst_45 : f32 to vector<128x128xf32>
    %93 = arith.mulf %89, %92 : vector<128x128xf32>
    %94 = math.erf %93 : vector<128x128xf32>
    %cst_46 = arith.constant 1.000000e+00 : f32
    %95 = vector.broadcast %cst_46 : f32 to vector<128x128xf32>
    %96 = arith.addf %95, %94 : vector<128x128xf32>
    %97 = arith.mulf %91, %96 : vector<128x128xf32>
    %c0_47 = arith.constant 0 : index
    %c0_48 = arith.constant 0 : index
    %c0_49 = arith.constant 0 : index
    %98 = vector.load %arg13[%c0_47, %c0_48, %c0_49] : memref<2x128x32xf32, #tpu.memory_space<vmem>>, vector<1x128x32xf32>
    %99 = vector.shape_cast %98 : vector<1x128x32xf32> to vector<128x32xf32>
    %cst_50 = arith.constant dense<0.000000e+00> : vector<128x32xf32>
    %100 = tpu.matmul %97, %99, %cst_50 {dimension_numbers = #tpu.dot_dimension_numbers<[1], [0], [0], [1], [0, 0, 1, 1], [], []>} : vector<128x128xf32>, vector<128x32xf32>, vector<128x32xf32> -> vector<128x32xf32>
    %101 = arith.addf %59, %100 : vector<128x32xf32>
    %c0_51 = arith.constant 0 : index
    %c0_52 = arith.constant 0 : index
    %102 = vector.load %arg14[%c0_51, %c0_52] : memref<2x32xf32, #tpu.memory_space<vmem>>, vector<1x32xf32>
    %103 = vector.broadcast %102 : vector<1x32xf32> to vector<128x32xf32>
    %104 = arith.addf %101, %103 : vector<128x32xf32>
    %c1 = arith.constant 1 : index
    %c0_53 = arith.constant 0 : index
    %105 = vector.load %arg3[%c1, %c0_53] : memref<2x32xf32, #tpu.memory_space<vmem>>, vector<1x32xf32>
    %c1_54 = arith.constant 1 : index
    %c0_55 = arith.constant 0 : index
    %106 = vector.load %arg4[%c1_54, %c0_55] : memref<2x32xf32, #tpu.memory_space<vmem>>, vector<1x32xf32>
    %cst_56 = arith.constant dense<0.000000e+00> : vector<128xf32>
    %107 = vector.multi_reduction <add>, %104, %cst_56 [1] : vector<128x32xf32> to vector<128xf32>
    %108 = vector.shape_cast %107 : vector<128xf32> to vector<128x1xf32>
    %cst_57 = arith.constant 3.200000e+01 : f32
    %109 = vector.broadcast %cst_57 : f32 to vector<128x1xf32>
    %110 = arith.divf %108, %109 : vector<128x1xf32>
    %111 = vector.broadcast %110 : vector<128x1xf32> to vector<128x32xf32>
    %112 = arith.subf %104, %111 : vector<128x32xf32>
    %113 = arith.mulf %112, %112 : vector<128x32xf32>
    %cst_58 = arith.constant dense<0.000000e+00> : vector<128xf32>
    %114 = vector.multi_reduction <add>, %113, %cst_58 [1] : vector<128x32xf32> to vector<128xf32>
    %115 = vector.shape_cast %114 : vector<128xf32> to vector<128x1xf32>
    %cst_59 = arith.constant 3.200000e+01 : f32
    %116 = vector.broadcast %cst_59 : f32 to vector<128x1xf32>
    %117 = arith.divf %115, %116 : vector<128x1xf32>
    %118 = vector.broadcast %110 : vector<128x1xf32> to vector<128x32xf32>
    %119 = arith.subf %104, %118 : vector<128x32xf32>
    %cst_60 = arith.constant 9.99999974E-6 : f32
    %120 = vector.broadcast %cst_60 : f32 to vector<128x1xf32>
    %121 = arith.addf %117, %120 : vector<128x1xf32>
    %122 = math.rsqrt %121 : vector<128x1xf32>
    %123 = vector.broadcast %122 : vector<128x1xf32> to vector<128x32xf32>
    %124 = arith.mulf %119, %123 : vector<128x32xf32>
    %125 = vector.broadcast %105 : vector<1x32xf32> to vector<128x32xf32>
    %126 = arith.mulf %124, %125 : vector<128x32xf32>
    %127 = vector.broadcast %106 : vector<1x32xf32> to vector<128x32xf32>
    %128 = arith.addf %126, %127 : vector<128x32xf32>
    %129 = vector.shape_cast %128 : vector<128x32xf32> to vector<8x16x32xf32>
    %c1_61 = arith.constant 1 : index
    %c0_62 = arith.constant 0 : index
    %c0_63 = arith.constant 0 : index
    %130 = vector.load %arg5[%c1_61, %c0_62, %c0_63] : memref<2x16x16xf32, #tpu.memory_space<vmem>>, vector<1x16x16xf32>
    %131 = vector.shape_cast %130 : vector<1x16x16xf32> to vector<16x16xf32>
    %132 = vector.shape_cast %131 : vector<16x16xf32> to vector<1x16x16xf32>
    %133 = vector.shape_cast %132 : vector<1x16x16xf32> to vector<1x16x16xf32>
    %134 = vector.broadcast %133 : vector<1x16x16xf32> to vector<8x16x16xf32>
    "tpu.trace_start"() <{level = 10 : i32, message = "bjt,btc->bjc"}> : () -> ()
    %cst_64 = arith.constant dense<0.000000e+00> : vector<8x16x32xf32>
    %135 = tpu.matmul %134, %129, %cst_64 {dimension_numbers = #tpu.dot_dimension_numbers<[2], [1], [1], [2], [0, 0, 0, 1, 1, 2], [0], [0]>} : vector<8x16x16xf32>, vector<8x16x32xf32>, vector<8x16x32xf32> -> vector<8x16x32xf32>
    "tpu.trace_stop"() : () -> ()
    %c1_65 = arith.constant 1 : index
    %c0_66 = arith.constant 0 : index
    %c0_67 = arith.constant 0 : index
    %136 = vector.load %arg6[%c1_65, %c0_66, %c0_67] : memref<2x16x1xf32, #tpu.memory_space<vmem>>, vector<1x16x1xf32>
    %137 = vector.shape_cast %136 : vector<1x16x1xf32> to vector<16x1xf32>
    %138 = vector.shape_cast %137 : vector<16x1xf32> to vector<1x16x1xf32>
    %139 = vector.broadcast %138 : vector<1x16x1xf32> to vector<8x16x32xf32>
    %140 = arith.addf %135, %139 : vector<8x16x32xf32>
    %cst_68 = arith.constant 5.000000e-01 : f32
    %141 = vector.broadcast %cst_68 : f32 to vector<8x16x32xf32>
    %142 = arith.mulf %141, %140 : vector<8x16x32xf32>
    %cst_69 = arith.constant 0.707106769 : f32
    %143 = vector.broadcast %cst_69 : f32 to vector<8x16x32xf32>
    %144 = arith.mulf %140, %143 : vector<8x16x32xf32>
    %145 = math.erf %144 : vector<8x16x32xf32>
    %cst_70 = arith.constant 1.000000e+00 : f32
    %146 = vector.broadcast %cst_70 : f32 to vector<8x16x32xf32>
    %147 = arith.addf %146, %145 : vector<8x16x32xf32>
    %148 = arith.mulf %142, %147 : vector<8x16x32xf32>
    %c1_71 = arith.constant 1 : index
    %c0_72 = arith.constant 0 : index
    %c0_73 = arith.constant 0 : index
    %149 = vector.load %arg7[%c1_71, %c0_72, %c0_73] : memref<2x16x16xf32, #tpu.memory_space<vmem>>, vector<1x16x16xf32>
    %150 = vector.shape_cast %149 : vector<1x16x16xf32> to vector<16x16xf32>
    %151 = vector.shape_cast %150 : vector<16x16xf32> to vector<1x16x16xf32>
    %152 = vector.shape_cast %151 : vector<1x16x16xf32> to vector<1x16x16xf32>
    %153 = vector.broadcast %152 : vector<1x16x16xf32> to vector<8x16x16xf32>
    "tpu.trace_start"() <{level = 10 : i32, message = "btj,bjc->btc"}> : () -> ()
    %cst_74 = arith.constant dense<0.000000e+00> : vector<8x16x32xf32>
    %154 = tpu.matmul %153, %148, %cst_74 {dimension_numbers = #tpu.dot_dimension_numbers<[2], [1], [1], [2], [0, 0, 0, 1, 1, 2], [0], [0]>} : vector<8x16x16xf32>, vector<8x16x32xf32>, vector<8x16x32xf32> -> vector<8x16x32xf32>
    "tpu.trace_stop"() : () -> ()
    %c1_75 = arith.constant 1 : index
    %c0_76 = arith.constant 0 : index
    %c0_77 = arith.constant 0 : index
    %155 = vector.load %arg8[%c1_75, %c0_76, %c0_77] : memref<2x16x1xf32, #tpu.memory_space<vmem>>, vector<1x16x1xf32>
    %156 = vector.shape_cast %155 : vector<1x16x1xf32> to vector<16x1xf32>
    %157 = vector.shape_cast %156 : vector<16x1xf32> to vector<1x16x1xf32>
    %158 = vector.broadcast %157 : vector<1x16x1xf32> to vector<8x16x32xf32>
    %159 = arith.addf %154, %158 : vector<8x16x32xf32>
    %160 = vector.shape_cast %159 : vector<8x16x32xf32> to vector<128x32xf32>
    %161 = arith.addf %104, %160 : vector<128x32xf32>
    %c1_78 = arith.constant 1 : index
    %c0_79 = arith.constant 0 : index
    %162 = vector.load %arg9[%c1_78, %c0_79] : memref<2x32xf32, #tpu.memory_space<vmem>>, vector<1x32xf32>
    %c1_80 = arith.constant 1 : index
    %c0_81 = arith.constant 0 : index
    %163 = vector.load %arg10[%c1_80, %c0_81] : memref<2x32xf32, #tpu.memory_space<vmem>>, vector<1x32xf32>
    %cst_82 = arith.constant dense<0.000000e+00> : vector<128xf32>
    %164 = vector.multi_reduction <add>, %161, %cst_82 [1] : vector<128x32xf32> to vector<128xf32>
    %165 = vector.shape_cast %164 : vector<128xf32> to vector<128x1xf32>
    %cst_83 = arith.constant 3.200000e+01 : f32
    %166 = vector.broadcast %cst_83 : f32 to vector<128x1xf32>
    %167 = arith.divf %165, %166 : vector<128x1xf32>
    %168 = vector.broadcast %167 : vector<128x1xf32> to vector<128x32xf32>
    %169 = arith.subf %161, %168 : vector<128x32xf32>
    %170 = arith.mulf %169, %169 : vector<128x32xf32>
    %cst_84 = arith.constant dense<0.000000e+00> : vector<128xf32>
    %171 = vector.multi_reduction <add>, %170, %cst_84 [1] : vector<128x32xf32> to vector<128xf32>
    %172 = vector.shape_cast %171 : vector<128xf32> to vector<128x1xf32>
    %cst_85 = arith.constant 3.200000e+01 : f32
    %173 = vector.broadcast %cst_85 : f32 to vector<128x1xf32>
    %174 = arith.divf %172, %173 : vector<128x1xf32>
    %175 = vector.broadcast %167 : vector<128x1xf32> to vector<128x32xf32>
    %176 = arith.subf %161, %175 : vector<128x32xf32>
    %cst_86 = arith.constant 9.99999974E-6 : f32
    %177 = vector.broadcast %cst_86 : f32 to vector<128x1xf32>
    %178 = arith.addf %174, %177 : vector<128x1xf32>
    %179 = math.rsqrt %178 : vector<128x1xf32>
    %180 = vector.broadcast %179 : vector<128x1xf32> to vector<128x32xf32>
    %181 = arith.mulf %176, %180 : vector<128x32xf32>
    %182 = vector.broadcast %162 : vector<1x32xf32> to vector<128x32xf32>
    %183 = arith.mulf %181, %182 : vector<128x32xf32>
    %184 = vector.broadcast %163 : vector<1x32xf32> to vector<128x32xf32>
    %185 = arith.addf %183, %184 : vector<128x32xf32>
    %c1_87 = arith.constant 1 : index
    %c0_88 = arith.constant 0 : index
    %c0_89 = arith.constant 0 : index
    %186 = vector.load %arg11[%c1_87, %c0_88, %c0_89] : memref<2x32x128xf32, #tpu.memory_space<vmem>>, vector<1x32x128xf32>
    %187 = vector.shape_cast %186 : vector<1x32x128xf32> to vector<32x128xf32>
    %cst_90 = arith.constant dense<0.000000e+00> : vector<128x128xf32>
    %188 = tpu.matmul %185, %187, %cst_90 {dimension_numbers = #tpu.dot_dimension_numbers<[1], [0], [0], [1], [0, 0, 1, 1], [], []>} : vector<128x32xf32>, vector<32x128xf32>, vector<128x128xf32> -> vector<128x128xf32>
    %c1_91 = arith.constant 1 : index
    %c0_92 = arith.constant 0 : index
    %189 = vector.load %arg12[%c1_91, %c0_92] : memref<2x128xf32, #tpu.memory_space<vmem>>, vector<1x128xf32>
    %190 = vector.broadcast %189 : vector<1x128xf32> to vector<128x128xf32>
    %191 = arith.addf %188, %190 : vector<128x128xf32>
    %cst_93 = arith.constant 5.000000e-01 : f32
    %192 = vector.broadcast %cst_93 : f32 to vector<128x128xf32>
    %193 = arith.mulf %192, %191 : vector<128x128xf32>
    %cst_94 = arith.constant 0.707106769 : f32
    %194 = vector.broadcast %cst_94 : f32 to vector<128x128xf32>
    %195 = arith.mulf %191, %194 : vector<128x128xf32>
    %196 = math.erf %195 : vector<128x128xf32>
    %cst_95 = arith.constant 1.000000e+00 : f32
    %197 = vector.broadcast %cst_95 : f32 to vector<128x128xf32>
    %198 = arith.addf %197, %196 : vector<128x128xf32>
    %199 = arith.mulf %193, %198 : vector<128x128xf32>
    %c1_96 = arith.constant 1 : index
    %c0_97 = arith.constant 0 : index
    %c0_98 = arith.constant 0 : index
    %200 = vector.load %arg13[%c1_96, %c0_97, %c0_98] : memref<2x128x32xf32, #tpu.memory_space<vmem>>, vector<1x128x32xf32>
    %201 = vector.shape_cast %200 : vector<1x128x32xf32> to vector<128x32xf32>
    %cst_99 = arith.constant dense<0.000000e+00> : vector<128x32xf32>
    %202 = tpu.matmul %199, %201, %cst_99 {dimension_numbers = #tpu.dot_dimension_numbers<[1], [0], [0], [1], [0, 0, 1, 1], [], []>} : vector<128x128xf32>, vector<128x32xf32>, vector<128x32xf32> -> vector<128x32xf32>
    %203 = arith.addf %161, %202 : vector<128x32xf32>
    %c1_100 = arith.constant 1 : index
    %c0_101 = arith.constant 0 : index
    %204 = vector.load %arg14[%c1_100, %c0_101] : memref<2x32xf32, #tpu.memory_space<vmem>>, vector<1x32xf32>
    %205 = vector.broadcast %204 : vector<1x32xf32> to vector<128x32xf32>
    %206 = arith.addf %203, %205 : vector<128x32xf32>
    %c0_102 = arith.constant 0 : index
    %c0_103 = arith.constant 0 : index
    %207 = vector.load %arg15[%c0_102, %c0_103] : memref<1x32xf32, #tpu.memory_space<vmem>>, vector<1x32xf32>
    %c0_104 = arith.constant 0 : index
    %c0_105 = arith.constant 0 : index
    %208 = vector.load %arg16[%c0_104, %c0_105] : memref<1x32xf32, #tpu.memory_space<vmem>>, vector<1x32xf32>
    %cst_106 = arith.constant dense<0.000000e+00> : vector<128xf32>
    %209 = vector.multi_reduction <add>, %206, %cst_106 [1] : vector<128x32xf32> to vector<128xf32>
    %210 = vector.shape_cast %209 : vector<128xf32> to vector<128x1xf32>
    %cst_107 = arith.constant 3.200000e+01 : f32
    %211 = vector.broadcast %cst_107 : f32 to vector<128x1xf32>
    %212 = arith.divf %210, %211 : vector<128x1xf32>
    %213 = vector.broadcast %212 : vector<128x1xf32> to vector<128x32xf32>
    %214 = arith.subf %206, %213 : vector<128x32xf32>
    %215 = arith.mulf %214, %214 : vector<128x32xf32>
    %cst_108 = arith.constant dense<0.000000e+00> : vector<128xf32>
    %216 = vector.multi_reduction <add>, %215, %cst_108 [1] : vector<128x32xf32> to vector<128xf32>
    %217 = vector.shape_cast %216 : vector<128xf32> to vector<128x1xf32>
    %cst_109 = arith.constant 3.200000e+01 : f32
    %218 = vector.broadcast %cst_109 : f32 to vector<128x1xf32>
    %219 = arith.divf %217, %218 : vector<128x1xf32>
    %220 = vector.broadcast %212 : vector<128x1xf32> to vector<128x32xf32>
    %221 = arith.subf %206, %220 : vector<128x32xf32>
    %cst_110 = arith.constant 9.99999974E-6 : f32
    %222 = vector.broadcast %cst_110 : f32 to vector<128x1xf32>
    %223 = arith.addf %219, %222 : vector<128x1xf32>
    %224 = math.rsqrt %223 : vector<128x1xf32>
    %225 = vector.broadcast %224 : vector<128x1xf32> to vector<128x32xf32>
    %226 = arith.mulf %221, %225 : vector<128x32xf32>
    %227 = vector.broadcast %207 : vector<1x32xf32> to vector<128x32xf32>
    %228 = arith.mulf %226, %227 : vector<128x32xf32>
    %229 = vector.broadcast %208 : vector<1x32xf32> to vector<128x32xf32>
    %230 = arith.addf %228, %229 : vector<128x32xf32>
    %231 = vector.shape_cast %230 : vector<128x32xf32> to vector<8x16x32xf32>
    %cst_111 = arith.constant dense<0.000000e+00> : vector<8x32xf32>
    %232 = vector.multi_reduction <add>, %231, %cst_111 [1] : vector<8x16x32xf32> to vector<8x32xf32>
    %cst_112 = arith.constant 1.600000e+01 : f32
    %233 = vector.broadcast %cst_112 : f32 to vector<8x32xf32>
    %234 = arith.divf %232, %233 : vector<8x32xf32>
    %c0_113 = arith.constant 0 : index
    %c0_114 = arith.constant 0 : index
    %235 = vector.load %arg17[%c0_113, %c0_114] : memref<32x128xf32, #tpu.memory_space<vmem>>, vector<32x128xf32>
    %cst_115 = arith.constant dense<0.000000e+00> : vector<8x128xf32>
    %236 = tpu.matmul %234, %235, %cst_115 {dimension_numbers = #tpu.dot_dimension_numbers<[1], [0], [0], [1], [0, 0, 1, 1], [], []>} : vector<8x32xf32>, vector<32x128xf32>, vector<8x128xf32> -> vector<8x128xf32>
    %c0_116 = arith.constant 0 : index
    %c0_117 = arith.constant 0 : index
    %237 = vector.load %arg18[%c0_116, %c0_117] : memref<1x128xf32, #tpu.memory_space<vmem>>, vector<1x128xf32>
    %238 = vector.broadcast %237 : vector<1x128xf32> to vector<8x128xf32>
    %239 = arith.addf %236, %238 : vector<8x128xf32>
    %c0_118 = arith.constant 0 : index
    %c0_119 = arith.constant 0 : index
    %c0_120 = arith.constant 0 : index
    %240 = vector.load %arg19[%c0_118, %c0_119, %c0_120] : memref<1x8x128xf32, #tpu.memory_space<vmem>>, vector<1x8x128xf32>
    %241 = vector.shape_cast %240 : vector<1x8x128xf32> to vector<8x128xf32>
    %242 = vector.shape_cast %239 : vector<8x128xf32> to vector<1x8x128xf32>
    tpu.vector_store %arg19[%c0_118, %c0_119, %c0_120], %242 {strides = array<i32>} : memref<1x8x128xf32, #tpu.memory_space<vmem>>, vector<1x8x128xf32>,
    return
  }
  func.func @transform_0(%arg0: i32) -> (i32, i32) {
    %c0_i32 = arith.constant 0 : i32
    %c0_i32_0 = arith.constant 0 : i32
    return %arg0, %c0_i32 : i32, i32
  }
  func.func @transform_1(%arg0: i32) -> (i32, i32) {
    %c0_i32 = arith.constant 0 : i32
    %c0_i32_0 = arith.constant 0 : i32
    %c0_i32_1 = arith.constant 0 : i32
    return %c0_i32, %c0_i32_0 : i32, i32
  }
  func.func @transform_2(%arg0: i32) -> (i32, i32) {
    %c0_i32 = arith.constant 0 : i32
    %c0_i32_0 = arith.constant 0 : i32
    %c0_i32_1 = arith.constant 0 : i32
    return %c0_i32, %c0_i32_0 : i32, i32
  }
  func.func @transform_3(%arg0: i32) -> (i32, i32) {
    %c0_i32 = arith.constant 0 : i32
    %c0_i32_0 = arith.constant 0 : i32
    %c0_i32_1 = arith.constant 0 : i32
    return %c0_i32, %c0_i32_0 : i32, i32
  }
  func.func @transform_4(%arg0: i32) -> (i32, i32, i32) {
    %c0_i32 = arith.constant 0 : i32
    %c0_i32_0 = arith.constant 0 : i32
    %c0_i32_1 = arith.constant 0 : i32
    %c0_i32_2 = arith.constant 0 : i32
    return %c0_i32, %c0_i32_0, %c0_i32_1 : i32, i32, i32
  }
  func.func @transform_5(%arg0: i32) -> (i32, i32, i32) {
    %c0_i32 = arith.constant 0 : i32
    %c0_i32_0 = arith.constant 0 : i32
    %c0_i32_1 = arith.constant 0 : i32
    %c0_i32_2 = arith.constant 0 : i32
    return %c0_i32, %c0_i32_0, %c0_i32_1 : i32, i32, i32
  }
  func.func @transform_6(%arg0: i32) -> (i32, i32, i32) {
    %c0_i32 = arith.constant 0 : i32
    %c0_i32_0 = arith.constant 0 : i32
    %c0_i32_1 = arith.constant 0 : i32
    %c0_i32_2 = arith.constant 0 : i32
    return %c0_i32, %c0_i32_0, %c0_i32_1 : i32, i32, i32
  }
  func.func @transform_7(%arg0: i32) -> (i32, i32, i32) {
    %c0_i32 = arith.constant 0 : i32
    %c0_i32_0 = arith.constant 0 : i32
    %c0_i32_1 = arith.constant 0 : i32
    %c0_i32_2 = arith.constant 0 : i32
    return %c0_i32, %c0_i32_0, %c0_i32_1 : i32, i32, i32
  }
  func.func @transform_8(%arg0: i32) -> (i32, i32) {
    %c0_i32 = arith.constant 0 : i32
    %c0_i32_0 = arith.constant 0 : i32
    %c0_i32_1 = arith.constant 0 : i32
    return %c0_i32, %c0_i32_0 : i32, i32
  }
  func.func @transform_9(%arg0: i32) -> (i32, i32) {
    %c0_i32 = arith.constant 0 : i32
    %c0_i32_0 = arith.constant 0 : i32
    %c0_i32_1 = arith.constant 0 : i32
    return %c0_i32, %c0_i32_0 : i32, i32
  }
  func.func @transform_10(%arg0: i32) -> (i32, i32, i32) {
    %c0_i32 = arith.constant 0 : i32
    %c0_i32_0 = arith.constant 0 : i32
    %c0_i32_1 = arith.constant 0 : i32
    %c0_i32_2 = arith.constant 0 : i32
    return %c0_i32, %c0_i32_0, %c0_i32_1 : i32, i32, i32
  }
  func.func @transform_11(%arg0: i32) -> (i32, i32) {
    %c0_i32 = arith.constant 0 : i32
    %c0_i32_0 = arith.constant 0 : i32
    %c0_i32_1 = arith.constant 0 : i32
    return %c0_i32, %c0_i32_0 : i32, i32
  }
  func.func @transform_12(%arg0: i32) -> (i32, i32, i32) {
    %c0_i32 = arith.constant 0 : i32
    %c0_i32_0 = arith.constant 0 : i32
    %c0_i32_1 = arith.constant 0 : i32
    %c0_i32_2 = arith.constant 0 : i32
    return %c0_i32, %c0_i32_0, %c0_i32_1 : i32, i32, i32
  }
  func.func @transform_13(%arg0: i32) -> (i32, i32) {
    %c0_i32 = arith.constant 0 : i32
    %c0_i32_0 = arith.constant 0 : i32
    %c0_i32_1 = arith.constant 0 : i32
    return %c0_i32, %c0_i32_0 : i32, i32
  }
  func.func @transform_14(%arg0: i32) -> (i32, i32) {
    %c0_i32 = arith.constant 0 : i32
    %c0_i32_0 = arith.constant 0 : i32
    %c0_i32_1 = arith.constant 0 : i32
    return %c0_i32, %c0_i32_0 : i32, i32
  }
  func.func @transform_15(%arg0: i32) -> (i32, i32) {
    %c0_i32 = arith.constant 0 : i32
    %c0_i32_0 = arith.constant 0 : i32
    %c0_i32_1 = arith.constant 0 : i32
    return %c0_i32, %c0_i32_0 : i32, i32
  }
  func.func @transform_16(%arg0: i32) -> (i32, i32) {
    %c0_i32 = arith.constant 0 : i32
    %c0_i32_0 = arith.constant 0 : i32
    %c0_i32_1 = arith.constant 0 : i32
    return %c0_i32, %c0_i32_0 : i32, i32
  }
  func.func @transform_17(%arg0: i32) -> (i32, i32) {
    %c0_i32 = arith.constant 0 : i32
    %c0_i32_0 = arith.constant 0 : i32
    %c0_i32_1 = arith.constant 0 : i32
    return %c0_i32, %c0_i32_0 : i32, i32
  }
  func.func @transform_18(%arg0: i32) -> (i32, i32, i32) {
    %c0_i32 = arith.constant 0 : i32
    %c0_i32_0 = arith.constant 0 : i32
    %c0_i32_1 = arith.constant 0 : i32
    return %arg0, %c0_i32, %c0_i32_0 : i32, i32, i32
  }
}

</mosaic_0001>

<bundles_post_ra>
// kernel: tpu_custom_call.1
= control target key start
LH: loop header
LB: loop body
LE: loop exit
PB: predicated region body
PF: predicated region fallthrough
CT: control target
= control target key end

     0   :  { %s8622_s0 = inlined_call_operand.vmem [shape: f32[128,49], index: 0, kind: input, shape index: {}]   ;;  %s8623_s1 = inlined_call_operand.vmem [shape: f32[49,32], index: 1, kind: input, shape index: {}]   ;;  %s8624_s2 = inlined_call_operand.vmem [shape: f32[2,32], index: 2, kind: input, shape index: {}]   ;;  %s8625_s3 = inlined_call_operand.vmem [shape: f32[2,32], index: 3, kind: input, shape index: {}]   ;;  %s8626_s4 = inlined_call_operand.vmem [shape: f32[2,16,16], index: 4, kind: input, shape index: {}]   ;;  %s8627_s5 = inlined_call_operand.vmem [shape: f32[2,16,1], index: 5, kind: input, shape index: {}]   ;;  %s8628_s6 = inlined_call_operand.vmem [shape: f32[2,16,16], index: 6, kind: input, shape index: {}]   ;;  %s8629_s7 = inlined_call_operand.vmem [shape: f32[2,16,1], index: 7, kind: input, shape index: {}]   ;;  %s8630_s8 = inlined_call_operand.vmem [shape: f32[2,32], index: 8, kind: input, shape index: {}]   ;;  %s8631_s9 = inlined_call_operand.vmem [shape: f32[2,32], index: 9, kind: input, shape index: {}]   ;;  %s8632_s10 = inlined_call_operand.vmem [shape: f32[2,32,128], index: 10, kind: input, shape index: {}]   ;;  %s8633_s11 = inlined_call_operand.vmem [shape: f32[2,128], index: 11, kind: input, shape index: {}]   ;;  %s8634_s12 = inlined_call_operand.vmem [shape: f32[2,128,32], index: 12, kind: input, shape index: {}]   ;;  %s8635_s13 = inlined_call_operand.vmem [shape: f32[2,32], index: 13, kind: input, shape index: {}]   ;;  %s8636_s14 = inlined_call_operand.vmem [shape: f32[1,32], index: 14, kind: input, shape index: {}]   ;;  %s8637_s15 = inlined_call_operand.vmem [shape: f32[1,32], index: 15, kind: input, shape index: {}]   ;;  %s8638_s16 = inlined_call_operand.vmem [shape: f32[32,128], index: 16, kind: input, shape index: {}]   ;;  %s8639_s17 = inlined_call_operand.vmem [shape: f32[1,128], index: 17, kind: input, shape index: {}]   ;;  %s8640_s18 = inlined_call_operand.hbm [shape: f32[1,8,128], index: 18, kind: output, shape index: {}]  }
   0x1   :  { %8644 = sst [smem:[#allocation5_spill]] %s8622_s0 }
   0x2   :  { %8645 = sst [smem:[#allocation6_spill]] %s8623_s1 }
   0x3   :  { %8646 = sst [smem:[#allocation7_spill]] %s8624_s2 }
   0x4   :  { %s8647_s29 = sld [smem:[#allocation6_spill]]  ;;  %vm132_vm0 = vcmask 1040384   ;;  %vm83_vm1 = vcmask 400384  }
   0x5   :  { %s8648_s22 = sld [smem:[#allocation5_spill]] }
   0xa   :  { %v82_v0 = vld [vmem:[%s8647_s29 + $0x30] sm:$0x1]  ;;  %v81_v1 = vld [vmem:[%s8647_s29 + $0x28] sm:$0xff]  ;;  %v80_v2 = vld [vmem:[%s8647_s29 + $0x20] sm:$0xff] }
   0xb   :  { %5794 = vmatprep.subr.msk.mxu0 %vm132_vm0, %v82_v0  ;;  %v60_v3 = vld [vmem:[%s8648_s22] sm:$0xff]  ;;  %v79_v4 = vld [vmem:[%s8647_s29 + $0x18] sm:$0xff]  ;;  %v78_v5 = vld [vmem:[%s8647_s29 + $0x10] sm:$0xff] }
   0xc   :  { %5795 = vmatpush3.msk.msra.mxu0 %vm132_vm0, %v82_v0  ;;  %5808 = vmatprep.mubr.msk.f32.mxu0 %vm83_vm1, %v60_v3 }
   0xd   :  { %5796 = vmatprep.subr.mxu0 %v81_v1 }
   0xe   :  { %5797 = vmatpush3.msra.mxu0 %v81_v1 }
   0xf   :  { %5798 = vmatprep.subr.mxu0 %v80_v2 }
  0x10   :  { %5799 = vmatpush3.msra.mxu0 %v80_v2 }
  0x11   :  { %5800 = vmatprep.subr.mxu0 %v79_v4 }
  0x12   :  { %23 = vsyncpa [#allocation3], 0  ;;  %5801 = vmatpush3.msra.mxu0 %v79_v4  ;;  %v77_v6 = vld [vmem:[%s8647_s29 + $0x8] sm:$0xff]  ;;  %v76_v7 = vld [vmem:[%s8647_s29] sm:$0xff]  ;;  %vm283_vm2 = vcmask 261120   ;;  %vm547_vm3 = vcmask 130048  }
  0x13   :  { %5802 = vmatprep.subr.mxu0 %v78_v5  ;;  %v61_v8 = vld [vmem:[%s8648_s22 + $0x8] sm:$0xff]  ;;  %v62_v9 = vld [vmem:[%s8648_s22 + $0x10] sm:$0xff]  ;;  %v63_v10 = vld [vmem:[%s8648_s22 + $0x18] sm:$0xff]  ;;  %s8649_s30 = sld [smem:[#allocation7_spill]]  ;;  %vm6593_vm4 = vmmov 0   ;;  %vm5276_vm5 = vcmask 1041409  }
  0x14   :  { %5803 = vmatpush3.msra.mxu0 %v78_v5  ;;  %v64_v11 = vld [vmem:[%s8648_s22 + $0x20] sm:$0xff]  ;;  %v65_v12 = vld [vmem:[%s8648_s22 + $0x28] sm:$0xff]  ;;  %v66_v13 = vld [vmem:[%s8648_s22 + $0x30] sm:$0xff]  ;;  %vm5278_vm6 = vcmask 1042434   ;;  %vm5280_vm7 = vcmask 1043459   ;;  %vm5282_vm8 = vcmask 1044484  }
  0x15   :  { %5804 = vmatprep.subr.mxu0 %v77_v6  ;;  %v67_v14 = vld [vmem:[%s8648_s22 + $0x38] sm:$0xff]  ;;  %v68_v15 = vld [vmem:[%s8648_s22 + $0x40] sm:$0xff]  ;;  %v69_v16 = vld [vmem:[%s8648_s22 + $0x48] sm:$0xff]  ;;  %vm5284_vm9 = vcmask 1045509   ;;  %vm5286_vm10 = vcmask 1046534   ;;  %vm5288_vm11 = vcmask 1047559  }
  0x16   :  { %5805 = vmatpush3.msra.mxu0 %v77_v6  ;;  %v70_v17 = vld [vmem:[%s8648_s22 + $0x50] sm:$0xff]  ;;  %v71_v18 = vld [vmem:[%s8648_s22 + $0x58] sm:$0xff]  ;;  %v72_v19 = vld [vmem:[%s8648_s22 + $0x60] sm:$0xff] }
  0x17   :  { %5806 = vmatprep.subr.mxu0 %v76_v7  ;;  %v73_v20 = vld [vmem:[%s8648_s22 + $0x68] sm:$0xff]  ;;  %v74_v21 = vld [vmem:[%s8648_s22 + $0x70] sm:$0xff]  ;;  %v75_v22 = vld [vmem:[%s8648_s22 + $0x78] sm:$0xff] }
  0x18   :  { %5807 = vmatpush3.msra.mxu0 %v76_v7 }
  0x19   :  { %5809 = vmatmul.mubr.msk.f32.vlgmr.msra.gmra.mxu0 %vm83_vm1, %v61_v8 }
  0x1a   :  { %5811 = vmatprep.mubr.msk.f32.mxu0 %vm83_vm1, %v62_v9 }
  0x1d   :  { %5812 = vmatmul.mubr.msk.f32.gmra.mxu0 %vm83_vm1, %v63_v10 }
  0x1e   :  { %5814 = vmatprep.mubr.msk.f32.mxu0 %vm83_vm1, %v64_v11 }
  0x21   :  { %5815 = vmatmul.mubr.msk.f32.gmra.mxu0 %vm83_vm1, %v65_v12 }
  0x22   :  { %5817 = vmatprep.mubr.msk.f32.mxu0 %vm83_vm1, %v66_v13 }
  0x25   :  { %5818 = vmatmul.mubr.msk.f32.gmra.mxu0 %vm83_vm1, %v67_v14 }
  0x26   :  { %5820 = vmatprep.mubr.msk.f32.mxu0 %vm83_vm1, %v68_v15 }
  0x29   :  { %5821 = vmatmul.mubr.msk.f32.gmra.mxu0 %vm83_vm1, %v69_v16 }
  0x2a   :  { %5823 = vmatprep.mubr.msk.f32.mxu0 %vm83_vm1, %v70_v17 }
  0x2d   :  { %5824 = vmatmul.mubr.msk.f32.gmra.mxu0 %vm83_vm1, %v71_v18 }
  0x2e   :  { %5826 = vmatprep.mubr.msk.f32.mxu0 %vm83_vm1, %v72_v19 }
  0x31   :  { %5827 = vmatmul.mubr.msk.f32.gmra.mxu0 %vm83_vm1, %v73_v20 }
  0x32   :  { %5829 = vmatprep.mubr.msk.f32.mxu0 %vm83_vm1, %v74_v21 }
  0x35   :  { %5830 = vmatmul.mubr.msk.f32.gmra.mxu0 %vm83_vm1, %v75_v22 }
  0xd9   :  { %v6775_v23 = vpop.f32.mrf.mxu0 }
  0xda   :  { %v287_v24 = vsel %vm283_vm2, %v6775_v23, 0.0 }
  0xdb   :  { %288 = vadd.xlane.f32.xlu0 %v287_v24  ;;  %v6779_v25 = vpop.f32.mrf.mxu0 }
  0xdc   :  { %v284_v27 = vsel %vm283_vm2, %v6779_v25, 0.0 }
  0xdd   :  { %v6781_v26 = vpop.f32.mrf.mxu0 }
  0xde   :  { %v293_v28 = vsel %vm283_vm2, %v6781_v26, 0.0 }
  0xdf   :  { %285 = vadd.xlane.f32.xlu0 %v284_v27  ;;  %294 = vadd.xlane.f32.xlu1 %v293_v28  ;;  %v6787_v29 = vpop.f32.mrf.mxu0 }
  0xe0   :  { %v290_v31 = vsel %vm283_vm2, %v6787_v29, 0.0 }
  0xe1   :  { %v6789_v30 = vpop.f32.mrf.mxu0 }
  0xe2   :  { %v299_v32 = vsel %vm283_vm2, %v6789_v30, 0.0 }
  0xe3   :  { %291 = vadd.xlane.f32.xlu1 %v290_v31  ;;  %300 = vadd.xlane.f32.xlu0 %v299_v32  ;;  %v6795_v33 = vpop.f32.mrf.mxu0 }
  0xe4   :  { %v296_v34 = vsel %vm283_vm2, %v6795_v33, 0.0 }
  0xe5   :  { %v6799_v35 = vpop.f32.mrf.mxu0 }
  0xe6   :  { %v305_v36 = vsel %vm283_vm2, %v6799_v35, 0.0 }
  0xe7   :  { %297 = vadd.xlane.f32.xlu1 %v296_v34  ;;  %306 = vadd.xlane.f32.xlu0 %v305_v36  ;;  %v6803_v37 = vpop.f32.mrf.mxu0 }
  0xe8   :  { %v302_v38 = vsel %vm283_vm2, %v6803_v37, 0.0 }
  0xe9   :  { %v6807_v39 = vpop.f32.mrf.mxu0 }
  0xea   :  { %v311_v40 = vsel %vm283_vm2, %v6807_v39, 0.0 }
  0xeb   :  { %303 = vadd.xlane.f32.xlu1 %v302_v38  ;;  %312 = vadd.xlane.f32.xlu0 %v311_v40  ;;  %v6811_v41 = vpop.f32.mrf.mxu0 }
  0xec   :  { %v308_v42 = vsel %vm283_vm2, %v6811_v41, 0.0 }
  0xed   :  { %v6815_v43 = vpop.f32.mrf.mxu0 }
  0xee   :  { %v317_v44 = vsel %vm283_vm2, %v6815_v43, 0.0 }
  0xef   :  { %309 = vadd.xlane.f32.xlu1 %v308_v42  ;;  %318 = vadd.xlane.f32.xlu0 %v317_v44  ;;  %v6819_v45 = vpop.f32.mrf.mxu0 }
  0xf0   :  { %v314_v46 = vsel %vm283_vm2, %v6819_v45, 0.0 }
  0xf1   :  { %v6823_v47 = vpop.f32.mrf.mxu0 }
  0xf2   :  { %v323_v48 = vsel %vm283_vm2, %v6823_v47, 0.0 }
  0xf3   :  { %315 = vadd.xlane.f32.xlu1 %v314_v46  ;;  %324 = vadd.xlane.f32.xlu0 %v323_v48  ;;  %v6827_v49 = vpop.f32.mrf.mxu0 }
  0xf4   :  { %v320_v50 = vsel %vm283_vm2, %v6827_v49, 0.0 }
  0xf5   :  { %v6831_v51 = vpop.f32.mrf.mxu0 }
  0xf6   :  { %v329_v52 = vsel %vm283_vm2, %v6831_v51, 0.0 }
  0xf7   :  { %321 = vadd.xlane.f32.xlu1 %v320_v50  ;;  %330 = vadd.xlane.f32.xlu0 %v329_v52  ;;  %v6835_v53 = vpop.f32.mrf.mxu0 }
  0xf8   :  { %v326_v54 = vsel %vm283_vm2, %v6835_v53, 0.0 }
  0xfb   :  { %327 = vadd.xlane.f32.xlu1 %v326_v54 }
 0x164   :  { %v289_v55 = vpop.xlane.xlu0 %288 }
 0x165   :  { %v334_v56 = vmul.f32 0.03125, %v289_v55 }
 0x167   :  { %v6840_v57 = vsub.f32 %v6775_v23, %v334_v56 }
 0x168   :  { %v286_v58 = vpop.xlane.xlu0 %285  ;;  %v295_v59 = vpop.xlane.xlu1 %294 }
 0x169   :  { %v333_v60 = vmul.f32 0.03125, %v286_v58  ;;  %v336_v61 = vmul.f32 0.03125, %v295_v59  ;;  %v366_v62 = vmul.f32 %v6840_v57, %v6840_v57 }
 0x16b   :  { %v6845_v63 = vsub.f32 %v6779_v25, %v333_v60  ;;  %v6848_v0 = vsub.f32 %v6781_v26, %v336_v61  ;;  %v384_v1 = vsel %vm283_vm2, %v366_v62, 0.0 }
 0x16c   :  { %v292_v2 = vpop.xlane.xlu1 %291  ;;  %v301_v3 = vpop.xlane.xlu0 %300  ;;  %385 = vadd.xlane.f32.xlu0 %v384_v1 }
 0x16d   :  { %v335_v4 = vmul.f32 0.03125, %v292_v2  ;;  %v338_v5 = vmul.f32 0.03125, %v301_v3  ;;  %v368_v6 = vmul.f32 %v6848_v0, %v6848_v0  ;;  %v365_v7 = vmul.f32 %v6845_v63, %v6845_v63 }
 0x16f   :  { %v6856_v8 = vsub.f32 %v6787_v29, %v335_v4  ;;  %v6859_v9 = vsub.f32 %v6789_v30, %v338_v5  ;;  %v390_v10 = vsel %vm283_vm2, %v368_v6, 0.0  ;;  %v381_v11 = vsel %vm283_vm2, %v365_v7, 0.0 }
 0x170   :  { %v298_v12 = vpop.xlane.xlu1 %297  ;;  %v307_v13 = vpop.xlane.xlu0 %306  ;;  %391 = vadd.xlane.f32.xlu0 %v390_v10  ;;  %382 = vadd.xlane.f32.xlu1 %v381_v11 }
 0x171   :  { %v337_v14 = vmul.f32 0.03125, %v298_v12  ;;  %v340_v15 = vmul.f32 0.03125, %v307_v13  ;;  %v370_v16 = vmul.f32 %v6859_v9, %v6859_v9  ;;  %v367_v17 = vmul.f32 %v6856_v8, %v6856_v8 }
 0x173   :  { %v6868_v18 = vsub.f32 %v6795_v33, %v337_v14  ;;  %v6871_v19 = vsub.f32 %v6799_v35, %v340_v15  ;;  %v396_v20 = vsel %vm283_vm2, %v370_v16, 0.0  ;;  %v387_v21 = vsel %vm283_vm2, %v367_v17, 0.0 }
 0x174   :  { %v304_v22 = vpop.xlane.xlu1 %303  ;;  %v313_v24 = vpop.xlane.xlu0 %312  ;;  %397 = vadd.xlane.f32.xlu0 %v396_v20  ;;  %388 = vadd.xlane.f32.xlu1 %v387_v21 }
 0x175   :  { %v339_v27 = vmul.f32 0.03125, %v304_v22  ;;  %v342_v28 = vmul.f32 0.03125, %v313_v24  ;;  %v372_v31 = vmul.f32 %v6871_v19, %v6871_v19  ;;  %v369_v32 = vmul.f32 %v6868_v18, %v6868_v18 }
 0x177   :  { %v6880_v34 = vsub.f32 %v6803_v37, %v339_v27  ;;  %v6883_v36 = vsub.f32 %v6807_v39, %v342_v28  ;;  %v402_v38 = vsel %vm283_vm2, %v372_v31, 0.0  ;;  %v393_v40 = vsel %vm283_vm2, %v369_v32, 0.0 }
 0x178   :  { %v310_v42 = vpop.xlane.xlu1 %309  ;;  %v319_v44 = vpop.xlane.xlu0 %318  ;;  %403 = vadd.xlane.f32.xlu0 %v402_v38  ;;  %394 = vadd.xlane.f32.xlu1 %v393_v40 }
 0x179   :  { %v341_v46 = vmul.f32 0.03125, %v310_v42  ;;  %v344_v48 = vmul.f32 0.03125, %v319_v44  ;;  %v374_v50 = vmul.f32 %v6883_v36, %v6883_v36  ;;  %v371_v52 = vmul.f32 %v6880_v34, %v6880_v34  ;;  %v6938_v42 = vld [vmem:[%s8626_s4] sm:$0xff] }
 0x17a   :  { %5836 = vmatprep.mubr.msk.f32.mxu1 %vm547_vm3, %v6938_v42  ;;  %v535_v44 = vld [vmem:[%s8627_s5] sm:$0xff] }
 0x17b   :  { %v6892_v54 = vsub.f32 %v6811_v41, %v341_v46  ;;  %v6895_v55 = vsub.f32 %v6815_v43, %v344_v48  ;;  %v408_v56 = vsel %vm283_vm2, %v374_v50, 0.0  ;;  %v399_v58 = vsel %vm283_vm2, %v371_v52, 0.0  ;;  %v536_v46 = vld [vmem:[%s8627_s5 + $0x8] sm:$0xff]  ;;  %v1236_v50 = vld [vmem:[%s8629_s7] sm:$0xff] }
 0x17c   :  { %v316_v59 = vpop.xlane.xlu1 %315  ;;  %v325_v60 = vpop.xlane.xlu0 %324  ;;  %409 = vadd.xlane.f32.xlu0 %v408_v56  ;;  %400 = vadd.xlane.f32.xlu1 %v399_v58  ;;  %v6591_v48 = vmov 0   ;;  %v1237_v52 = vld [vmem:[%s8629_s7 + $0x8] sm:$0xff] }
 0x17d   :  { %v343_v61 = vmul.f32 0.03125, %v316_v59  ;;  %v346_v62 = vmul.f32 0.03125, %v325_v60  ;;  %v376_v1 = vmul.f32 %v6895_v55, %v6895_v55  ;;  %v373_v2 = vmul.f32 %v6892_v54, %v6892_v54  ;;  %6280 = vset.pattern.permute.xlu1 %v6591_v48  ;;  %6279 = vset.pattern.permute.xlu0 %v6591_v48 }
 0x17f   :  { %v6904_v3 = vsub.f32 %v6819_v45, %v343_v61  ;;  %v6907_v4 = vsub.f32 %v6823_v47, %v346_v62  ;;  %v414_v5 = vsel %vm283_vm2, %v376_v1, 0.0  ;;  %v405_v6 = vsel %vm283_vm2, %v373_v2, 0.0 }
 0x180   :  { %v322_v7 = vpop.xlane.xlu1 %321  ;;  %415 = vadd.xlane.f32.xlu0 %v414_v5  ;;  %v331_v10 = vpop.xlane.xlu0 %330  ;;  %406 = vadd.xlane.f32.xlu1 %v405_v6 }
 0x181   :  { %v345_v11 = vmul.f32 0.03125, %v322_v7  ;;  %v348_v12 = vmul.f32 0.03125, %v331_v10  ;;  %v378_v13 = vmul.f32 %v6907_v4, %v6907_v4  ;;  %v375_v14 = vmul.f32 %v6904_v3, %v6904_v3 }
 0x183   :  { %v6916_v15 = vsub.f32 %v6827_v49, %v345_v11  ;;  %v6919_v16 = vsub.f32 %v6831_v51, %v348_v12  ;;  %v420_v17 = vsel %vm283_vm2, %v378_v13, 0.0  ;;  %v411_v20 = vsel %vm283_vm2, %v375_v14, 0.0 }
 0x184   :  { %421 = vadd.xlane.f32.xlu0 %v420_v17  ;;  %412 = vadd.xlane.f32.xlu1 %v411_v20  ;;  %v328_v21 = vpop.xlane.xlu1 %327 }
 0x185   :  { %v347_v22 = vmul.f32 0.03125, %v328_v21  ;;  %v380_v24 = vmul.f32 %v6919_v16, %v6919_v16  ;;  %v377_v27 = vmul.f32 %v6916_v15, %v6916_v15 }
 0x187   :  { %v6928_v28 = vsub.f32 %v6835_v53, %v347_v22  ;;  %v426_v31 = vsel %vm283_vm2, %v380_v24, 0.0  ;;  %v417_v32 = vsel %vm283_vm2, %v377_v27, 0.0 }
 0x188   :  { %427 = vadd.xlane.f32.xlu0 %v426_v31  ;;  %418 = vadd.xlane.f32.xlu1 %v417_v32 }
 0x189   :  { %v379_v38 = vmul.f32 %v6928_v28, %v6928_v28 }
 0x18b   :  { %v423_v40 = vsel %vm283_vm2, %v379_v38, 0.0 }
 0x18c   :  { %424 = vadd.xlane.f32.xlu1 %v423_v40 }
 0x19d   :  { %539 = vperm.xlu1 %6280, %v535_v44   ;;  %v6957_v44 = vld [vmem:[%s8649_s30] ss:$0 sm:$0xff] }
 0x19e   :  { %544 = vperm.xlu0 %6279, %v536_v46  }
 0x1a1   :  { %1240 = vperm.xlu1 %6280, %v1236_v50  }
 0x1a5   :  { %1245 = vperm.xlu1 %6280, %v1237_v52  }
 0x1f5   :  { %v386_v56 = vpop.xlane.xlu0 %385 }
 0x1f6   :  { %v430_v58 = vmul.f32 0.03125, %v386_v56 }
 0x1f8   :  { %v446_v59 = vadd.f32 1e-05, %v430_v58  ;;  %v6963_v58 = vld [vmem:[%s8625_s3] ss:$0 sm:$0xff] }
 0x1f9   :  { %v392_v60 = vpop.xlane.xlu0 %391  ;;  %v383_v61 = vpop.xlane.xlu1 %382 }
 0x1fa   :  { %6281 = vrsqrt.f32 %v446_v59  ;;  %v432_v62 = vmul.f32 0.03125, %v392_v60  ;;  %v429_v1 = vmul.f32 0.03125, %v383_v61 }
 0x1fc   :  { %v448_v2 = vadd.f32 1e-05, %v432_v62  ;;  %v445_v5 = vadd.f32 1e-05, %v429_v1 }
 0x1fd   :  { %v398_v6 = vpop.xlane.xlu0 %397  ;;  %v389_v7 = vpop.xlane.xlu1 %388 }
 0x1fe   :  { %6283 = vrsqrt.f32 %v448_v2  ;;  %v434_v10 = vmul.f32 0.03125, %v398_v6  ;;  %v431_v11 = vmul.f32 0.03125, %v389_v7 }
 0x1ff   :  { %6285 = vrsqrt.f32 %v445_v5 }
 0x200   :  { %v450_v12 = vadd.f32 1e-05, %v434_v10  ;;  %v447_v13 = vadd.f32 1e-05, %v431_v11 }
 0x201   :  { %v404_v14 = vpop.xlane.xlu0 %403  ;;  %v395_v17 = vpop.xlane.xlu1 %394 }
 0x202   :  { %6287 = vrsqrt.f32 %v450_v12  ;;  %v436_v20 = vmul.f32 0.03125, %v404_v14  ;;  %v433_v21 = vmul.f32 0.03125, %v395_v17 }
 0x203   :  { %6289 = vrsqrt.f32 %v447_v13 }
 0x204   :  { %v452_v22 = vadd.f32 1e-05, %v436_v20  ;;  %v449_v24 = vadd.f32 1e-05, %v433_v21 }
 0x205   :  { %v410_v27 = vpop.xlane.xlu0 %409  ;;  %v401_v31 = vpop.xlane.xlu1 %400 }
 0x206   :  { %6291 = vrsqrt.f32 %v452_v22  ;;  %v438_v32 = vmul.f32 0.03125, %v410_v27  ;;  %v435_v38 = vmul.f32 0.03125, %v401_v31 }
 0x207   :  { %v6282_v40 = vpop.eup %6281  ;;  %6293 = vrsqrt.f32 %v449_v24 }
 0x208   :  { %v454_v46 = vadd.f32 1e-05, %v438_v32  ;;  %v451_v48 = vadd.f32 1e-05, %v435_v38  ;;  %v478_v50 = vmul.f32 %v6282_v40, %v6840_v57 }
 0x209   :  { %v416_v52 = vpop.xlane.xlu0 %415  ;;  %v407_v56 = vpop.xlane.xlu1 %406 }
 0x20a   :  { %6295 = vrsqrt.f32 %v454_v46  ;;  %v440_v59 = vmul.f32 0.03125, %v416_v52  ;;  %v437_v60 = vmul.f32 0.03125, %v407_v56  ;;  %v498_v61 = vmul.f32 %v6957_v44, %v478_v50  ;;  %v6977_v46 = vld [vmem:[%s8626_s4 + $0x8] sm:$0xff] }
 0x20b   :  { %v6284_v62 = vpop.eup %6283  ;;  %6297 = vrsqrt.f32 %v451_v48 }
 0x20c   :  { %v6286_v1 = vpop.eup %6285  ;;  %v456_v2 = vadd.f32 1e-05, %v440_v59  ;;  %v453_v5 = vadd.f32 1e-05, %v437_v60  ;;  %v518_v6 = vadd.f32 %v6963_v58, %v498_v61  ;;  %v480_v57 = vmul.f32 %v6284_v62, %v6848_v0 }
 0x20d   :  { %v422_v7 = vpop.xlane.xlu0 %421  ;;  %v413_v10 = vpop.xlane.xlu1 %412  ;;  %v477_v11 = vmul.f32 %v6286_v1, %v6845_v63 }
 0x20e   :  { %6299 = vrsqrt.f32 %v456_v2  ;;  %v442_v12 = vmul.f32 0.03125, %v422_v7  ;;  %v439_v13 = vmul.f32 0.03125, %v413_v10  ;;  %5832 = vmatprep.subr.mxu1 %v518_v6  ;;  %v500_v20 = vmul.f32 %v6957_v44, %v480_v57 }
 0x20f   :  { %v6288_v14 = vpop.eup %6287  ;;  %6301 = vrsqrt.f32 %v453_v5  ;;  %5833 = vmatpush3.msra.mxu1 %v518_v6  ;;  %v497_v17 = vmul.f32 %v6957_v44, %v477_v11 }
 0x210   :  { %v6290_v21 = vpop.eup %6289  ;;  %v458_v22 = vadd.f32 1e-05, %v442_v12  ;;  %v455_v24 = vadd.f32 1e-05, %v439_v13  ;;  %v482_v0 = vmul.f32 %v6288_v14, %v6859_v9  ;;  %v520_v50 = vadd.f32 %v6963_v58, %v500_v20 }
 0x211   :  { %v428_v27 = vpop.xlane.xlu0 %427  ;;  %v419_v31 = vpop.xlane.xlu1 %418  ;;  %v517_v63 = vadd.f32 %v6963_v58, %v497_v17  ;;  %v479_v32 = vmul.f32 %v6290_v21, %v6856_v8 }
 0x212   :  { %6303 = vrsqrt.f32 %v458_v22  ;;  %v444_v38 = vmul.f32 0.03125, %v428_v27  ;;  %v441_v40 = vmul.f32 0.03125, %v419_v31  ;;  %v502_v52 = vmul.f32 %v6957_v44, %v482_v0 }
 0x213   :  { %v6292_v48 = vpop.eup %6291  ;;  %6305 = vrsqrt.f32 %v455_v24  ;;  %5834 = vmatprep.subr.mxu1 %v517_v63  ;;  %v499_v9 = vmul.f32 %v6957_v44, %v479_v32 }
 0x214   :  { %v6294_v56 = vpop.eup %6293  ;;  %v460_v59 = vadd.f32 1e-05, %v444_v38  ;;  %v457_v8 = vadd.f32 1e-05, %v441_v40  ;;  %5835 = vmatpush3.msra.mxu1 %v517_v63  ;;  %v484_v60 = vmul.f32 %v6292_v48, %v6871_v19  ;;  %v522_v19 = vadd.f32 %v6963_v58, %v502_v52 }
 0x215   :  { %5837 = vmatmul.mubr.msk.f32.vlgmr.msra.gmra.mxu1 %vm547_vm3, %v6977_v46  ;;  %5839 = vmatprep.subr.mxu1 %v520_v50  ;;  %v425_v61 = vpop.xlane.xlu1 %424  ;;  %v519_v62 = vadd.f32 %v6963_v58, %v499_v9  ;;  %v481_v1 = vmul.f32 %v6294_v56, %v6868_v18 }
 0x216   :  { %6307 = vrsqrt.f32 %v460_v59  ;;  %5840 = vmatpush3.msra.mxu1 %v520_v50  ;;  %v443_v2 = vmul.f32 0.03125, %v425_v61  ;;  %5843 = vmatprep.mubr.msk.f32.mxu1 %vm547_vm3, %v6938_v42  ;;  %v504_v57 = vmul.f32 %v6957_v44, %v484_v60 }
 0x217   :  { %v6296_v5 = vpop.eup %6295  ;;  %6309 = vrsqrt.f32 %v457_v8  ;;  %5841 = vmatprep.subr.mxu1 %v519_v62  ;;  %v501_v6 = vmul.f32 %v6957_v44, %v481_v1 }
 0x218   :  { %v6298_v7 = vpop.eup %6297  ;;  %v459_v10 = vadd.f32 1e-05, %v443_v2  ;;  %5842 = vmatpush3.msra.mxu1 %v519_v62  ;;  %v486_v18 = vmul.f32 %v6296_v5, %v6883_v36  ;;  %v524_v14 = vadd.f32 %v6963_v58, %v504_v57 }
 0x219   :  { %5844 = vmatmul.mubr.msk.f32.vlgmr.msra.gmra.mxu1 %vm547_vm3, %v6977_v46  ;;  %5846 = vmatprep.subr.mxu1 %v522_v19  ;;  %v521_v11 = vadd.f32 %v6963_v58, %v501_v6  ;;  %v483_v12 = vmul.f32 %v6298_v7, %v6880_v34  ;;  %v7059_v2 = vpop.permute.xlu1 %539 }
 0x21a   :  { %6311 = vrsqrt.f32 %v459_v10  ;;  %5847 = vmatpush3.msra.mxu1 %v522_v19  ;;  %5850 = vmatprep.mubr.msk.f32.mxu1 %vm547_vm3, %v6938_v42  ;;  %v506_v36 = vmul.f32 %v6957_v44, %v486_v18 }
 0x21b   :  { %v6300_v13 = vpop.eup %6299  ;;  %5848 = vmatprep.subr.mxu1 %v521_v11  ;;  %v503_v17 = vmul.f32 %v6957_v44, %v483_v12 }
 0x21c   :  { %v6302_v20 = vpop.eup %6301  ;;  %5849 = vmatpush3.msra.mxu1 %v521_v11  ;;  %v488_v21 = vmul.f32 %v6300_v13, %v6895_v55  ;;  %v526_v0 = vadd.f32 %v6963_v58, %v506_v36 }
 0x21d   :  { %5851 = vmatmul.mubr.msk.f32.vlgmr.msra.gmra.mxu1 %vm547_vm3, %v6977_v46  ;;  %5853 = vmatprep.subr.mxu1 %v524_v14  ;;  %v523_v34 = vadd.f32 %v6963_v58, %v503_v17  ;;  %v485_v22 = vmul.f32 %v6302_v20, %v6892_v54 }
 0x21e   :  { %5854 = vmatpush3.msra.mxu1 %v524_v14  ;;  %5857 = vmatprep.mubr.msk.f32.mxu1 %vm547_vm3, %v6938_v42  ;;  %v508_v55 = vmul.f32 %v6957_v44, %v488_v21 }
 0x21f   :  { %v6304_v24 = vpop.eup %6303  ;;  %5855 = vmatprep.subr.mxu1 %v523_v34  ;;  %v505_v27 = vmul.f32 %v6957_v44, %v485_v22 }
 0x220   :  { %v6306_v31 = vpop.eup %6305  ;;  %5856 = vmatpush3.msra.mxu1 %v523_v34  ;;  %v490_v63 = vmul.f32 %v6304_v24, %v6907_v4  ;;  %v528_v40 = vadd.f32 %v6963_v58, %v508_v55 }
 0x221   :  { %5858 = vmatmul.mubr.msk.f32.vlgmr.msra.gmra.mxu1 %vm547_vm3, %v6977_v46  ;;  %5860 = vmatprep.subr.mxu1 %v526_v0  ;;  %v525_v54 = vadd.f32 %v6963_v58, %v505_v27  ;;  %v487_v32 = vmul.f32 %v6306_v31, %v6904_v3 }
 0x222   :  { %5861 = vmatpush3.msra.mxu1 %v526_v0  ;;  %5864 = vmatprep.mubr.msk.f32.mxu1 %vm547_vm3, %v6938_v42  ;;  %v510_v4 = vmul.f32 %v6957_v44, %v490_v63 }
 0x223   :  { %v6308_v38 = vpop.eup %6307  ;;  %5862 = vmatprep.subr.mxu1 %v525_v54  ;;  %v507_v48 = vmul.f32 %v6957_v44, %v487_v32 }
 0x224   :  { %v6310_v50 = vpop.eup %6309  ;;  %5863 = vmatpush3.msra.mxu1 %v525_v54  ;;  %v492_v9 = vmul.f32 %v6308_v38, %v6919_v16  ;;  %v530_v59 = vadd.f32 %v6963_v58, %v510_v4 }
 0x225   :  { %5865 = vmatmul.mubr.msk.f32.vlgmr.msra.gmra.mxu1 %vm547_vm3, %v6977_v46  ;;  %5867 = vmatprep.subr.mxu1 %v528_v40  ;;  %v527_v3 = vadd.f32 %v6963_v58, %v507_v48  ;;  %v489_v52 = vmul.f32 %v6310_v50, %v6916_v15 }
 0x226   :  { %5868 = vmatpush3.msra.mxu1 %v528_v40  ;;  %5871 = vmatprep.mubr.msk.f32.mxu1 %vm547_vm3, %v6938_v42  ;;  %v512_v16 = vmul.f32 %v6957_v44, %v492_v9 }
 0x227   :  { %v6312_v56 = vpop.eup %6311  ;;  %5869 = vmatprep.subr.mxu1 %v527_v3  ;;  %v509_v8 = vmul.f32 %v6957_v44, %v489_v52 }
 0x228   :  { %5870 = vmatpush3.msra.mxu1 %v527_v3  ;;  %v491_v60 = vmul.f32 %v6312_v56, %v6928_v28  ;;  %v532_v62 = vadd.f32 %v6963_v58, %v512_v16  ;;  %v7050_v28 = vld [vmem:[%s8628_s6] sm:$0xff] }
 0x229   :  { %5872 = vmatmul.mubr.msk.f32.vlgmr.msra.gmra.mxu1 %vm547_vm3, %v6977_v46  ;;  %5874 = vmatprep.subr.mxu1 %v530_v59  ;;  %v529_v15 = vadd.f32 %v6963_v58, %v509_v8 }
 0x22a   :  { %5875 = vmatpush3.msra.mxu1 %v530_v59  ;;  %5878 = vmatprep.mubr.msk.f32.mxu1 %vm547_vm3, %v6938_v42  ;;  %v511_v61 = vmul.f32 %v6957_v44, %v491_v60  ;;  %v7056_v44 = vpop.permute.xlu0 %544 }
 0x22b   :  { %5876 = vmatprep.subr.mxu1 %v529_v15  ;;  %5927 = vmatprep.mubr.msk.f32.mxu0 %vm547_vm3, %v7050_v28 }
 0x22c   :  { %5877 = vmatpush3.msra.mxu1 %v529_v15  ;;  %v531_v1 = vadd.f32 %v6963_v58, %v511_v61 }
 0x22d   :  { %5879 = vmatmul.mubr.msk.f32.vlgmr.msra.gmra.mxu1 %vm547_vm3, %v6977_v46  ;;  %5881 = vmatprep.subr.mxu1 %v532_v62 }
 0x22e   :  { %5882 = vmatpush3.msra.mxu1 %v532_v62  ;;  %5885 = vmatprep.mubr.msk.f32.mxu1 %vm547_vm3, %v6938_v42 }
 0x22f   :  { %5883 = vmatprep.subr.mxu1 %v531_v1 }
 0x230   :  { %5884 = vmatpush3.msra.mxu1 %v531_v1 }
 0x231   :  { %5886 = vmatmul.mubr.msk.f32.vlgmr.msra.gmra.mxu1 %vm547_vm3, %v6977_v46 }
 0x232   :  { %5892 = vmatprep.mubr.msk.f32.mxu1 %vm547_vm3, %v7050_v28 }
 0x2d5   :  { %v5838_v58 = vpop.f32.mrf.mxu1 }
 0x2d6   :  { %v626_v42 = vadd.f32 %v5838_v58, %v7056_v44 }
 0x2d7   :  { %v620_v5 = vpop.f32.mrf.mxu1 }
 0x2d8   :  { %v1171_v46 = vmul.f32 0.70710677, %v626_v42  ;;  %v621_v19 = vadd.f32 %v620_v5, %v7059_v2  ;;  %v1155_v4 = vmul.f32 0.5, %v626_v42 }
 0x2d9   :  { %v5845_v6 = vpop.f32.mrf.mxu1 }
 0x2da   :  { %6313 = verf.f32 %v1171_v46  ;;  %v1170_v57 = vmul.f32 0.70710677, %v621_v19  ;;  %v701_v7 = vadd.f32 %v5845_v6, %v7056_v44  ;;  %v1154_v59 = vmul.f32 0.5, %v621_v19  ;;  %v7099_v6 = vld [vmem:[%s8628_s6 + $0x8] sm:$0xff] }
 0x2db   :  { %v695_v10 = vpop.f32.mrf.mxu1 }
 0x2dc   :  { %6315 = verf.f32 %v1170_v57  ;;  %v1173_v18 = vmul.f32 0.70710677, %v701_v7  ;;  %v696_v11 = vadd.f32 %v695_v10, %v7059_v2  ;;  %v1157_v1 = vmul.f32 0.5, %v701_v7 }
 0x2dd   :  { %v5852_v12 = vpop.f32.mrf.mxu1 }
 0x2de   :  { %6317 = verf.f32 %v1173_v18  ;;  %v1172_v13 = vmul.f32 0.70710677, %v696_v11  ;;  %v776_v14 = vadd.f32 %v5852_v12, %v7056_v44  ;;  %v1156_v10 = vmul.f32 0.5, %v696_v11 }
 0x2df   :  { %v770_v17 = vpop.f32.mrf.mxu1 }
 0x2e0   :  { %6319 = verf.f32 %v1172_v13  ;;  %v1175_v36 = vmul.f32 0.70710677, %v776_v14  ;;  %v7066_v20 = vadd.f32 %v770_v17, %v7059_v2 }
 0x2e1   :  { %v5859_v21 = vpop.f32.mrf.mxu1 }
 0x2e2   :  { %6321 = verf.f32 %v1175_v36  ;;  %v1174_v34 = vmul.f32 0.70710677, %v7066_v20  ;;  %v7070_v22 = vadd.f32 %v5859_v21, %v7056_v44  ;;  %v1159_v21 = vmul.f32 0.5, %v776_v14 }
 0x2e3   :  { %v845_v24 = vpop.f32.mrf.mxu1  ;;  %v1158_v14 = vmul.f32 0.5, %v7066_v20 }
 0x2e4   :  { %6323 = verf.f32 %v1174_v34  ;;  %v1177_v0 = vmul.f32 0.70710677, %v7070_v22  ;;  %v7074_v27 = vadd.f32 %v845_v24, %v7059_v2 }
 0x2e5   :  { %v5866_v55 = vpop.f32.mrf.mxu1 }
 0x2e6   :  { %6325 = verf.f32 %v1177_v0  ;;  %v1176_v31 = vmul.f32 0.70710677, %v7074_v27  ;;  %v7078_v63 = vadd.f32 %v5866_v55, %v7056_v44 }
 0x2e7   :  { %v6314_v54 = vpop.eup %6313  ;;  %v920_v32 = vpop.f32.mrf.mxu1 }
 0x2e8   :  { %6327 = verf.f32 %v1176_v31  ;;  %v1179_v38 = vmul.f32 0.70710677, %v7078_v63  ;;  %v7082_v40 = vadd.f32 %v920_v32, %v7059_v2  ;;  %v1203_v9 = vadd.f32 1.0, %v6314_v54 }
 0x2e9   :  { %v6316_v48 = vpop.eup %6315  ;;  %v5873_v50 = vpop.f32.mrf.mxu1 }
 0x2ea   :  { %6329 = verf.f32 %v1179_v38  ;;  %v1178_v3 = vmul.f32 0.70710677, %v7082_v40  ;;  %v7086_v52 = vadd.f32 %v5873_v50, %v7056_v44  ;;  %v1219_v16 = vmul.f32 %v1203_v9, %v1155_v4 }
 0x2eb   :  { %v6318_v56 = vpop.eup %6317  ;;  %v995_v8 = vpop.f32.mrf.mxu1  ;;  %v1202_v60 = vadd.f32 1.0, %v6316_v48  ;;  %v1161_v50 = vmul.f32 0.5, %v7070_v22  ;;  %v1163_v22 = vmul.f32 0.5, %v7078_v63 }
 0x2ec   :  { %6331 = verf.f32 %v1178_v3  ;;  %v1181_v15 = vmul.f32 0.70710677, %v7086_v52  ;;  %v7090_v61 = vadd.f32 %v995_v8, %v7059_v2  ;;  %5888 = vmatprep.subr.mxu1 %v1219_v16  ;;  %v1205_v5 = vadd.f32 1.0, %v6318_v56 }
 0x2ed   :  { %v6320_v62 = vpop.eup %6319  ;;  %v5880_v58 = vpop.f32.mrf.mxu1  ;;  %v1218_v42 = vmul.f32 %v1202_v60, %v1154_v59  ;;  %5889 = vmatpush3.msra.mxu1 %v1219_v16  ;;  %v1160_v3 = vmul.f32 0.5, %v7074_v27  ;;  %v1162_v27 = vmul.f32 0.5, %v7082_v40  ;;  %v1165_v63 = vmul.f32 0.5, %v7086_v52 }
 0x2ee   :  { %6333 = verf.f32 %v1181_v15  ;;  %v1180_v46 = vmul.f32 0.70710677, %v7090_v61  ;;  %v7094_v19 = vadd.f32 %v5880_v58, %v7056_v44  ;;  %v1221_v18 = vmul.f32 %v1205_v5, %v1157_v1 }
 0x2ef   :  { %v6322_v57 = vpop.eup %6321  ;;  %5890 = vmatprep.subr.mxu1 %v1218_v42  ;;  %v1070_v7 = vpop.f32.mrf.mxu1  ;;  %v1204_v12 = vadd.f32 1.0, %v6320_v62  ;;  %v1164_v40 = vmul.f32 0.5, %v7090_v61 }
 0x2f0   :  { %6335 = verf.f32 %v1180_v46  ;;  %v1183_v13 = vmul.f32 0.70710677, %v7094_v19  ;;  %v7103_v17 = vadd.f32 %v1070_v7, %v7059_v2  ;;  %5891 = vmatpush3.msra.mxu1 %v1218_v42  ;;  %v1207_v11 = vadd.f32 1.0, %v6322_v57 }
 0x2f1   :  { %v6324_v36 = vpop.eup %6323  ;;  %5893 = vmatmul.mubr.msk.f32.vlgmr.msra.gmra.mxu1 %vm547_vm3, %v7099_v6  ;;  %5895 = vmatprep.subr.mxu1 %v1221_v18  ;;  %v5887_v34 = vpop.f32.mrf.mxu1  ;;  %v1220_v24 = vmul.f32 %v1204_v12, %v1156_v10  ;;  %v1167_v52 = vmul.f32 0.5, %v7094_v19 }
 0x2f2   :  { %6337 = verf.f32 %v1183_v13  ;;  %v1182_v0 = vmul.f32 0.70710677, %v7103_v17  ;;  %v7109_v55 = vadd.f32 %v5887_v34, %v7056_v44  ;;  %5896 = vmatpush3.msra.mxu1 %v1221_v18  ;;  %5899 = vmatprep.mubr.msk.f32.mxu1 %vm547_vm3, %v7050_v28  ;;  %v1223_v32 = vmul.f32 %v1207_v11, %v1159_v21 }
 0x2f3   :  { %v6326_v31 = vpop.eup %6325  ;;  %5897 = vmatprep.subr.mxu1 %v1220_v24  ;;  %v1145_v54 = vpop.f32.mrf.mxu1  ;;  %v1206_v38 = vadd.f32 1.0, %v6324_v36  ;;  %v1166_v61 = vmul.f32 0.5, %v7103_v17 }
 0x2f4   :  { %6339 = verf.f32 %v1182_v0  ;;  %v1185_v48 = vmul.f32 0.70710677, %v7109_v55  ;;  %v7116_v4 = vadd.f32 %v1145_v54, %v7059_v2  ;;  %5898 = vmatpush3.msra.mxu1 %v1220_v24  ;;  %v1209_v20 = vadd.f32 1.0, %v6326_v31  ;;  %v7153_v54 = vpop.permute.xlu1 %1240 }
 0x2f5   :  { %v6328_v44 = vpop.eup %6327  ;;  %5900 = vmatmul.mubr.msk.f32.vlgmr.msra.gmra.mxu1 %vm547_vm3, %v7099_v6  ;;  %5902 = vmatprep.subr.mxu1 %v1223_v32  ;;  %v1222_v9 = vmul.f32 %v1206_v38, %v1158_v14  ;;  %v1169_v19 = vmul.f32 0.5, %v7109_v55 }
 0x2f6   :  { %6341 = verf.f32 %v1185_v48  ;;  %v1184_v56 = vmul.f32 0.70710677, %v7116_v4  ;;  %5903 = vmatpush3.msra.mxu1 %v1223_v32  ;;  %5906 = vmatprep.mubr.msk.f32.mxu1 %vm547_vm3, %v7050_v28  ;;  %v1208_v2 = vadd.f32 1.0, %v6328_v44  ;;  %v1225_v8 = vmul.f32 %v1209_v20, %v1161_v50 }
 0x2f7   :  { %v6330_v59 = vpop.eup %6329  ;;  %5904 = vmatprep.subr.mxu1 %v1222_v9  ;;  %v1168_v17 = vmul.f32 0.5, %v7116_v4 }
 0x2f8   :  { %6343 = verf.f32 %v1184_v56  ;;  %5905 = vmatpush3.msra.mxu1 %v1222_v9  ;;  %v1224_v16 = vmul.f32 %v1208_v2, %v1160_v3  ;;  %v1211_v60 = vadd.f32 1.0, %v6330_v59 }
 0x2f9   :  { %v6332_v15 = vpop.eup %6331  ;;  %5907 = vmatmul.mubr.msk.f32.vlgmr.msra.gmra.mxu1 %vm547_vm3, %v7099_v6  ;;  %5909 = vmatprep.subr.mxu1 %v1225_v8 }
 0x2fa   :  { %5910 = vmatpush3.msra.mxu1 %v1225_v8  ;;  %5913 = vmatprep.mubr.msk.f32.mxu1 %vm547_vm3, %v7050_v28  ;;  %v1227_v62 = vmul.f32 %v1211_v60, %v1163_v22  ;;  %v1210_v1 = vadd.f32 1.0, %v6332_v15 }
 0x2fb   :  { %v6334_v58 = vpop.eup %6333  ;;  %5911 = vmatprep.subr.mxu1 %v1224_v16 }
 0x2fc   :  { %5912 = vmatpush3.msra.mxu1 %v1224_v16  ;;  %v1226_v42 = vmul.f32 %v1210_v1, %v1162_v27  ;;  %v1213_v5 = vadd.f32 1.0, %v6334_v58 }
 0x2fd   :  { %v6336_v46 = vpop.eup %6335  ;;  %5914 = vmatmul.mubr.msk.f32.vlgmr.msra.gmra.mxu1 %vm547_vm3, %v7099_v6  ;;  %5916 = vmatprep.subr.mxu1 %v1227_v62 }
 0x2fe   :  { %5917 = vmatpush3.msra.mxu1 %v1227_v62  ;;  %5920 = vmatprep.mubr.msk.f32.mxu1 %vm547_vm3, %v7050_v28  ;;  %v1229_v57 = vmul.f32 %v1213_v5, %v1165_v63  ;;  %v1212_v10 = vadd.f32 1.0, %v6336_v46 }
 0x2ff   :  { %v6338_v7 = vpop.eup %6337  ;;  %5918 = vmatprep.subr.mxu1 %v1226_v42 }
 0x300   :  { %5919 = vmatpush3.msra.mxu1 %v1226_v42  ;;  %5923 = vmatprep.subr.mxu0 %v1229_v57  ;;  %v1228_v18 = vmul.f32 %v1212_v10, %v1164_v40  ;;  %v1215_v12 = vadd.f32 1.0, %v6338_v7 }
 0x301   :  { %v6340_v13 = vpop.eup %6339  ;;  %5921 = vmatmul.mubr.msk.f32.vlgmr.msra.gmra.mxu1 %vm547_vm3, %v7099_v6  ;;  %5924 = vmatpush3.msra.mxu0 %v1229_v57 }
 0x302   :  { %5925 = vmatprep.subr.mxu0 %v1228_v18  ;;  %v1231_v36 = vmul.f32 %v1215_v12, %v1167_v52  ;;  %v1214_v21 = vadd.f32 1.0, %v6340_v13  ;;  %5934 = vmatprep.mubr.msk.f32.mxu1 %vm547_vm3, %v7050_v28 }
 0x303   :  { %v6342_v34 = vpop.eup %6341  ;;  %5926 = vmatpush3.msra.mxu0 %v1228_v18 }
 0x304   :  { %5928 = vmatmul.mubr.msk.f32.vlgmr.msra.gmra.mxu0 %vm547_vm3, %v7099_v6  ;;  %5930 = vmatprep.subr.mxu1 %v1231_v36  ;;  %v1230_v24 = vmul.f32 %v1214_v21, %v1166_v61  ;;  %v1217_v11 = vadd.f32 1.0, %v6342_v34 }
 0x305   :  { %v6344_v0 = vpop.eup %6343  ;;  %5931 = vmatpush3.msra.mxu1 %v1231_v36  ;;  %5941 = vmatprep.mubr.msk.f32.mxu0 %vm547_vm3, %v7050_v28  ;;  %v7155_v28 = vpop.permute.xlu1 %1245 }
 0x306   :  { %5932 = vmatprep.subr.mxu1 %v1230_v24  ;;  %v1233_v31 = vmul.f32 %v1217_v11, %v1169_v19  ;;  %v1216_v14 = vadd.f32 1.0, %v6344_v0 }
 0x307   :  { %5933 = vmatpush3.msra.mxu1 %v1230_v24 }
 0x308   :  { %5935 = vmatmul.mubr.msk.f32.vlgmr.msra.gmra.mxu1 %vm547_vm3, %v7099_v6  ;;  %5937 = vmatprep.subr.mxu0 %v1233_v31  ;;  %v1232_v55 = vmul.f32 %v1216_v14, %v1168_v17 }
 0x309   :  { %5938 = vmatpush3.msra.mxu0 %v1233_v31 }
 0x30a   :  { %5939 = vmatprep.subr.mxu0 %v1232_v55 }
 0x30b   :  { %5940 = vmatpush3.msra.mxu0 %v1232_v55 }
 0x30c   :  { %5942 = vmatmul.mubr.msk.f32.vlgmr.msra.gmra.mxu0 %vm547_vm3, %v7099_v6 }
 0x3b1   :  { %v5894_v32 = vpop.f32.mrf.mxu1 }
 0x3b2   :  { %v1326_v38 = vadd.f32 %v5894_v32, %v7155_v28 }
 0x3b3   :  { %v1320_v48 = vpop.f32.mrf.mxu1 }
 0x3b4   :  { %v7159_v4 = vadd.f32 %v6775_v23, %v1326_v38  ;;  %v1321_v44 = vadd.f32 %v1320_v48, %v7153_v54 }
 0x3b5   :  { %v5901_v50 = vpop.f32.mrf.mxu1 }
 0x3b6   :  { %v7163_v9 = vadd.f32 %v1321_v44, %v6779_v25  ;;  %v1401_v20 = vadd.f32 %v5901_v50, %v7155_v28  ;;  %v1875_v6 = vsel %vm283_vm2, %v7159_v4, 0.0 }
 0x3b7   :  { %v1395_v3 = vpop.f32.mrf.mxu1  ;;  %1876 = vadd.xlane.f32.xlu0 %v1875_v6 }
 0x3b8   :  { %v7169_v56 = vadd.f32 %v6781_v26, %v1401_v20  ;;  %v1396_v2 = vadd.f32 %v1395_v3, %v7153_v54  ;;  %v1872_v23 = vsel %vm283_vm2, %v7163_v9, 0.0 }
 0x3b9   :  { %v5908_v59 = vpop.f32.mrf.mxu1  ;;  %1873 = vadd.xlane.f32.xlu1 %v1872_v23 }
 0x3ba   :  { %v7175_v25 = vadd.f32 %v1396_v2, %v6787_v29  ;;  %v1881_v16 = vsel %vm283_vm2, %v7169_v56, 0.0  ;;  %v1476_v26 = vadd.f32 %v5908_v59, %v7155_v28 }
 0x3bb   :  { %v1470_v8 = vpop.f32.mrf.mxu1 }
 0x3bc   :  { %v1471_v22 = vadd.f32 %v1470_v8, %v7153_v54  ;;  %v1878_v1 = vsel %vm283_vm2, %v7175_v25, 0.0  ;;  %v7191_v63 = vadd.f32 %v6789_v30, %v1476_v26 }
 0x3bd   :  { %v5915_v60 = vpop.f32.mrf.mxu1  ;;  %1882 = vadd.xlane.f32.xlu1 %v1881_v16 }
 0x3be   :  { %v7182_v27 = vadd.f32 %v1471_v22, %v6795_v33  ;;  %v1551_v5 = vadd.f32 %v5915_v60, %v7155_v28  ;;  %v1887_v12 = vsel %vm283_vm2, %v7191_v63, 0.0 }
 0x3bf   :  { %v1545_v15 = vpop.f32.mrf.mxu1 }
 0x3c0   :  { %v1546_v62 = vadd.f32 %v1545_v15, %v7153_v54  ;;  %v1884_v40 = vsel %vm283_vm2, %v7182_v27, 0.0  ;;  %v7204_v7 = vadd.f32 %v6799_v35, %v1551_v5 }
 0x3c1   :  { %v5922_v29 = vpop.f32.mrf.mxu1  ;;  %1879 = vadd.xlane.f32.xlu1 %v1878_v1 }
 0x3c2   :  { %v7188_v58 = vadd.f32 %v1546_v62, %v6803_v37  ;;  %v1626_v52 = vadd.f32 %v5922_v29, %v7155_v28  ;;  %v1893_v24 = vsel %vm283_vm2, %v7204_v7, 0.0 }
 0x3c3   :  { %v1620_v42 = vpop.f32.mrf.mxu1 }
 0x3c4   :  { %v1621_v46 = vadd.f32 %v1620_v42, %v7153_v54  ;;  %v5929_v33 = vpop.f32.mrf.mxu0  ;;  %v1890_v57 = vsel %vm283_vm2, %v7188_v58, 0.0  ;;  %v7218_v21 = vadd.f32 %v6807_v39, %v1626_v52 }
 0x3c5   :  { %1885 = vadd.xlane.f32.xlu1 %v1884_v40  ;;  %1891 = vadd.xlane.f32.xlu0 %v1890_v57  ;;  %v1701_v34 = vadd.f32 %v5929_v33, %v7155_v28 }
 0x3c6   :  { %v7200_v37 = vadd.f32 %v1621_v46, %v6811_v41  ;;  %v1695_v10 = vpop.f32.mrf.mxu0  ;;  %v1899_v14 = vsel %vm283_vm2, %v7218_v21, 0.0 }
 0x3c7   :  { %v1696_v30 = vadd.f32 %v1695_v10, %v7153_v54  ;;  %v7230_v39 = vadd.f32 %v6815_v43, %v1701_v34 }
 0x3c8   :  { %v5936_v18 = vpop.f32.mrf.mxu1  ;;  %v1896_v13 = vsel %vm283_vm2, %v7200_v37, 0.0 }
 0x3c9   :  { %v7212_v61 = vadd.f32 %v1696_v30, %v6819_v45  ;;  %1888 = vadd.xlane.f32.xlu1 %v1887_v12  ;;  %1897 = vadd.xlane.f32.xlu0 %v1896_v13  ;;  %v1776_v31 = vadd.f32 %v5936_v18, %v7155_v28  ;;  %v1905_v43 = vsel %vm283_vm2, %v7230_v39, 0.0 }
 0x3ca   :  { %v1770_v41 = vpop.f32.mrf.mxu1 }
 0x3cb   :  { %v1771_v36 = vadd.f32 %v1770_v41, %v7153_v54  ;;  %v1902_v35 = vsel %vm283_vm2, %v7212_v61, 0.0 }
 0x3cc   :  { %v5943_v19 = vpop.f32.mrf.mxu0 }
 0x3cd   :  { %v7224_v45 = vadd.f32 %v1771_v36, %v6827_v49  ;;  %1894 = vadd.xlane.f32.xlu1 %v1893_v24  ;;  %1903 = vadd.xlane.f32.xlu0 %v1902_v35  ;;  %v1851_v32 = vadd.f32 %v5943_v19, %v7155_v28 }
 0x3ce   :  { %v1845_v11 = vpop.f32.mrf.mxu0 }
 0x3cf   :  { %v1846_v0 = vadd.f32 %v1845_v11, %v7153_v54  ;;  %v1908_v17 = vsel %vm283_vm2, %v7224_v45, 0.0  ;;  %v7241_v54 = vadd.f32 %v6823_v47, %v1776_v31  ;;  %v7247_v38 = vadd.f32 %v6831_v51, %v1851_v32 }
 0x3d1   :  { %v7236_v55 = vadd.f32 %v1846_v0, %v6835_v53  ;;  %1900 = vadd.xlane.f32.xlu1 %v1899_v14  ;;  %1909 = vadd.xlane.f32.xlu0 %v1908_v17  ;;  %v1911_v53 = vsel %vm283_vm2, %v7241_v54, 0.0  ;;  %v1917_v48 = vsel %vm283_vm2, %v7247_v38, 0.0 }
 0x3d3   :  { %v1914_v49 = vsel %vm283_vm2, %v7236_v55, 0.0 }
 0x3d5   :  { %1906 = vadd.xlane.f32.xlu1 %v1905_v43  ;;  %1915 = vadd.xlane.f32.xlu0 %v1914_v49 }
 0x3d9   :  { %1912 = vadd.xlane.f32.xlu1 %v1911_v53 }
 0x3dd   :  { %1918 = vadd.xlane.f32.xlu1 %v1917_v48 }
 0x440   :  { %v1877_v47 = vpop.xlane.xlu0 %1876 }
 0x441   :  { %v1921_v44 = vmul.f32 0.03125, %v1877_v47 }
 0x442   :  { %v1874_v50 = vpop.xlane.xlu1 %1873 }
 0x443   :  { %v7254_v28 = vsub.f32 %v7159_v4, %v1921_v44  ;;  %v1920_v20 = vmul.f32 0.03125, %v1874_v50 }
 0x445   :  { %v7257_v6 = vsub.f32 %v7163_v9, %v1920_v20  ;;  %v1953_v51 = vmul.f32 %v7254_v28, %v7254_v28 }
 0x446   :  { %v1883_v3 = vpop.xlane.xlu1 %1882 }
 0x447   :  { %v1923_v2 = vmul.f32 0.03125, %v1883_v3  ;;  %v1971_v23 = vsel %vm283_vm2, %v1953_v51, 0.0  ;;  %v1952_v59 = vmul.f32 %v7257_v6, %v7257_v6 }
 0x448   :  { %1972 = vadd.xlane.f32.xlu1 %v1971_v23 }
 0x449   :  { %v7265_v8 = vsub.f32 %v7169_v56, %v1923_v2  ;;  %v1968_v22 = vsel %vm283_vm2, %v1952_v59, 0.0 }
 0x44a   :  { %1969 = vadd.xlane.f32.xlu0 %v1968_v22  ;;  %v1880_v16 = vpop.xlane.xlu1 %1879 }
 0x44b   :  { %v1922_v60 = vmul.f32 0.03125, %v1880_v16  ;;  %v1955_v26 = vmul.f32 %v7265_v8, %v7265_v8 }
 0x44d   :  { %v7271_v15 = vsub.f32 %v7175_v25, %v1922_v60  ;;  %v1977_v62 = vsel %vm283_vm2, %v1955_v26, 0.0 }
 0x44e   :  { %v1892_v1 = vpop.xlane.xlu0 %1891  ;;  %1978 = vadd.xlane.f32.xlu1 %v1977_v62  ;;  %v1886_v29 = vpop.xlane.xlu1 %1885 }
 0x44f   :  { %v1926_v42 = vmul.f32 0.03125, %v1892_v1  ;;  %v1924_v5 = vmul.f32 0.03125, %v1886_v29  ;;  %v1954_v46 = vmul.f32 %v7271_v15, %v7271_v15 }
 0x451   :  { %v7277_v33 = vsub.f32 %v7188_v58, %v1926_v42  ;;  %v7280_v40 = vsub.f32 %v7182_v27, %v1924_v5  ;;  %v1974_v57 = vsel %vm283_vm2, %v1954_v46, 0.0 }
 0x452   :  { %v1898_v10 = vpop.xlane.xlu0 %1897  ;;  %1975 = vadd.xlane.f32.xlu0 %v1974_v57  ;;  %v1889_v30 = vpop.xlane.xlu1 %1888 }
 0x453   :  { %v1928_v52 = vmul.f32 0.03125, %v1898_v10  ;;  %v1925_v18 = vmul.f32 0.03125, %v1889_v30  ;;  %v1956_v12 = vmul.f32 %v7280_v40, %v7280_v40  ;;  %v1958_v13 = vmul.f32 %v7277_v33, %v7277_v33 }
 0x455   :  { %v7288_v41 = vsub.f32 %v7200_v37, %v1928_v52  ;;  %v7291_v36 = vsub.f32 %v7191_v63, %v1925_v18  ;;  %v1980_v35 = vsel %vm283_vm2, %v1956_v12, 0.0  ;;  %v1986_v17 = vsel %vm283_vm2, %v1958_v13, 0.0  ;;  %v2123_v12 = vld [vmem:[%s8632_s10 + $0x18] sm:$0xff] }
 0x456   :  { %v1904_v34 = vpop.xlane.xlu0 %1903  ;;  %1981 = vadd.xlane.f32.xlu0 %v1980_v35  ;;  %v1895_v19 = vpop.xlane.xlu1 %1894  ;;  %5944 = vmatprep.subr.mxu1 %v2123_v12 }
 0x457   :  { %v1930_v24 = vmul.f32 0.03125, %v1904_v34  ;;  %v1927_v11 = vmul.f32 0.03125, %v1895_v19  ;;  %v1957_v0 = vmul.f32 %v7291_v36, %v7291_v36  ;;  %v1960_v32 = vmul.f32 %v7288_v41, %v7288_v41  ;;  %v2122_v19 = vld [vmem:[%s8632_s10 + $0x10] sm:$0xff]  ;;  %5945 = vmatpush3.msra.mxu1 %v2123_v12 }
 0x458   :  { %5946 = vmatprep.subr.mxu1 %v2122_v19 }
 0x459   :  { %v7298_v31 = vsub.f32 %v7212_v61, %v1930_v24  ;;  %v7301_v14 = vsub.f32 %v7204_v7, %v1927_v11  ;;  %v1983_v49 = vsel %vm283_vm2, %v1957_v0, 0.0  ;;  %v1992_v3 = vsel %vm283_vm2, %v1960_v32, 0.0  ;;  %5947 = vmatpush3.msra.mxu1 %v2122_v19  ;;  %v2120_v32 = vld [vmem:[%s8632_s10] sm:$0xff] }
 0x45a   :  { %v1910_v43 = vpop.xlane.xlu0 %1909  ;;  %1987 = vadd.xlane.f32.xlu0 %v1986_v17  ;;  %1984 = vadd.xlane.f32.xlu1 %v1983_v49  ;;  %v1901_v53 = vpop.xlane.xlu1 %1900  ;;  %v2121_v17 = vld [vmem:[%s8632_s10 + $0x8] sm:$0xff] }
 0x45b   :  { %v1932_v48 = vmul.f32 0.03125, %v1910_v43  ;;  %v1929_v47 = vmul.f32 0.03125, %v1901_v53  ;;  %v1959_v44 = vmul.f32 %v7301_v14, %v7301_v14  ;;  %v1962_v50 = vmul.f32 %v7298_v31, %v7298_v31  ;;  %5948 = vmatprep.subr.mxu1 %v2121_v17  ;;  %v7364_v53 = vld [vmem:[%s8634_s12 + $0x78] sm:$0xff] }
 0x45c   :  { %5949 = vmatpush3.msra.mxu1 %v2121_v17  ;;  %5976 = vmatprep.subr.mxu0 %v7364_v53 }
 0x45d   :  { %v7311_v20 = vsub.f32 %v7224_v45, %v1932_v48  ;;  %v7314_v51 = vsub.f32 %v7218_v21, %v1929_v47  ;;  %v1989_v2 = vsel %vm283_vm2, %v1959_v44, 0.0  ;;  %v1998_v26 = vsel %vm283_vm2, %v1962_v50, 0.0  ;;  %5950 = vmatprep.subr.mxu1 %v2120_v32  ;;  %v7369_v48 = vld [vmem:[%s8634_s12 + $0x70] sm:$0xff]  ;;  %5977 = vmatpush3.msra.mxu0 %v7364_v53  ;;  %v7377_v47 = vld [vmem:[%s8634_s12 + $0x68] sm:$0xff] }
 0x45e   :  { %v1916_v23 = vpop.xlane.xlu0 %1915  ;;  %1993 = vadd.xlane.f32.xlu0 %v1992_v3  ;;  %1990 = vadd.xlane.f32.xlu1 %v1989_v2  ;;  %v1907_v59 = vpop.xlane.xlu1 %1906 }
 0x45f   :  { %v1934_v22 = vmul.f32 0.03125, %v1916_v23  ;;  %v1931_v16 = vmul.f32 0.03125, %v1907_v59  ;;  %v1961_v60 = vmul.f32 %v7314_v51, %v7314_v51  ;;  %v1964_v42 = vmul.f32 %v7311_v20, %v7311_v20  ;;  %5951 = vmatpush3.msra.mxu1 %v2120_v32  ;;  %5978 = vmatprep.subr.mxu0 %v7369_v48 }
 0x460   :  { %6243 = vmatprep.subr.mxu1 %v7364_v53  ;;  %5979 = vmatpush3.msra.mxu0 %v7369_v48 }
 0x461   :  { %v7322_v62 = vsub.f32 %v7236_v55, %v1934_v22  ;;  %v7325_v1 = vsub.f32 %v7230_v39, %v1931_v16  ;;  %v1995_v29 = vsel %vm283_vm2, %v1961_v60, 0.0  ;;  %v2004_v30 = vsel %vm283_vm2, %v1964_v42, 0.0  ;;  %5980 = vmatprep.subr.mxu0 %v7377_v47 }
 0x462   :  { %1999 = vadd.xlane.f32.xlu0 %v1998_v26  ;;  %1996 = vadd.xlane.f32.xlu1 %v1995_v29  ;;  %v1913_v5 = vpop.xlane.xlu1 %1912 }
 0x463   :  { %v1933_v46 = vmul.f32 0.03125, %v1913_v5  ;;  %v1963_v57 = vmul.f32 %v7325_v1, %v7325_v1  ;;  %v1966_v18 = vmul.f32 %v7322_v62, %v7322_v62  ;;  %5981 = vmatpush3.msra.mxu0 %v7377_v47 }
 0x465   :  { %v7333_v10 = vsub.f32 %v7241_v54, %v1933_v46  ;;  %v2001_v52 = vsel %vm283_vm2, %v1963_v57, 0.0  ;;  %v2010_v11 = vsel %vm283_vm2, %v1966_v18, 0.0 }
 0x466   :  { %2005 = vadd.xlane.f32.xlu0 %v2004_v30  ;;  %2002 = vadd.xlane.f32.xlu1 %v2001_v52  ;;  %v1919_v13 = vpop.xlane.xlu1 %1918 }
 0x467   :  { %v1935_v35 = vmul.f32 0.03125, %v1919_v13  ;;  %v1965_v34 = vmul.f32 %v7333_v10, %v7333_v10 }
 0x469   :  { %v7348_v24 = vsub.f32 %v7247_v38, %v1935_v35  ;;  %v2007_v0 = vsel %vm283_vm2, %v1965_v34, 0.0  ;;  %v7386_v35 = vld [vmem:[%s8630_s8] ss:$0 sm:$0xff] }
 0x46a   :  { %2011 = vadd.xlane.f32.xlu0 %v2010_v11  ;;  %2008 = vadd.xlane.f32.xlu1 %v2007_v0 }
 0x46b   :  { %v1967_v49 = vmul.f32 %v7348_v24, %v7348_v24 }
 0x46d   :  { %v2013_v43 = vsel %vm283_vm2, %v1967_v49, 0.0 }
 0x46e   :  { %2014 = vadd.xlane.f32.xlu1 %v2013_v43 }
 0x4d1   :  { %v1973_v44 = vpop.xlane.xlu1 %1972 }
 0x4d2   :  { %v2017_v50 = vmul.f32 0.03125, %v1973_v44 }
 0x4d3   :  { %v1970_v3 = vpop.xlane.xlu0 %1969 }
 0x4d4   :  { %v2033_v2 = vadd.f32 1e-05, %v2017_v50  ;;  %v2016_v23 = vmul.f32 0.03125, %v1970_v3  ;;  %v7394_v3 = vld [vmem:[%s8631_s9] ss:$0 sm:$0xff] }
 0x4d6   :  { %6345 = vrsqrt.f32 %v2033_v2  ;;  %v2032_v59 = vadd.f32 1e-05, %v2016_v23 }
 0x4d7   :  { %v1979_v22 = vpop.xlane.xlu1 %1978 }
 0x4d8   :  { %6347 = vrsqrt.f32 %v2032_v59  ;;  %v2019_v16 = vmul.f32 0.03125, %v1979_v22 }
 0x4da   :  { %v2035_v60 = vadd.f32 1e-05, %v2019_v16 }
 0x4db   :  { %v1976_v26 = vpop.xlane.xlu0 %1975 }
 0x4dc   :  { %6349 = vrsqrt.f32 %v2035_v60  ;;  %v2018_v29 = vmul.f32 0.03125, %v1976_v26 }
 0x4de   :  { %v2034_v42 = vadd.f32 1e-05, %v2018_v29 }
 0x4df   :  { %v1982_v5 = vpop.xlane.xlu0 %1981 }
 0x4e0   :  { %6351 = vrsqrt.f32 %v2034_v42  ;;  %v2020_v46 = vmul.f32 0.03125, %v1982_v5 }
 0x4e2   :  { %v2036_v57 = vadd.f32 1e-05, %v2020_v46 }
 0x4e3   :  { %v6346_v30 = vpop.eup %6345  ;;  %v1988_v52 = vpop.xlane.xlu0 %1987 }
 0x4e4   :  { %v1985_v18 = vpop.xlane.xlu1 %1984  ;;  %6353 = vrsqrt.f32 %v2036_v57  ;;  %v2022_v12 = vmul.f32 0.03125, %v1988_v52  ;;  %v2065_v34 = vmul.f32 %v6346_v30, %v7254_v28 }
 0x4e5   :  { %v2021_v13 = vmul.f32 0.03125, %v1985_v18  ;;  %v6348_v19 = vpop.eup %6347 }
 0x4e6   :  { %v2038_v11 = vadd.f32 1e-05, %v2022_v12  ;;  %v2064_v17 = vmul.f32 %v6348_v19, %v7257_v6  ;;  %v2085_v43 = vmul.f32 %v7386_v35, %v2065_v34 }
 0x4e7   :  { %v2037_v0 = vadd.f32 1e-05, %v2021_v13  ;;  %v1994_v49 = vpop.xlane.xlu0 %1993 }
 0x4e8   :  { %v1991_v32 = vpop.xlane.xlu1 %1990  ;;  %6355 = vrsqrt.f32 %v2038_v11  ;;  %v2024_v44 = vmul.f32 0.03125, %v1994_v49  ;;  %v2084_v2 = vmul.f32 %v7386_v35, %v2064_v17  ;;  %v2105_v60 = vadd.f32 %v7394_v3, %v2085_v43 }
 0x4e9   :  { %v2023_v50 = vmul.f32 0.03125, %v1991_v32  ;;  %v6350_v28 = vpop.eup %6349  ;;  %6357 = vrsqrt.f32 %v2037_v0 }
 0x4ea   :  { %v2040_v23 = vadd.f32 1e-05, %v2024_v44  ;;  %v2104_v6 = vadd.f32 %v7394_v3, %v2084_v2  ;;  %v2067_v26 = vmul.f32 %v6350_v28, %v7265_v8 }
 0x4eb   :  { %v2039_v59 = vadd.f32 1e-05, %v2023_v50  ;;  %v2000_v22 = vpop.xlane.xlu0 %1999 }
 0x4ec   :  { %v1997_v16 = vpop.xlane.xlu1 %1996  ;;  %6359 = vrsqrt.f32 %v2040_v23  ;;  %v2026_v29 = vmul.f32 0.03125, %v2000_v22  ;;  %5952 = vmatprep.mubr.msk.f32.mxu1 %vm283_vm2, %v2104_v6  ;;  %v2087_v12 = vmul.f32 %v7386_v35, %v2067_v26 }
 0x4ed   :  { %v2025_v42 = vmul.f32 0.03125, %v1997_v16  ;;  %v6352_v5 = vpop.eup %6351  ;;  %6361 = vrsqrt.f32 %v2039_v59  ;;  %5953 = vmatmul.mubr.msk.f32.vlgmr.msra.gmra.mxu1 %vm283_vm2, %v2105_v60 }
 0x4ee   :  { %v2042_v46 = vadd.f32 1e-05, %v2026_v29  ;;  %v2066_v30 = vmul.f32 %v6352_v5, %v7271_v15  ;;  %6259 = vmatpush3.msra.mxu1 %v7364_v53  ;;  %v2107_v32 = vadd.f32 %v7394_v3, %v2087_v12 }
 0x4ef   :  { %v2041_v57 = vadd.f32 1e-05, %v2025_v42  ;;  %v2006_v52 = vpop.xlane.xlu0 %2005  ;;  %6244 = vmatprep.subr.mxu1 %v7369_v48 }
 0x4f0   :  { %v2003_v18 = vpop.xlane.xlu1 %2002  ;;  %6363 = vrsqrt.f32 %v2042_v46  ;;  %v2028_v8 = vmul.f32 0.03125, %v2006_v52  ;;  %v2086_v34 = vmul.f32 %v7386_v35, %v2066_v30  ;;  %6260 = vmatpush3.msra.mxu1 %v7369_v48 }
 0x4f1   :  { %v2027_v13 = vmul.f32 0.03125, %v2003_v18  ;;  %v6354_v19 = vpop.eup %6353  ;;  %6365 = vrsqrt.f32 %v2041_v57  ;;  %6245 = vmatprep.subr.mxu1 %v7377_v47 }
 0x4f2   :  { %v2044_v15 = vadd.f32 1e-05, %v2028_v8  ;;  %v2106_v53 = vadd.f32 %v7394_v3, %v2086_v34  ;;  %v2068_v0 = vmul.f32 %v6354_v19, %v7280_v40  ;;  %6261 = vmatpush3.msra.mxu1 %v7377_v47 }
 0x4f3   :  { %v2043_v11 = vadd.f32 1e-05, %v2027_v13  ;;  %v2012_v17 = vpop.xlane.xlu0 %2011 }
 0x4f4   :  { %v2009_v49 = vpop.xlane.xlu1 %2008  ;;  %6367 = vrsqrt.f32 %v2044_v15  ;;  %v2030_v43 = vmul.f32 0.03125, %v2012_v17  ;;  %5955 = vmatprep.mubr.msk.f32.mxu1 %vm283_vm2, %v2106_v53  ;;  %v2088_v48 = vmul.f32 %v7386_v35, %v2068_v0 }
 0x4f5   :  { %v2029_v44 = vmul.f32 0.03125, %v2009_v49  ;;  %v6356_v50 = vpop.eup %6355  ;;  %6369 = vrsqrt.f32 %v2043_v11  ;;  %5956 = vmatmul.mubr.msk.f32.gmra.mxu1 %vm283_vm2, %v2107_v32 }
 0x4f6   :  { %v6358_v2 = vpop.eup %6357  ;;  %v2046_v28 = vadd.f32 1e-05, %v2030_v43  ;;  %v2108_v47 = vadd.f32 %v7394_v3, %v2088_v48  ;;  %v2070_v23 = vmul.f32 %v6356_v50, %v7277_v33 }
 0x4f7   :  { %v2045_v40 = vadd.f32 1e-05, %v2029_v44  ;;  %v2069_v6 = vmul.f32 %v6358_v2, %v7291_v36 }
 0x4f8   :  { %v2015_v59 = vpop.xlane.xlu1 %2014  ;;  %6371 = vrsqrt.f32 %v2046_v28  ;;  %5958 = vmatprep.mubr.msk.f32.mxu1 %vm283_vm2, %v2108_v47  ;;  %v2090_v16 = vmul.f32 %v7386_v35, %v2070_v23  ;;  %v2414_v23 = vld [vmem:[%s8634_s12 + $0x60] sm:$0xff] }
 0x4f9   :  { %v2031_v22 = vmul.f32 0.03125, %v2015_v59  ;;  %v6360_v60 = vpop.eup %6359  ;;  %6373 = vrsqrt.f32 %v2045_v40  ;;  %v2089_v26 = vmul.f32 %v7386_v35, %v2069_v6  ;;  %5982 = vmatprep.subr.mxu0 %v2414_v23  ;;  %6246 = vmatprep.subr.mxu1 %v2414_v23  ;;  %v2410_v59 = vld [vmem:[%s8634_s12 + $0x40] sm:$0xff]  ;;  %v2409_v6 = vld [vmem:[%s8634_s12 + $0x38] sm:$0xff] }
 0x4fa   :  { %v6362_v29 = vpop.eup %6361  ;;  %v2110_v5 = vadd.f32 %v7394_v3, %v2090_v16  ;;  %v2072_v46 = vmul.f32 %v6360_v60, %v7288_v41  ;;  %5983 = vmatpush3.msra.mxu0 %v2414_v23  ;;  %6262 = vmatpush3.msra.mxu1 %v2414_v23  ;;  %v2407_v16 = vld [vmem:[%s8634_s12 + $0x28] sm:$0xff]  ;;  %v2406_v60 = vld [vmem:[%s8634_s12 + $0x20] sm:$0xff] }
 0x4fb   :  { %v2047_v42 = vadd.f32 1e-05, %v2031_v22  ;;  %v2109_v33 = vadd.f32 %v7394_v3, %v2089_v26  ;;  %v2071_v36 = vmul.f32 %v6362_v29, %v7301_v14  ;;  %v2408_v22 = vld [vmem:[%s8634_s12 + $0x30] sm:$0xff]  ;;  %v2405_v26 = vld [vmem:[%s8634_s12 + $0x18] sm:$0xff] }
 0x4fc   :  { %v2092_v57 = vmul.f32 %v7386_v35, %v2072_v46  ;;  %v2404_v29 = vld [vmem:[%s8634_s12 + $0x10] sm:$0xff]  ;;  %v7504_v46 = vld [vmem:[%s8633_s11] ss:$0 sm:$0xff] }
 0x4fd   :  { %6375 = vrsqrt.f32 %v2047_v42  ;;  %v6364_v30 = vpop.eup %6363  ;;  %5959 = vmatmul.mubr.msk.f32.gmra.mxu1 %vm283_vm2, %v2109_v33  ;;  %v2091_v52 = vmul.f32 %v7386_v35, %v2071_v36  ;;  %v2403_v42 = vld [vmem:[%s8634_s12 + $0x8] sm:$0xff] }
 0x4fe   :  { %v6366_v18 = vpop.eup %6365  ;;  %5961 = vmatprep.mubr.msk.f32.mxu1 %vm283_vm2, %v2110_v5  ;;  %v2112_v12 = vadd.f32 %v7394_v3, %v2092_v57  ;;  %v2074_v8 = vmul.f32 %v6364_v30, %v7298_v31  ;;  %v2402_v5 = vld [vmem:[%s8634_s12] sm:$0xff] }
 0x4ff   :  { %v2111_v41 = vadd.f32 %v7394_v3, %v2091_v52  ;;  %v2073_v13 = vmul.f32 %v6366_v18, %v7314_v51 }
 0x500   :  { %v2094_v14 = vmul.f32 %v7386_v35, %v2074_v8 }
 0x501   :  { %v6368_v34 = vpop.eup %6367  ;;  %5962 = vmatmul.mubr.msk.f32.gmra.mxu1 %vm283_vm2, %v2111_v41  ;;  %v2093_v19 = vmul.f32 %v7386_v35, %v2073_v13 }
 0x502   :  { %v6370_v15 = vpop.eup %6369  ;;  %5964 = vmatprep.mubr.msk.f32.mxu1 %vm283_vm2, %v2112_v12  ;;  %v2114_v11 = vadd.f32 %v7394_v3, %v2094_v14  ;;  %v2076_v53 = vmul.f32 %v6368_v34, %v7311_v20 }
 0x503   :  { %v2113_v31 = vadd.f32 %v7394_v3, %v2093_v19  ;;  %v2075_v0 = vmul.f32 %v6370_v15, %v7325_v1 }
 0x504   :  { %v2096_v51 = vmul.f32 %v7386_v35, %v2076_v53 }
 0x505   :  { %v6372_v17 = vpop.eup %6371  ;;  %5965 = vmatmul.mubr.msk.f32.gmra.mxu1 %vm283_vm2, %v2113_v31  ;;  %v2095_v49 = vmul.f32 %v7386_v35, %v2075_v0 }
 0x506   :  { %v6374_v32 = vpop.eup %6373  ;;  %5967 = vmatprep.mubr.msk.f32.mxu1 %vm283_vm2, %v2114_v11  ;;  %v2116_v43 = vadd.f32 %v7394_v3, %v2096_v51  ;;  %v2078_v44 = vmul.f32 %v6372_v17, %v7322_v62 }
 0x507   :  { %v2115_v20 = vadd.f32 %v7394_v3, %v2095_v49  ;;  %v2077_v48 = vmul.f32 %v6374_v32, %v7333_v10 }
 0x508   :  { %v2098_v1 = vmul.f32 %v7386_v35, %v2078_v44 }
 0x509   :  { %5968 = vmatmul.mubr.msk.f32.gmra.mxu1 %vm283_vm2, %v2115_v20  ;;  %v2097_v2 = vmul.f32 %v7386_v35, %v2077_v48 }
 0x50a   :  { %v6376_v50 = vpop.eup %6375  ;;  %5970 = vmatprep.mubr.msk.f32.mxu1 %vm283_vm2, %v2116_v43  ;;  %v2118_v28 = vadd.f32 %v7394_v3, %v2098_v1 }
 0x50b   :  { %v2079_v40 = vmul.f32 %v6376_v50, %v7348_v24  ;;  %v2117_v47 = vadd.f32 %v7394_v3, %v2097_v2  ;;  %v2413_v24 = vld [vmem:[%s8634_s12 + $0x58] sm:$0xff] }
 0x50c   :  { %5984 = vmatprep.subr.mxu0 %v2413_v24  ;;  %6247 = vmatprep.subr.mxu1 %v2413_v24 }
 0x50d   :  { %v2099_v62 = vmul.f32 %v7386_v35, %v2079_v40  ;;  %5971 = vmatmul.mubr.msk.f32.gmra.mxu1 %vm283_vm2, %v2117_v47  ;;  %5985 = vmatpush3.msra.mxu0 %v2413_v24  ;;  %v2412_v35 = vld [vmem:[%s8634_s12 + $0x50] sm:$0xff] }
 0x50e   :  { %5973 = vmatprep.mubr.msk.f32.mxu1 %vm283_vm2, %v2118_v28  ;;  %6263 = vmatpush3.msra.mxu1 %v2413_v24 }
 0x50f   :  { %v2119_v10 = vadd.f32 %v7394_v3, %v2099_v62  ;;  %5986 = vmatprep.subr.mxu0 %v2412_v35  ;;  %6248 = vmatprep.subr.mxu1 %v2412_v35  ;;  %v2411_v3 = vld [vmem:[%s8634_s12 + $0x48] sm:$0xff] }
 0x510   :  { %5987 = vmatpush3.msra.mxu0 %v2412_v35  ;;  %6264 = vmatpush3.msra.mxu1 %v2412_v35 }
 0x511   :  { %5974 = vmatmul.mubr.msk.f32.gmra.mxu1 %vm283_vm2, %v2119_v10  ;;  %5988 = vmatprep.subr.mxu0 %v2411_v3 }
 0x512   :  { %6249 = vmatprep.subr.mxu1 %v2411_v3  ;;  %5989 = vmatpush3.msra.mxu0 %v2411_v3 }
 0x513   :  { %6265 = vmatpush3.msra.mxu1 %v2411_v3  ;;  %5990 = vmatprep.subr.mxu0 %v2410_v59 }
 0x514   :  { %6250 = vmatprep.subr.mxu1 %v2410_v59  ;;  %5991 = vmatpush3.msra.mxu0 %v2410_v59 }
 0x515   :  { %6266 = vmatpush3.msra.mxu1 %v2410_v59  ;;  %5992 = vmatprep.subr.mxu0 %v2409_v6 }
 0x516   :  { %6251 = vmatprep.subr.mxu1 %v2409_v6  ;;  %5993 = vmatpush3.msra.mxu0 %v2409_v6 }
 0x517   :  { %6267 = vmatpush3.msra.mxu1 %v2409_v6  ;;  %5994 = vmatprep.subr.mxu0 %v2408_v22 }
 0x518   :  { %6252 = vmatprep.subr.mxu1 %v2408_v22  ;;  %5995 = vmatpush3.msra.mxu0 %v2408_v22 }
 0x519   :  { %6268 = vmatpush3.msra.mxu1 %v2408_v22  ;;  %5996 = vmatprep.subr.mxu0 %v2407_v16 }
 0x51a   :  { %6253 = vmatprep.subr.mxu1 %v2407_v16  ;;  %5997 = vmatpush3.msra.mxu0 %v2407_v16 }
 0x51b   :  { %6269 = vmatpush3.msra.mxu1 %v2407_v16  ;;  %5998 = vmatprep.subr.mxu0 %v2406_v60 }
 0x51c   :  { %6254 = vmatprep.subr.mxu1 %v2406_v60  ;;  %5999 = vmatpush3.msra.mxu0 %v2406_v60 }
 0x51d   :  { %6270 = vmatpush3.msra.mxu1 %v2406_v60  ;;  %6000 = vmatprep.subr.mxu0 %v2405_v26 }
 0x51e   :  { %6255 = vmatprep.subr.mxu1 %v2405_v26  ;;  %6001 = vmatpush3.msra.mxu0 %v2405_v26 }
 0x51f   :  { %6271 = vmatpush3.msra.mxu1 %v2405_v26  ;;  %6002 = vmatprep.subr.mxu0 %v2404_v29 }
 0x520   :  { %6256 = vmatprep.subr.mxu1 %v2404_v29  ;;  %6003 = vmatpush3.msra.mxu0 %v2404_v29 }
 0x521   :  { %6272 = vmatpush3.msra.mxu1 %v2404_v29  ;;  %6004 = vmatprep.subr.mxu0 %v2403_v42 }
 0x522   :  { %6257 = vmatprep.subr.mxu1 %v2403_v42  ;;  %6005 = vmatpush3.msra.mxu0 %v2403_v42 }
 0x523   :  { %6273 = vmatpush3.msra.mxu1 %v2403_v42  ;;  %6006 = vmatprep.subr.mxu0 %v2402_v5 }
 0x524   :  { %6258 = vmatprep.subr.mxu1 %v2402_v5  ;;  %6007 = vmatpush3.msra.mxu0 %v2402_v5 }
 0x525   :  { %6274 = vmatpush3.msra.mxu1 %v2402_v5 }
 0x5ad   :  { %v5954_v33 = vpop.f32.mrf.mxu1 }
 0x5ae   :  { %v2249_v36 = vadd.f32 %v5954_v33, %v7504_v46 }
 0x5af   :  { %v2243_v57 = vpop.f32.mrf.mxu1 }
 0x5b0   :  { %v2339_v30 = vmul.f32 0.70710677, %v2249_v36  ;;  %v2244_v52 = vadd.f32 %v7504_v46, %v2243_v57  ;;  %v2323_v1 = vmul.f32 0.5, %v2249_v36 }
 0x5b2   :  { %6377 = verf.f32 %v2339_v30  ;;  %v2338_v18 = vmul.f32 0.70710677, %v2244_v52  ;;  %v2322_v43 = vmul.f32 0.5, %v2244_v52 }
 0x5b4   :  { %6379 = verf.f32 %v2338_v18 }
 0x5b5   :  { %v5957_v12 = vpop.f32.mrf.mxu1 }
 0x5b6   :  { %v2259_v8 = vadd.f32 %v5957_v12, %v7504_v46 }
 0x5b7   :  { %v2253_v41 = vpop.f32.mrf.mxu1 }
 0x5b8   :  { %v2341_v13 = vmul.f32 0.70710677, %v2259_v8  ;;  %v2254_v14 = vadd.f32 %v7504_v46, %v2253_v41  ;;  %v2325_v5 = vmul.f32 0.5, %v2259_v8 }
 0x5ba   :  { %6381 = verf.f32 %v2341_v13  ;;  %v2340_v34 = vmul.f32 0.70710677, %v2254_v14  ;;  %v2324_v26 = vmul.f32 0.5, %v2254_v14 }
 0x5bc   :  { %6383 = verf.f32 %v2340_v34 }
 0x5bd   :  { %v5960_v19 = vpop.f32.mrf.mxu1 }
 0x5be   :  { %v7511_v15 = vadd.f32 %v5960_v19, %v7504_v46 }
 0x5bf   :  { %v6378_v11 = vpop.eup %6377  ;;  %v2263_v53 = vpop.f32.mrf.mxu1 }
 0x5c0   :  { %v2343_v31 = vmul.f32 0.70710677, %v7511_v15  ;;  %v2264_v0 = vadd.f32 %v7504_v46, %v2263_v53  ;;  %v2371_v49 = vadd.f32 1.0, %v6378_v11 }
 0x5c1   :  { %v6380_v51 = vpop.eup %6379  ;;  %v5963_v17 = vpop.f32.mrf.mxu1 }
 0x5c2   :  { %6385 = verf.f32 %v2343_v31  ;;  %v2342_v32 = vmul.f32 0.70710677, %v2264_v0  ;;  %v7516_v44 = vadd.f32 %v5963_v17, %v7504_v46  ;;  %v2370_v48 = vadd.f32 1.0, %v6380_v51 }
 0x5c3   :  { %v2273_v20 = vpop.f32.mrf.mxu1  ;;  %v2387_v47 = vmul.f32 %v2371_v49, %v2323_v1  ;;  %v2327_v51 = vmul.f32 0.5, %v7511_v15  ;;  %v2326_v17 = vmul.f32 0.5, %v2264_v0 }
 0x5c4   :  { %6387 = verf.f32 %v2342_v32  ;;  %v2274_v50 = vadd.f32 %v7504_v46, %v2273_v20  ;;  %v2345_v2 = vmul.f32 0.70710677, %v7516_v44  ;;  %v2386_v40 = vmul.f32 %v2370_v48, %v2322_v43 }
 0x5c5   :  { %v5966_v28 = vpop.f32.mrf.mxu1  ;;  %v2329_v15 = vmul.f32 0.5, %v7516_v44 }
 0x5c6   :  { %v2344_v62 = vmul.f32 0.70710677, %v2274_v50  ;;  %v7521_v10 = vadd.f32 %v5966_v28, %v7504_v46  ;;  %6389 = verf.f32 %v2345_v2  ;;  %6008 = vmatprep.mubr.f32.mxu0 %v2386_v40  ;;  %v2328_v2 = vmul.f32 0.5, %v2274_v50 }
 0x5c7   :  { %v6382_v23 = vpop.eup %6381  ;;  %v2283_v24 = vpop.f32.mrf.mxu1  ;;  %6009 = vmatmul.mubr.f32.vlgmr.msra.gmra.mxu0 %v2387_v47 }
 0x5c8   :  { %6391 = verf.f32 %v2344_v62  ;;  %v2347_v35 = vmul.f32 0.70710677, %v7521_v10  ;;  %v2284_v3 = vadd.f32 %v7504_v46, %v2283_v24  ;;  %v2373_v60 = vadd.f32 1.0, %v6382_v23 }
 0x5c9   :  { %v6384_v59 = vpop.eup %6383  ;;  %v5969_v6 = vpop.f32.mrf.mxu1 }
 0x5ca   :  { %6393 = verf.f32 %v2347_v35  ;;  %v2346_v22 = vmul.f32 0.70710677, %v2284_v3  ;;  %v7526_v16 = vadd.f32 %v5969_v6, %v7504_v46  ;;  %v2372_v42 = vadd.f32 1.0, %v6384_v59 }
 0x5cb   :  { %v2293_v29 = vpop.f32.mrf.mxu1  ;;  %v2389_v12 = vmul.f32 %v2373_v60, %v2325_v5  ;;  %v2330_v59 = vmul.f32 0.5, %v2284_v3  ;;  %v2331_v60 = vmul.f32 0.5, %v7521_v10 }
 0x5cc   :  { %6395 = verf.f32 %v2346_v22  ;;  %v2349_v33 = vmul.f32 0.70710677, %v7526_v16  ;;  %v2294_v36 = vadd.f32 %v7504_v46, %v2293_v29  ;;  %v2388_v30 = vmul.f32 %v2372_v42, %v2324_v26 }
 0x5cd   :  { %v5972_v57 = vpop.f32.mrf.mxu1 }
 0x5ce   :  { %6397 = verf.f32 %v2349_v33  ;;  %v2348_v52 = vmul.f32 0.70710677, %v2294_v36  ;;  %v7531_v18 = vadd.f32 %v5972_v57, %v7504_v46  ;;  %6011 = vmatprep.mubr.f32.mxu0 %v2388_v30  ;;  %v2332_v42 = vmul.f32 0.5, %v2294_v36 }
 0x5cf   :  { %v6386_v41 = vpop.eup %6385  ;;  %v2303_v13 = vpop.f32.mrf.mxu1  ;;  %6012 = vmatmul.mubr.f32.gmra.mxu0 %v2389_v12  ;;  %v2333_v30 = vmul.f32 0.5, %v7526_v16 }
 0x5d0   :  { %6399 = verf.f32 %v2348_v52  ;;  %v2351_v14 = vmul.f32 0.70710677, %v7531_v18  ;;  %v2304_v8 = vadd.f32 %v7504_v46, %v2303_v13  ;;  %v2375_v11 = vadd.f32 1.0, %v6386_v41 }
 0x5d1   :  { %v6388_v34 = vpop.eup %6387  ;;  %v5975_v19 = vpop.f32.mrf.mxu1 }
 0x5d2   :  { %6401 = verf.f32 %v2351_v14  ;;  %v2350_v53 = vmul.f32 0.70710677, %v2304_v8  ;;  %v2319_v31 = vadd.f32 %v5975_v19, %v7504_v46  ;;  %v2374_v32 = vadd.f32 1.0, %v6388_v34 }
 0x5d3   :  { %v2313_v49 = vpop.f32.mrf.mxu1  ;;  %v6390_v43 = vpop.eup %6389  ;;  %v2391_v40 = vmul.f32 %v2375_v11, %v2327_v51  ;;  %v2334_v41 = vmul.f32 0.5, %v2304_v8  ;;  %v2335_v34 = vmul.f32 0.5, %v7531_v18 }
 0x5d4   :  { %6403 = verf.f32 %v2350_v53  ;;  %v2353_v20 = vmul.f32 0.70710677, %v2319_v31  ;;  %v2314_v48 = vadd.f32 %v7504_v46, %v2313_v49  ;;  %v2390_v28 = vmul.f32 %v2374_v32, %v2326_v17 }
 0x5d5   :  { %v6392_v1 = vpop.eup %6391  ;;  %v2377_v23 = vadd.f32 1.0, %v6390_v43  ;;  %v2337_v16 = vmul.f32 0.5, %v2319_v31  ;;  %v7545_v43 = vld [vmem:[%s8635_s13] ss:$0 sm:$0xff] }
 0x5d6   :  { %6405 = verf.f32 %v2353_v20  ;;  %v2352_v47 = vmul.f32 0.70710677, %v2314_v48  ;;  %v2376_v62 = vadd.f32 1.0, %v6392_v1  ;;  %6014 = vmatprep.mubr.f32.mxu0 %v2390_v28  ;;  %v2336_v51 = vmul.f32 0.5, %v2314_v48 }
 0x5d7   :  { %v6394_v24 = vpop.eup %6393  ;;  %6015 = vmatmul.mubr.f32.gmra.mxu0 %v2391_v40  ;;  %v2393_v6 = vmul.f32 %v2377_v23, %v2329_v15 }
 0x5d8   :  { %6407 = verf.f32 %v2352_v47  ;;  %v2392_v0 = vmul.f32 %v2376_v62, %v2328_v2  ;;  %v2379_v22 = vadd.f32 1.0, %v6394_v24 }
 0x5d9   :  { %v6396_v35 = vpop.eup %6395 }
 0x5da   :  { %6017 = vmatprep.mubr.f32.mxu0 %v2392_v0  ;;  %v2378_v46 = vadd.f32 1.0, %v6396_v35  ;;  %v2395_v5 = vmul.f32 %v2379_v22, %v2331_v60 }
 0x5db   :  { %v6398_v50 = vpop.eup %6397  ;;  %6018 = vmatmul.mubr.f32.gmra.mxu0 %v2393_v6 }
 0x5dc   :  { %v2394_v26 = vmul.f32 %v2378_v46, %v2330_v59  ;;  %v2381_v44 = vadd.f32 1.0, %v6398_v50 }
 0x5dd   :  { %v6400_v29 = vpop.eup %6399 }
 0x5de   :  { %6020 = vmatprep.mubr.f32.mxu0 %v2394_v26  ;;  %v2380_v33 = vadd.f32 1.0, %v6400_v29  ;;  %v2397_v13 = vmul.f32 %v2381_v44, %v2333_v30 }
 0x5df   :  { %v6402_v57 = vpop.eup %6401  ;;  %6021 = vmatmul.mubr.f32.gmra.mxu0 %v2395_v5 }
 0x5e0   :  { %v2396_v3 = vmul.f32 %v2380_v33, %v2332_v42  ;;  %v2383_v12 = vadd.f32 1.0, %v6402_v57 }
 0x5e1   :  { %v6404_v52 = vpop.eup %6403 }
 0x5e2   :  { %6023 = vmatprep.mubr.f32.mxu0 %v2396_v3  ;;  %v2382_v14 = vadd.f32 1.0, %v6404_v52  ;;  %v2399_v11 = vmul.f32 %v2383_v12, %v2335_v34 }
 0x5e3   :  { %v6406_v10 = vpop.eup %6405  ;;  %6024 = vmatmul.mubr.f32.gmra.mxu0 %v2397_v13 }
 0x5e4   :  { %v2398_v36 = vmul.f32 %v2382_v14, %v2334_v41  ;;  %v2385_v53 = vadd.f32 1.0, %v6406_v10 }
 0x5e5   :  { %v6408_v19 = vpop.eup %6407 }
 0x5e6   :  { %6026 = vmatprep.mubr.f32.mxu1 %v2398_v36  ;;  %v2384_v17 = vadd.f32 1.0, %v6408_v19  ;;  %v2401_v32 = vmul.f32 %v2385_v53, %v2337_v16 }
 0x5e7   :  { %6027 = vmatmul.mubr.f32.vlgmr.msra.gmra.mxu1 %v2399_v11 }
 0x5e8   :  { %v2400_v49 = vmul.f32 %v2384_v17, %v2336_v51 }
 0x5ea   :  { %6029 = vmatprep.mubr.f32.mxu1 %v2400_v49 }
 0x5eb   :  { %6030 = vmatmul.mubr.f32.gmra.mxu1 %v2401_v32 }
 0x687   :  { %v6010_v8 = vpop.f32.mrf.mxu0 }
 0x688   :  { %v2564_v18 = vadd.f32 %v6010_v8, %v7159_v4 }
 0x689   :  { %v2484_v20 = vpop.f32.mrf.mxu0 }
 0x68a   :  { %v7549_v1 = vadd.f32 %v7545_v43, %v2564_v18  ;;  %v2563_v48 = vadd.f32 %v2484_v20, %v7163_v9 }
 0x68c   :  { %v7553_v31 = vadd.f32 %v7545_v43, %v2563_v48  ;;  %v2605_v2 = vsel %vm283_vm2, %v7549_v1, 0.0 }
 0x68d   :  { %2606 = vadd.xlane.f32.xlu0 %v2605_v2 }
 0x68e   :  { %v2602_v28 = vsel %vm283_vm2, %v7553_v31, 0.0 }
 0x68f   :  { %2603 = vadd.xlane.f32.xlu1 %v2602_v28  ;;  %v6013_v40 = vpop.f32.mrf.mxu0 }
 0x690   :  { %v2566_v4 = vadd.f32 %v6013_v40, %v7169_v56 }
 0x691   :  { %v2494_v47 = vpop.f32.mrf.mxu0 }
 0x692   :  { %v7561_v62 = vadd.f32 %v7545_v43, %v2566_v4  ;;  %v2565_v9 = vadd.f32 %v2494_v47, %v7175_v25 }
 0x694   :  { %v7565_v23 = vadd.f32 %v7545_v43, %v2565_v9  ;;  %v2611_v24 = vsel %vm283_vm2, %v7561_v62, 0.0 }
 0x695   :  { %2612 = vadd.xlane.f32.xlu0 %v2611_v24 }
 0x696   :  { %v2608_v15 = vsel %vm283_vm2, %v7565_v23, 0.0 }
 0x697   :  { %v6016_v0 = vpop.f32.mrf.mxu0  ;;  %2609 = vadd.xlane.f32.xlu1 %v2608_v15 }
 0x698   :  { %v2568_v56 = vadd.f32 %v6016_v0, %v7191_v63 }
 0x699   :  { %v2504_v35 = vpop.f32.mrf.mxu0 }
 0x69a   :  { %v7573_v59 = vadd.f32 %v7545_v43, %v2568_v56  ;;  %v2567_v25 = vadd.f32 %v2504_v35, %v7182_v27 }
 0x69b   :  { %v6019_v6 = vpop.f32.mrf.mxu0 }
 0x69c   :  { %v7577_v46 = vadd.f32 %v7545_v43, %v2567_v25  ;;  %v2570_v22 = vadd.f32 %v6019_v6, %v7204_v7  ;;  %v2617_v50 = vsel %vm283_vm2, %v7573_v59, 0.0 }
 0x69d   :  { %2618 = vadd.xlane.f32.xlu0 %v2617_v50  ;;  %v2514_v60 = vpop.f32.mrf.mxu0 }
 0x69e   :  { %v7583_v26 = vadd.f32 %v7545_v43, %v2570_v22  ;;  %v2569_v63 = vadd.f32 %v2514_v60, %v7188_v58  ;;  %v2614_v29 = vsel %vm283_vm2, %v7577_v46, 0.0 }
 0x69f   :  { %2615 = vadd.xlane.f32.xlu1 %v2614_v29  ;;  %v6022_v27 = vpop.f32.mrf.mxu0 }
 0x6a0   :  { %v7589_v42 = vadd.f32 %v7545_v43, %v2569_v63  ;;  %v2572_v7 = vadd.f32 %v6022_v27, %v7218_v21  ;;  %v2623_v5 = vsel %vm283_vm2, %v7583_v26, 0.0 }
 0x6a1   :  { %2624 = vadd.xlane.f32.xlu0 %v2623_v5  ;;  %v2524_v33 = vpop.f32.mrf.mxu0 }
 0x6a2   :  { %v7595_v44 = vadd.f32 %v7545_v43, %v2572_v7  ;;  %v2571_v58 = vadd.f32 %v2524_v33, %v7200_v37  ;;  %v2620_v57 = vsel %vm283_vm2, %v7589_v42, 0.0 }
 0x6a3   :  { %2621 = vadd.xlane.f32.xlu1 %v2620_v57  ;;  %v6025_v30 = vpop.f32.mrf.mxu0 }
 0x6a4   :  { %v7601_v3 = vadd.f32 %v7545_v43, %v2571_v58  ;;  %v2574_v21 = vadd.f32 %v6025_v30, %v7230_v39  ;;  %v2629_v52 = vsel %vm283_vm2, %v7595_v44, 0.0 }
 0x6a5   :  { %2630 = vadd.xlane.f32.xlu0 %v2629_v52  ;;  %v2534_v12 = vpop.f32.mrf.mxu0 }
 0x6a6   :  { %v7607_v41 = vadd.f32 %v7545_v43, %v2574_v21  ;;  %v2573_v37 = vadd.f32 %v2534_v12, %v7212_v61  ;;  %v2626_v13 = vsel %vm283_vm2, %v7601_v3, 0.0 }
 0x6a7   :  { %v6028_v14 = vpop.f32.mrf.mxu1  ;;  %2627 = vadd.xlane.f32.xlu1 %v2626_v13 }
 0x6a8   :  { %v2576_v10 = vadd.f32 %v6028_v14, %v7241_v54  ;;  %v7614_v34 = vadd.f32 %v7545_v43, %v2573_v37  ;;  %v2635_v39 = vsel %vm283_vm2, %v7607_v41, 0.0 }
 0x6a9   :  { %v2544_v36 = vpop.f32.mrf.mxu1  ;;  %2636 = vadd.xlane.f32.xlu0 %v2635_v39 }
 0x6aa   :  { %v7619_v19 = vadd.f32 %v7545_v43, %v2576_v10  ;;  %v2575_v61 = vadd.f32 %v2544_v36, %v7224_v45  ;;  %v2632_v11 = vsel %vm283_vm2, %v7614_v34, 0.0 }
 0x6ab   :  { %v6031_v53 = vpop.f32.mrf.mxu1  ;;  %2633 = vadd.xlane.f32.xlu1 %v2632_v11 }
 0x6ac   :  { %v7625_v51 = vadd.f32 %v7545_v43, %v2575_v61  ;;  %v2578_v54 = vadd.f32 %v6031_v53, %v7247_v38  ;;  %v2641_v17 = vsel %vm283_vm2, %v7619_v19, 0.0 }
 0x6ad   :  { %v2554_v16 = vpop.f32.mrf.mxu1  ;;  %2642 = vadd.xlane.f32.xlu0 %v2641_v17 }
 0x6ae   :  { %v7631_v49 = vadd.f32 %v7545_v43, %v2578_v54  ;;  %v2577_v45 = vadd.f32 %v2554_v16, %v7236_v55  ;;  %v2638_v32 = vsel %vm283_vm2, %v7625_v51, 0.0 }
 0x6af   :  { %2639 = vadd.xlane.f32.xlu1 %v2638_v32 }
 0x6b0   :  { %v7637_v8 = vadd.f32 %v7545_v43, %v2577_v45  ;;  %v2647_v38 = vsel %vm283_vm2, %v7631_v49, 0.0 }
 0x6b1   :  { %2648 = vadd.xlane.f32.xlu0 %v2647_v38 }
 0x6b2   :  { %v2644_v18 = vsel %vm283_vm2, %v7637_v8, 0.0 }
 0x6b3   :  { %2645 = vadd.xlane.f32.xlu1 %v2644_v18 }
 0x716   :  { %v2607_v20 = vpop.xlane.xlu0 %2606 }
 0x717   :  { %v2651_v48 = vmul.f32 0.03125, %v2607_v20 }
 0x718   :  { %v2604_v2 = vpop.xlane.xlu1 %2603 }
 0x719   :  { %v7644_v55 = vsub.f32 %v7549_v1, %v2651_v48  ;;  %v2650_v28 = vmul.f32 0.03125, %v2604_v2 }
 0x71b   :  { %v7647_v40 = vsub.f32 %v7553_v31, %v2650_v28  ;;  %v2683_v43 = vmul.f32 %v7644_v55, %v7644_v55 }
 0x71d   :  { %v2701_v4 = vsel %vm283_vm2, %v2683_v43, 0.0  ;;  %v2682_v47 = vmul.f32 %v7647_v40, %v7647_v40 }
 0x71e   :  { %v2613_v9 = vpop.xlane.xlu0 %2612  ;;  %2702 = vadd.xlane.f32.xlu0 %v2701_v4 }
 0x71f   :  { %v2653_v24 = vmul.f32 0.03125, %v2613_v9  ;;  %v2698_v15 = vsel %vm283_vm2, %v2682_v47, 0.0 }
 0x720   :  { %2699 = vadd.xlane.f32.xlu1 %v2698_v15  ;;  %v2610_v0 = vpop.xlane.xlu1 %2609 }
 0x721   :  { %v7656_v56 = vsub.f32 %v7561_v62, %v2653_v24  ;;  %v2652_v35 = vmul.f32 0.03125, %v2610_v0 }
 0x723   :  { %v7659_v25 = vsub.f32 %v7565_v23, %v2652_v35  ;;  %v2685_v6 = vmul.f32 %v7656_v56, %v7656_v56 }
 0x725   :  { %v2707_v22 = vsel %vm283_vm2, %v2685_v6, 0.0  ;;  %v2684_v50 = vmul.f32 %v7659_v25, %v7659_v25 }
 0x726   :  { %v2619_v60 = vpop.xlane.xlu0 %2618  ;;  %2708 = vadd.xlane.f32.xlu0 %v2707_v22 }
 0x727   :  { %v2655_v63 = vmul.f32 0.03125, %v2619_v60  ;;  %v2704_v29 = vsel %vm283_vm2, %v2684_v50, 0.0 }
 0x728   :  { %v2616_v27 = vpop.xlane.xlu1 %2615  ;;  %2705 = vadd.xlane.f32.xlu1 %v2704_v29 }
 0x729   :  { %v7668_v7 = vsub.f32 %v7573_v59, %v2655_v63  ;;  %v2654_v5 = vmul.f32 0.03125, %v2616_v27 }
 0x72a   :  { %v2625_v33 = vpop.xlane.xlu0 %2624 }
 0x72b   :  { %v7671_v58 = vsub.f32 %v7577_v46, %v2654_v5  ;;  %v2657_v57 = vmul.f32 0.03125, %v2625_v33  ;;  %v2687_v30 = vmul.f32 %v7668_v7, %v7668_v7 }
 0x72c   :  { %v2622_v21 = vpop.xlane.xlu1 %2621 }
 0x72d   :  { %v7676_v52 = vsub.f32 %v7583_v26, %v2657_v57  ;;  %v2656_v12 = vmul.f32 0.03125, %v2622_v21  ;;  %v2713_v37 = vsel %vm283_vm2, %v2687_v30, 0.0  ;;  %v2686_v13 = vmul.f32 %v7671_v58, %v7671_v58 }
 0x72e   :  { %v2631_v14 = vpop.xlane.xlu0 %2630  ;;  %2714 = vadd.xlane.f32.xlu0 %v2713_v37 }
 0x72f   :  { %v7682_v10 = vsub.f32 %v7589_v42, %v2656_v12  ;;  %v2659_v39 = vmul.f32 0.03125, %v2631_v14  ;;  %v2710_v36 = vsel %vm283_vm2, %v2686_v13, 0.0  ;;  %v2689_v61 = vmul.f32 %v7676_v52, %v7676_v52 }
 0x730   :  { %2711 = vadd.xlane.f32.xlu1 %v2710_v36  ;;  %v2628_v11 = vpop.xlane.xlu1 %2627 }
 0x731   :  { %v7688_v53 = vsub.f32 %v7595_v44, %v2659_v39  ;;  %v2658_v54 = vmul.f32 0.03125, %v2628_v11  ;;  %v2719_v17 = vsel %vm283_vm2, %v2689_v61, 0.0  ;;  %v2688_v16 = vmul.f32 %v7682_v10, %v7682_v10 }
 0x732   :  { %v2637_v45 = vpop.xlane.xlu0 %2636  ;;  %2720 = vadd.xlane.f32.xlu0 %v2719_v17  ;;  %v5452_v17 = vld [vmem:[%s8627_s5 + $0x10] sm:$0xff] }
 0x733   :  { %v7694_v32 = vsub.f32 %v7601_v3, %v2658_v54  ;;  %v2661_v38 = vmul.f32 0.03125, %v2637_v45  ;;  %v2716_v18 = vsel %vm283_vm2, %v2688_v16, 0.0  ;;  %v2691_v20 = vmul.f32 %v7688_v53, %v7688_v53  ;;  %v7742_v54 = vld [vmem:[%s8626_s4 + $0x10] sm:$0xff]  ;;  %v5453_v16 = vld [vmem:[%s8627_s5 + $0x18] sm:$0xff]  ;;  %s6594_s5 = smov [#allocation2]  }
 0x734   :  { %2717 = vadd.xlane.f32.xlu1 %v2716_v18  ;;  %v2634_v48 = vpop.xlane.xlu1 %2633  ;;  %6036 = vmatprep.mubr.msk.f32.mxu1 %vm547_vm3, %v7742_v54  ;;  %v5472_v45 = vld [vmem:[%s8629_s7 + $0x10] sm:$0xff] }
 0x735   :  { %v7700_v2 = vsub.f32 %v7607_v41, %v2661_v38  ;;  %v2660_v28 = vmul.f32 0.03125, %v2634_v48  ;;  %v2725_v43 = vsel %vm283_vm2, %v2691_v20, 0.0  ;;  %v2690_v4 = vmul.f32 %v7694_v32, %v7694_v32  ;;  %6085 = vmatprep.mubr.msk.f32.mxu0 %vm547_vm3, %v7742_v54  ;;  %v5473_v38 = vld [vmem:[%s8629_s7 + $0x18] sm:$0xff]  ;;  %s5369_s7 = sshll.u32 %s6594_s5, 4  ;;  %s5370_s7 = int_to_ptr.vmem [resolvable:$true] %s5369_s7 }
 0x736   :  { %v2643_v47 = vpop.xlane.xlu0 %2642  ;;  %2726 = vadd.xlane.f32.xlu0 %v2725_v43  ;;  %s6569_s25 = scalar_lea.vmem %s5370_s7, 128  ;;  %p6574_p1 = scmp.lt.s32.totalorder %s5370_s7, %s5370_s7 }
 0x737   :  { %v7706_v9 = vsub.f32 %v7614_v34, %v2660_v28  ;;  %v2663_v24 = vmul.f32 0.03125, %v2643_v47  ;;  %v2722_v15 = vsel %vm283_vm2, %v2690_v4, 0.0  ;;  %v2693_v0 = vmul.f32 %v7700_v2, %v7700_v2  ;;  %p6570_p0 = scmp.ne.s32.totalorder %s5370_s7, %s6569_s25  ;;  %p6575_p2 = scmp.lt.s32.totalorder %s6569_s25, %s6569_s25 }
 0x738   :  { %2723 = vadd.xlane.f32.xlu1 %v2722_v15  ;;  %v2640_v35 = vpop.xlane.xlu1 %2639 }
 0x739   :  { %v7712_v6 = vsub.f32 %v7619_v19, %v2663_v24  ;;  %v2662_v22 = vmul.f32 0.03125, %v2640_v35  ;;  %v2731_v50 = vsel %vm283_vm2, %v2693_v0, 0.0  ;;  %v2692_v60 = vmul.f32 %v7706_v9, %v7706_v9  ;;  %p6576_p3 = por %p6575_p2, %p6574_p1 }
 0x73a   :  { %2732 = vadd.xlane.f32.xlu0 %v2731_v50  ;;  %v2649_v63 = vpop.xlane.xlu0 %2648 }
 0x73b   :  { %v7718_v29 = vsub.f32 %v7625_v51, %v2662_v22  ;;  %v2665_v27 = vmul.f32 0.03125, %v2649_v63  ;;  %v2728_v5 = vsel %vm283_vm2, %v2692_v60, 0.0  ;;  %v2695_v33 = vmul.f32 %v7712_v6, %v7712_v6  ;;  %p6577_p4 = pnand %p6576_p3, %p6570_p0 }
 0x73c   :  { %2729 = vadd.xlane.f32.xlu1 %v2728_v5  ;;  %v2646_v57 = vpop.xlane.xlu1 %2645  ;;  %v7763_v5 = vld [vmem:[%s8649_s30 + $0x1] ss:$0 sm:$0xff] }
 0x73d   :  { %v7724_v30 = vsub.f32 %v7631_v49, %v2665_v27  ;;  %v2664_v21 = vmul.f32 0.03125, %v2646_v57  ;;  %v2737_v12 = vsel %vm283_vm2, %v2695_v33, 0.0  ;;  %v2694_v37 = vmul.f32 %v7718_v29, %v7718_v29 }
 0x73e   :  { %2738 = vadd.xlane.f32.xlu0 %v2737_v12 }
 0x73f   :  { %v7730_v13 = vsub.f32 %v7637_v8, %v2664_v21  ;;  %v2734_v14 = vsel %vm283_vm2, %v2694_v37, 0.0  ;;  %v2697_v39 = vmul.f32 %v7724_v30, %v7724_v30 }
 0x740   :  { %2735 = vadd.xlane.f32.xlu1 %v2734_v14  ;;  %v7769_v14 = vld [vmem:[%s8625_s3 + $0x1] ss:$0 sm:$0xff] }
 0x741   :  { %v2743_v36 = vsel %vm283_vm2, %v2697_v39, 0.0  ;;  %v2696_v61 = vmul.f32 %v7730_v13, %v7730_v13 }
 0x742   :  { %2744 = vadd.xlane.f32.xlu0 %v2743_v36 }
 0x743   :  { %v2740_v11 = vsel %vm283_vm2, %v2696_v61, 0.0 }
 0x744   :  { %2741 = vadd.xlane.f32.xlu1 %v2740_v11 }
 0x755   :  { %2858 = vperm.xlu1 %6280, %v5452_v17  }
 0x758   :  { %2863 = vperm.xlu0 %6279, %v5453_v16  }
 0x759   :  { %3560 = vperm.xlu1 %6280, %v5472_v45  }
 0x75c   :  { %3565 = vperm.xlu0 %6279, %v5473_v38  }
 0x7a7   :  { %v2703_v18 = vpop.xlane.xlu0 %2702 }
 0x7a8   :  { %v2747_v20 = vmul.f32 0.03125, %v2703_v18 }
 0x7a9   :  { %v2700_v48 = vpop.xlane.xlu1 %2699 }
 0x7aa   :  { %v2763_v28 = vadd.f32 1e-05, %v2747_v20  ;;  %v2746_v43 = vmul.f32 0.03125, %v2700_v48 }
 0x7ac   :  { %6409 = vrsqrt.f32 %v2763_v28  ;;  %v2762_v4 = vadd.f32 1e-05, %v2746_v43 }
 0x7ae   :  { %6411 = vrsqrt.f32 %v2762_v4 }
 0x7af   :  { %v2709_v47 = vpop.xlane.xlu0 %2708 }
 0x7b0   :  { %v2749_v24 = vmul.f32 0.03125, %v2709_v47 }
 0x7b1   :  { %v2706_v15 = vpop.xlane.xlu1 %2705 }
 0x7b2   :  { %v2765_v0 = vadd.f32 1e-05, %v2749_v24  ;;  %v2748_v35 = vmul.f32 0.03125, %v2706_v15  ;;  %v7779_v24 = vld [vmem:[%s8626_s4 + $0x18] sm:$0xff] }
 0x7b4   :  { %6413 = vrsqrt.f32 %v2765_v0  ;;  %v2764_v22 = vadd.f32 1e-05, %v2748_v35 }
 0x7b6   :  { %6415 = vrsqrt.f32 %v2764_v22 }
 0x7b7   :  { %v2715_v50 = vpop.xlane.xlu0 %2714 }
 0x7b8   :  { %v2751_v60 = vmul.f32 0.03125, %v2715_v50 }
 0x7b9   :  { %v6410_v63 = vpop.eup %6409  ;;  %v2712_v27 = vpop.xlane.xlu1 %2711 }
 0x7ba   :  { %v2767_v33 = vadd.f32 1e-05, %v2751_v60  ;;  %v2750_v57 = vmul.f32 0.03125, %v2712_v27  ;;  %v2795_v21 = vmul.f32 %v6410_v63, %v7644_v55 }
 0x7bb   :  { %v6412_v12 = vpop.eup %6411  ;;  %v2721_v37 = vpop.xlane.xlu0 %2720 }
 0x7bc   :  { %6417 = vrsqrt.f32 %v2767_v33  ;;  %v2766_v39 = vadd.f32 1e-05, %v2750_v57  ;;  %v2753_v36 = vmul.f32 0.03125, %v2721_v37  ;;  %v2815_v61 = vmul.f32 %v7763_v5, %v2795_v21 }
 0x7bd   :  { %v2718_v11 = vpop.xlane.xlu1 %2717  ;;  %v2794_v17 = vmul.f32 %v6412_v12, %v7647_v40 }
 0x7be   :  { %6419 = vrsqrt.f32 %v2766_v39  ;;  %v2769_v16 = vadd.f32 1e-05, %v2753_v36  ;;  %v2752_v45 = vmul.f32 0.03125, %v2718_v11  ;;  %v2835_v55 = vadd.f32 %v7769_v14, %v2815_v61 }
 0x7bf   :  { %v2727_v38 = vpop.xlane.xlu0 %2726  ;;  %v2814_v18 = vmul.f32 %v7763_v5, %v2794_v17 }
 0x7c0   :  { %6421 = vrsqrt.f32 %v2769_v16  ;;  %v2768_v20 = vadd.f32 1e-05, %v2752_v45  ;;  %v2755_v48 = vmul.f32 0.03125, %v2727_v38  ;;  %6032 = vmatprep.subr.mxu1 %v2835_v55 }
 0x7c1   :  { %v6414_v28 = vpop.eup %6413  ;;  %v2724_v43 = vpop.xlane.xlu1 %2723  ;;  %6033 = vmatpush3.msra.mxu1 %v2835_v55  ;;  %v2834_v4 = vadd.f32 %v7769_v14, %v2814_v18 }
 0x7c2   :  { %6423 = vrsqrt.f32 %v2768_v20  ;;  %v2771_v47 = vadd.f32 1e-05, %v2755_v48  ;;  %v2754_v40 = vmul.f32 0.03125, %v2724_v43  ;;  %v2797_v15 = vmul.f32 %v6414_v28, %v7656_v56 }
 0x7c3   :  { %v6416_v0 = vpop.eup %6415  ;;  %v2733_v35 = vpop.xlane.xlu0 %2732  ;;  %6034 = vmatprep.subr.mxu1 %v2834_v4 }
 0x7c4   :  { %6425 = vrsqrt.f32 %v2771_v47  ;;  %v2770_v22 = vadd.f32 1e-05, %v2754_v40  ;;  %v2757_v50 = vmul.f32 0.03125, %v2733_v35  ;;  %6035 = vmatpush3.msra.mxu1 %v2834_v4  ;;  %v2817_v60 = vmul.f32 %v7763_v5, %v2797_v15 }
 0x7c5   :  { %6037 = vmatmul.mubr.msk.f32.vlgmr.msra.gmra.mxu1 %vm547_vm3, %v7779_v24  ;;  %v2730_v63 = vpop.xlane.xlu1 %2729  ;;  %v2796_v27 = vmul.f32 %v6416_v0, %v7659_v25 }
 0x7c6   :  { %6427 = vrsqrt.f32 %v2770_v22  ;;  %v2773_v33 = vadd.f32 1e-05, %v2757_v50  ;;  %v2756_v57 = vmul.f32 0.03125, %v2730_v63  ;;  %v2837_v56 = vadd.f32 %v7769_v14, %v2817_v60  ;;  %6043 = vmatprep.mubr.msk.f32.mxu1 %vm547_vm3, %v7742_v54 }
 0x7c7   :  { %v2739_v21 = vpop.xlane.xlu0 %2738  ;;  %v2816_v12 = vmul.f32 %v7763_v5, %v2796_v27 }
 0x7c8   :  { %6429 = vrsqrt.f32 %v2773_v33  ;;  %v2772_v37 = vadd.f32 1e-05, %v2756_v57  ;;  %v2759_v39 = vmul.f32 0.03125, %v2739_v21  ;;  %6039 = vmatprep.subr.mxu1 %v2837_v56 }
 0x7c9   :  { %v6418_v36 = vpop.eup %6417  ;;  %v2736_v61 = vpop.xlane.xlu1 %2735  ;;  %6040 = vmatpush3.msra.mxu1 %v2837_v56  ;;  %v2836_v25 = vadd.f32 %v7769_v14, %v2816_v12 }
 0x7ca   :  { %6431 = vrsqrt.f32 %v2772_v37  ;;  %v2775_v11 = vadd.f32 1e-05, %v2759_v39  ;;  %v2758_v17 = vmul.f32 0.03125, %v2736_v61  ;;  %v2799_v16 = vmul.f32 %v6418_v36, %v7668_v7 }
 0x7cb   :  { %v6420_v45 = vpop.eup %6419  ;;  %v2745_v55 = vpop.xlane.xlu0 %2744  ;;  %6041 = vmatprep.subr.mxu1 %v2836_v25 }
 0x7cc   :  { %6433 = vrsqrt.f32 %v2775_v11  ;;  %v2774_v38 = vadd.f32 1e-05, %v2758_v17  ;;  %v2761_v18 = vmul.f32 0.03125, %v2745_v55  ;;  %6042 = vmatpush3.msra.mxu1 %v2836_v25  ;;  %v2819_v20 = vmul.f32 %v7763_v5, %v2799_v16 }
 0x7cd   :  { %v6422_v48 = vpop.eup %6421  ;;  %6044 = vmatmul.mubr.msk.f32.vlgmr.msra.gmra.mxu1 %vm547_vm3, %v7779_v24  ;;  %v2742_v28 = vpop.xlane.xlu1 %2741  ;;  %v2798_v43 = vmul.f32 %v6420_v45, %v7671_v58 }
 0x7ce   :  { %6435 = vrsqrt.f32 %v2774_v38  ;;  %v2777_v4 = vadd.f32 1e-05, %v2761_v18  ;;  %v2760_v47 = vmul.f32 0.03125, %v2742_v28  ;;  %v2839_v7 = vadd.f32 %v7769_v14, %v2819_v20  ;;  %6050 = vmatprep.mubr.msk.f32.mxu1 %vm547_vm3, %v7742_v54 }
 0x7cf   :  { %v6424_v40 = vpop.eup %6423  ;;  %v2818_v15 = vmul.f32 %v7763_v5, %v2798_v43  ;;  %v2801_v0 = vmul.f32 %v6422_v48, %v7676_v52 }
 0x7d0   :  { %6437 = vrsqrt.f32 %v2777_v4  ;;  %v2776_v35 = vadd.f32 1e-05, %v2760_v47  ;;  %6046 = vmatprep.subr.mxu1 %v2839_v7  ;;  %v2800_v22 = vmul.f32 %v6424_v40, %v7682_v10 }
 0x7d1   :  { %v6426_v50 = vpop.eup %6425  ;;  %6047 = vmatpush3.msra.mxu1 %v2839_v7  ;;  %v2838_v58 = vadd.f32 %v7769_v14, %v2818_v15  ;;  %v2821_v60 = vmul.f32 %v7763_v5, %v2801_v0  ;;  %v7863_v7 = vpop.permute.xlu1 %2858 }
 0x7d2   :  { %6439 = vrsqrt.f32 %v2776_v35  ;;  %v2820_v63 = vmul.f32 %v7763_v5, %v2800_v22  ;;  %v2803_v27 = vmul.f32 %v6426_v50, %v7688_v53 }
 0x7d3   :  { %v6428_v33 = vpop.eup %6427  ;;  %6048 = vmatprep.subr.mxu1 %v2838_v58  ;;  %v2841_v52 = vadd.f32 %v7769_v14, %v2821_v60 }
 0x7d4   :  { %6049 = vmatpush3.msra.mxu1 %v2838_v58  ;;  %v2840_v57 = vadd.f32 %v7769_v14, %v2820_v63  ;;  %v2823_v10 = vmul.f32 %v7763_v5, %v2803_v27  ;;  %v2802_v56 = vmul.f32 %v6428_v33, %v7694_v32 }
 0x7d5   :  { %v6430_v21 = vpop.eup %6429  ;;  %6051 = vmatmul.mubr.msk.f32.vlgmr.msra.gmra.mxu1 %vm547_vm3, %v7779_v24  ;;  %6053 = vmatprep.subr.mxu1 %v2841_v52 }
 0x7d6   :  { %6054 = vmatpush3.msra.mxu1 %v2841_v52  ;;  %6057 = vmatprep.mubr.msk.f32.mxu1 %vm547_vm3, %v7742_v54  ;;  %v2843_v53 = vadd.f32 %v7769_v14, %v2823_v10  ;;  %v2822_v12 = vmul.f32 %v7763_v5, %v2802_v56  ;;  %v2805_v37 = vmul.f32 %v6430_v21, %v7700_v2 }
 0x7d7   :  { %v6432_v39 = vpop.eup %6431  ;;  %6055 = vmatprep.subr.mxu1 %v2840_v57 }
 0x7d8   :  { %6056 = vmatpush3.msra.mxu1 %v2840_v57  ;;  %v2842_v32 = vadd.f32 %v7769_v14, %v2822_v12  ;;  %v2825_v36 = vmul.f32 %v7763_v5, %v2805_v37  ;;  %v2804_v61 = vmul.f32 %v6432_v39, %v7706_v9 }
 0x7d9   :  { %v6434_v25 = vpop.eup %6433  ;;  %6058 = vmatmul.mubr.msk.f32.vlgmr.msra.gmra.mxu1 %vm547_vm3, %v7779_v24  ;;  %6060 = vmatprep.subr.mxu1 %v2843_v53 }
 0x7da   :  { %6061 = vmatpush3.msra.mxu1 %v2843_v53  ;;  %6064 = vmatprep.mubr.msk.f32.mxu1 %vm547_vm3, %v7742_v54  ;;  %v2845_v2 = vadd.f32 %v7769_v14, %v2825_v36  ;;  %v2824_v11 = vmul.f32 %v7763_v5, %v2804_v61  ;;  %v2807_v17 = vmul.f32 %v6434_v25, %v7712_v6 }
 0x7db   :  { %v6436_v16 = vpop.eup %6435  ;;  %6062 = vmatprep.subr.mxu1 %v2842_v32 }
 0x7dc   :  { %6063 = vmatpush3.msra.mxu1 %v2842_v32  ;;  %v2844_v9 = vadd.f32 %v7769_v14, %v2824_v11  ;;  %v2827_v45 = vmul.f32 %v7763_v5, %v2807_v17  ;;  %v2806_v55 = vmul.f32 %v6436_v16, %v7718_v29 }
 0x7dd   :  { %v6438_v38 = vpop.eup %6437  ;;  %6065 = vmatmul.mubr.msk.f32.vlgmr.msra.gmra.mxu1 %vm547_vm3, %v7779_v24  ;;  %6067 = vmatprep.subr.mxu1 %v2845_v2 }
 0x7de   :  { %6068 = vmatpush3.msra.mxu1 %v2845_v2  ;;  %6071 = vmatprep.mubr.msk.f32.mxu1 %vm547_vm3, %v7742_v54  ;;  %v2847_v6 = vadd.f32 %v7769_v14, %v2827_v45  ;;  %v2826_v18 = vmul.f32 %v7763_v5, %v2806_v55  ;;  %v2809_v20 = vmul.f32 %v6438_v38, %v7724_v30  ;;  %v7890_v38 = vld [vmem:[%s8628_s6 + $0x18] sm:$0xff] }
 0x7df   :  { %v6440_v48 = vpop.eup %6439  ;;  %6069 = vmatprep.subr.mxu1 %v2844_v9 }
 0x7e0   :  { %6070 = vmatpush3.msra.mxu1 %v2844_v9  ;;  %v2846_v29 = vadd.f32 %v7769_v14, %v2826_v18  ;;  %v2829_v28 = vmul.f32 %v7763_v5, %v2809_v20  ;;  %v2808_v43 = vmul.f32 %v6440_v48, %v7730_v13  ;;  %v7854_v13 = vld [vmem:[%s8628_s6 + $0x10] sm:$0xff] }
 0x7e1   :  { %6072 = vmatmul.mubr.msk.f32.vlgmr.msra.gmra.mxu1 %vm547_vm3, %v7779_v24  ;;  %6074 = vmatprep.subr.mxu1 %v2847_v6 }
 0x7e2   :  { %6075 = vmatpush3.msra.mxu1 %v2847_v6  ;;  %6078 = vmatprep.mubr.msk.f32.mxu1 %vm547_vm3, %v7742_v54  ;;  %v2849_v4 = vadd.f32 %v7769_v14, %v2829_v28  ;;  %v2828_v30 = vmul.f32 %v7763_v5, %v2808_v43  ;;  %v7860_v54 = vpop.permute.xlu0 %2863 }
 0x7e3   :  { %6076 = vmatprep.subr.mxu1 %v2846_v29 }
 0x7e4   :  { %6077 = vmatpush3.msra.mxu1 %v2846_v29  ;;  %6081 = vmatprep.subr.mxu0 %v2849_v4  ;;  %v2848_v47 = vadd.f32 %v7769_v14, %v2828_v30 }
 0x7e5   :  { %6079 = vmatmul.mubr.msk.f32.vlgmr.msra.gmra.mxu1 %vm547_vm3, %v7779_v24  ;;  %6082 = vmatpush3.msra.mxu0 %v2849_v4 }
 0x7e6   :  { %6083 = vmatprep.subr.mxu0 %v2848_v47  ;;  %6092 = vmatprep.mubr.msk.f32.mxu1 %vm547_vm3, %v7854_v13 }
 0x7e7   :  { %6084 = vmatpush3.msra.mxu0 %v2848_v47 }
 0x7e8   :  { %6086 = vmatmul.mubr.msk.f32.vlgmr.msra.gmra.mxu0 %vm547_vm3, %v7779_v24 }
 0x7e9   :  { %6099 = vmatprep.mubr.msk.f32.mxu0 %vm547_vm3, %v7854_v13 }
 0x885   :  { %v6038_v5 = vpop.f32.mrf.mxu1 }
 0x886   :  { %v2944_v14 = vadd.f32 %v6038_v5, %v7860_v54 }
 0x887   :  { %v2938_v40 = vpop.f32.mrf.mxu1 }
 0x888   :  { %v3489_v24 = vmul.f32 0.70710677, %v2944_v14  ;;  %v2939_v15 = vadd.f32 %v2938_v40, %v7863_v7  ;;  %v3473_v12 = vmul.f32 0.5, %v2944_v14 }
 0x88a   :  { %6441 = verf.f32 %v3489_v24  ;;  %v3488_v0 = vmul.f32 0.70710677, %v2939_v15  ;;  %v3472_v36 = vmul.f32 0.5, %v2939_v15 }
 0x88c   :  { %6443 = verf.f32 %v3488_v0 }
 0x88d   :  { %v6045_v35 = vpop.f32.mrf.mxu1 }
 0x88e   :  { %v3019_v22 = vadd.f32 %v6045_v35, %v7860_v54 }
 0x88f   :  { %v3013_v50 = vpop.f32.mrf.mxu1 }
 0x890   :  { %v3491_v58 = vmul.f32 0.70710677, %v3019_v22  ;;  %v3014_v60 = vadd.f32 %v3013_v50, %v7863_v7  ;;  %v3475_v28 = vmul.f32 0.5, %v3019_v22 }
 0x892   :  { %6445 = verf.f32 %v3491_v58  ;;  %v3490_v63 = vmul.f32 0.70710677, %v3014_v60  ;;  %v3474_v5 = vmul.f32 0.5, %v3014_v60 }
 0x894   :  { %6447 = verf.f32 %v3490_v63 }
 0x895   :  { %v6052_v27 = vpop.f32.mrf.mxu1 }
 0x896   :  { %v7869_v33 = vadd.f32 %v6052_v27, %v7860_v54 }
 0x897   :  { %v6442_v52 = vpop.eup %6441  ;;  %v3088_v57 = vpop.f32.mrf.mxu1 }
 0x898   :  { %v3493_v10 = vmul.f32 0.70710677, %v7869_v33  ;;  %v7873_v56 = vadd.f32 %v3088_v57, %v7863_v7  ;;  %v3521_v21 = vadd.f32 1.0, %v6442_v52 }
 0x899   :  { %v6444_v53 = vpop.eup %6443  ;;  %v6059_v37 = vpop.f32.mrf.mxu1 }
 0x89a   :  { %6449 = verf.f32 %v3493_v10  ;;  %v3492_v39 = vmul.f32 0.70710677, %v7873_v56  ;;  %v7877_v32 = vadd.f32 %v6059_v37, %v7860_v54  ;;  %v3537_v25 = vmul.f32 %v3521_v21, %v3473_v12 }
 0x89b   :  { %v3163_v61 = vpop.f32.mrf.mxu1  ;;  %v3520_v2 = vadd.f32 1.0, %v6444_v53  ;;  %v3477_v21 = vmul.f32 0.5, %v7869_v33  ;;  %v3476_v37 = vmul.f32 0.5, %v7873_v56 }
 0x89c   :  { %6451 = verf.f32 %v3492_v39  ;;  %v3495_v11 = vmul.f32 0.70710677, %v7877_v32  ;;  %v7881_v17 = vadd.f32 %v3163_v61, %v7863_v7  ;;  %6088 = vmatprep.subr.mxu1 %v3537_v25 }
 0x89d   :  { %v6066_v16 = vpop.f32.mrf.mxu1  ;;  %v3536_v9 = vmul.f32 %v3520_v2, %v3472_v36  ;;  %6089 = vmatpush3.msra.mxu1 %v3537_v25 }
 0x89e   :  { %6453 = verf.f32 %v3495_v11  ;;  %v3494_v45 = vmul.f32 0.70710677, %v7881_v17  ;;  %v7885_v55 = vadd.f32 %v6066_v16, %v7860_v54  ;;  %v3479_v11 = vmul.f32 0.5, %v7877_v32 }
 0x89f   :  { %v6446_v6 = vpop.eup %6445  ;;  %v3238_v18 = vpop.f32.mrf.mxu1  ;;  %6090 = vmatprep.subr.mxu1 %v3536_v9 }
 0x8a0   :  { %6455 = verf.f32 %v3494_v45  ;;  %v3497_v20 = vmul.f32 0.70710677, %v7885_v55  ;;  %v7894_v48 = vadd.f32 %v3238_v18, %v7863_v7  ;;  %6091 = vmatpush3.msra.mxu1 %v3536_v9  ;;  %v3523_v4 = vadd.f32 1.0, %v6446_v6 }
 0x8a1   :  { %v6448_v29 = vpop.eup %6447  ;;  %v6073_v43 = vpop.f32.mrf.mxu1  ;;  %6093 = vmatmul.mubr.msk.f32.vlgmr.msra.gmra.mxu1 %vm547_vm3, %v7890_v38  ;;  %v3478_v6 = vmul.f32 0.5, %v7881_v17 }
 0x8a2   :  { %6457 = verf.f32 %v3497_v20  ;;  %v3496_v30 = vmul.f32 0.70710677, %v7894_v48  ;;  %v7900_v47 = vadd.f32 %v6073_v43, %v7860_v54  ;;  %6106 = vmatprep.mubr.msk.f32.mxu1 %vm547_vm3, %v7854_v13  ;;  %v3539_v40 = vmul.f32 %v3523_v4, %v3475_v28 }
 0x8a3   :  { %v3313_v14 = vpop.f32.mrf.mxu1  ;;  %v3522_v24 = vadd.f32 1.0, %v6448_v29  ;;  %v3480_v4 = vmul.f32 0.5, %v7894_v48 }
 0x8a4   :  { %6459 = verf.f32 %v3496_v30  ;;  %v3499_v15 = vmul.f32 0.70710677, %v7900_v47  ;;  %v7906_v0 = vadd.f32 %v3313_v14, %v7863_v7  ;;  %6095 = vmatprep.subr.mxu0 %v3539_v40 }
 0x8a5   :  { %v6080_v35 = vpop.f32.mrf.mxu1  ;;  %v3538_v22 = vmul.f32 %v3522_v24, %v3474_v5  ;;  %6096 = vmatpush3.msra.mxu0 %v3539_v40 }
 0x8a6   :  { %6461 = verf.f32 %v3499_v15  ;;  %v3498_v50 = vmul.f32 0.70710677, %v7906_v0  ;;  %v7910_v58 = vadd.f32 %v6080_v35, %v7860_v54  ;;  %v3482_v48 = vmul.f32 0.5, %v7906_v0 }
 0x8a7   :  { %v6450_v60 = vpop.eup %6449  ;;  %v3388_v63 = vpop.f32.mrf.mxu1  ;;  %6097 = vmatprep.subr.mxu0 %v3538_v22 }
 0x8a8   :  { %6463 = verf.f32 %v3498_v50  ;;  %v3501_v27 = vmul.f32 0.70710677, %v7910_v58  ;;  %v7914_v52 = vadd.f32 %v3388_v63, %v7863_v7  ;;  %6098 = vmatpush3.msra.mxu0 %v3538_v22  ;;  %v6087_v57 = vpop.f32.mrf.mxu0  ;;  %v3525_v12 = vadd.f32 1.0, %v6450_v60 }
 0x8a9   :  { %v6452_v10 = vpop.eup %6451  ;;  %v7918_v53 = vadd.f32 %v6087_v57, %v7860_v54  ;;  %6100 = vmatmul.mubr.msk.f32.vlgmr.msra.gmra.mxu0 %vm547_vm3, %v7890_v38 }
 0x8aa   :  { %6465 = verf.f32 %v3501_v27  ;;  %v3500_v39 = vmul.f32 0.70710677, %v7914_v52  ;;  %v3463_v36 = vpop.f32.mrf.mxu0  ;;  %v3524_v61 = vadd.f32 1.0, %v6452_v10  ;;  %6113 = vmatprep.mubr.msk.f32.mxu0 %vm547_vm3, %v7854_v13  ;;  %v3541_v2 = vmul.f32 %v3525_v12, %v3477_v21 }
 0x8ab   :  { %v6454_v25 = vpop.eup %6453  ;;  %v3503_v33 = vmul.f32 0.70710677, %v7918_v53  ;;  %v7928_v54 = vadd.f32 %v3463_v36, %v7863_v7  ;;  %v3481_v7 = vmul.f32 0.5, %v7885_v55  ;;  %v3483_v55 = vmul.f32 0.5, %v7900_v47 }
 0x8ac   :  { %6467 = verf.f32 %v3500_v39  ;;  %v3540_v16 = vmul.f32 %v3524_v61, %v3476_v37  ;;  %v3527_v56 = vadd.f32 1.0, %v6454_v25  ;;  %6102 = vmatprep.subr.mxu1 %v3541_v2  ;;  %v3485_v47 = vmul.f32 0.5, %v7910_v58 }
 0x8ad   :  { %v6456_v9 = vpop.eup %6455  ;;  %6469 = verf.f32 %v3503_v33  ;;  %v3502_v45 = vmul.f32 0.70710677, %v7928_v54  ;;  %6103 = vmatpush3.msra.mxu1 %v3541_v2  ;;  %v3484_v0 = vmul.f32 0.5, %v7914_v52  ;;  %v3487_v21 = vmul.f32 0.5, %v7918_v53  ;;  %v7961_v53 = vpop.permute.xlu0 %3565 }
 0x8ae   :  { %v3543_v18 = vmul.f32 %v3527_v56, %v3479_v11  ;;  %v3526_v20 = vadd.f32 1.0, %v6456_v9  ;;  %6104 = vmatprep.subr.mxu1 %v3540_v16  ;;  %v3486_v39 = vmul.f32 0.5, %v7928_v54  ;;  %v7964_v54 = vpop.permute.xlu1 %3560 }
 0x8af   :  { %v6458_v29 = vpop.eup %6457  ;;  %6471 = verf.f32 %v3502_v45  ;;  %6105 = vmatpush3.msra.mxu1 %v3540_v16 }
 0x8b0   :  { %6109 = vmatprep.subr.mxu0 %v3543_v18  ;;  %v3542_v32 = vmul.f32 %v3526_v20, %v3478_v6  ;;  %v3529_v28 = vadd.f32 1.0, %v6458_v29  ;;  %6107 = vmatmul.mubr.msk.f32.vlgmr.msra.gmra.mxu1 %vm547_vm3, %v7890_v38 }
 0x8b1   :  { %v6460_v43 = vpop.eup %6459  ;;  %6110 = vmatpush3.msra.mxu0 %v3543_v18  ;;  %6120 = vmatprep.mubr.msk.f32.mxu1 %vm547_vm3, %v7854_v13 }
 0x8b2   :  { %6111 = vmatprep.subr.mxu0 %v3542_v32  ;;  %v3545_v17 = vmul.f32 %v3529_v28, %v3481_v7  ;;  %v3528_v30 = vadd.f32 1.0, %v6460_v43 }
 0x8b3   :  { %v6462_v5 = vpop.eup %6461  ;;  %6112 = vmatpush3.msra.mxu0 %v3542_v32 }
 0x8b4   :  { %6114 = vmatmul.mubr.msk.f32.vlgmr.msra.gmra.mxu0 %vm547_vm3, %v7890_v38  ;;  %6116 = vmatprep.subr.mxu1 %v3545_v17  ;;  %v3544_v14 = vmul.f32 %v3528_v30, %v3480_v4  ;;  %v3531_v40 = vadd.f32 1.0, %v6462_v5 }
 0x8b5   :  { %v6464_v24 = vpop.eup %6463  ;;  %6117 = vmatpush3.msra.mxu1 %v3545_v17  ;;  %6127 = vmatprep.mubr.msk.f32.mxu0 %vm547_vm3, %v7854_v13 }
 0x8b6   :  { %6118 = vmatprep.subr.mxu1 %v3544_v14  ;;  %v3547_v15 = vmul.f32 %v3531_v40, %v3483_v55  ;;  %v3530_v35 = vadd.f32 1.0, %v6464_v24 }
 0x8b7   :  { %v6466_v22 = vpop.eup %6465  ;;  %6119 = vmatpush3.msra.mxu1 %v3544_v14 }
 0x8b8   :  { %6121 = vmatmul.mubr.msk.f32.vlgmr.msra.gmra.mxu1 %vm547_vm3, %v7890_v38  ;;  %6123 = vmatprep.subr.mxu0 %v3547_v15  ;;  %v3546_v50 = vmul.f32 %v3530_v35, %v3482_v48  ;;  %v3533_v60 = vadd.f32 1.0, %v6466_v22 }
 0x8b9   :  { %v6468_v63 = vpop.eup %6467  ;;  %6124 = vmatpush3.msra.mxu0 %v3547_v15  ;;  %6134 = vmatprep.mubr.msk.f32.mxu1 %vm547_vm3, %v7854_v13 }
 0x8ba   :  { %v6470_v27 = vpop.eup %6469  ;;  %6125 = vmatprep.subr.mxu0 %v3546_v50  ;;  %v3549_v57 = vmul.f32 %v3533_v60, %v3485_v47  ;;  %v3532_v10 = vadd.f32 1.0, %v6468_v63 }
 0x8bb   :  { %6126 = vmatpush3.msra.mxu0 %v3546_v50  ;;  %v3535_v58 = vadd.f32 1.0, %v6470_v27 }
 0x8bc   :  { %v6472_v12 = vpop.eup %6471  ;;  %6128 = vmatmul.mubr.msk.f32.vlgmr.msra.gmra.mxu0 %vm547_vm3, %v7890_v38  ;;  %6130 = vmatprep.subr.mxu1 %v3549_v57  ;;  %v3548_v37 = vmul.f32 %v3532_v10, %v3484_v0 }
 0x8bd   :  { %6131 = vmatpush3.msra.mxu1 %v3549_v57  ;;  %v3551_v36 = vmul.f32 %v3535_v58, %v3487_v21  ;;  %v3534_v61 = vadd.f32 1.0, %v6472_v12  ;;  %6141 = vmatprep.mubr.msk.f32.mxu0 %vm547_vm3, %v7854_v13 }
 0x8be   :  { %6132 = vmatprep.subr.mxu1 %v3548_v37 }
 0x8bf   :  { %6133 = vmatpush3.msra.mxu1 %v3548_v37  ;;  %6137 = vmatprep.subr.mxu0 %v3551_v36  ;;  %v3550_v52 = vmul.f32 %v3534_v61, %v3486_v39 }
 0x8c0   :  { %6135 = vmatmul.mubr.msk.f32.vlgmr.msra.gmra.mxu1 %vm547_vm3, %v7890_v38  ;;  %6138 = vmatpush3.msra.mxu0 %v3551_v36 }
 0x8c1   :  { %6139 = vmatprep.subr.mxu0 %v3550_v52 }
 0x8c2   :  { %6140 = vmatpush3.msra.mxu0 %v3550_v52 }
 0x8c3   :  { %6142 = vmatmul.mubr.msk.f32.vlgmr.msra.gmra.mxu0 %vm547_vm3, %v7890_v38 }
 0x961   :  { %v6094_v25 = vpop.f32.mrf.mxu1 }
 0x962   :  { %v3646_v33 = vadd.f32 %v6094_v25, %v7961_v53 }
 0x963   :  { %v3640_v13 = vpop.f32.mrf.mxu1 }
 0x964   :  { %v7967_v2 = vadd.f32 %v3646_v33, %v7549_v1  ;;  %v3641_v11 = vadd.f32 %v3640_v13, %v7964_v54 }
 0x966   :  { %v7971_v16 = vadd.f32 %v3641_v11, %v7553_v31  ;;  %v4195_v56 = vsel %vm283_vm2, %v7967_v2, 0.0 }
 0x967   :  { %4196 = vadd.xlane.f32.xlu0 %v4195_v56 }
 0x968   :  { %v4192_v38 = vsel %vm283_vm2, %v7971_v16, 0.0 }
 0x969   :  { %v6101_v9 = vpop.f32.mrf.mxu0  ;;  %4193 = vadd.xlane.f32.xlu1 %v4192_v38 }
 0x96a   :  { %v3721_v45 = vadd.f32 %v6101_v9, %v7961_v53 }
 0x96b   :  { %v3715_v6 = vpop.f32.mrf.mxu0 }
 0x96c   :  { %v7979_v1 = vadd.f32 %v3721_v45, %v7561_v62  ;;  %v3716_v18 = vadd.f32 %v3715_v6, %v7964_v54 }
 0x96e   :  { %v7983_v31 = vadd.f32 %v3716_v18, %v7565_v23  ;;  %v4201_v20 = vsel %vm283_vm2, %v7979_v1, 0.0 }
 0x96f   :  { %4202 = vadd.xlane.f32.xlu1 %v4201_v20 }
 0x970   :  { %v4198_v29 = vsel %vm283_vm2, %v7983_v31, 0.0  ;;  %v6108_v7 = vpop.f32.mrf.mxu1 }
 0x971   :  { %4199 = vadd.xlane.f32.xlu0 %v4198_v29  ;;  %v3796_v32 = vadd.f32 %v6108_v7, %v7961_v53 }
 0x972   :  { %v3790_v28 = vpop.f32.mrf.mxu1 }
 0x973   :  { %v7991_v62 = vadd.f32 %v3796_v32, %v7573_v59  ;;  %v3791_v43 = vadd.f32 %v3790_v28, %v7964_v54 }
 0x974   :  { %v6115_v4 = vpop.f32.mrf.mxu0 }
 0x975   :  { %v3871_v23 = vadd.f32 %v6115_v4, %v7961_v53  ;;  %v7996_v17 = vadd.f32 %v3791_v43, %v7577_v46  ;;  %v4207_v5 = vsel %vm283_vm2, %v7991_v62, 0.0 }
 0x976   :  { %v3865_v30 = vpop.f32.mrf.mxu0  ;;  %4208 = vadd.xlane.f32.xlu1 %v4207_v5 }
 0x977   :  { %v8001_v55 = vadd.f32 %v3871_v23, %v7583_v26  ;;  %v3866_v14 = vadd.f32 %v3865_v30, %v7964_v54  ;;  %v4204_v40 = vsel %vm283_vm2, %v7996_v17, 0.0 }
 0x978   :  { %v6122_v59 = vpop.f32.mrf.mxu1  ;;  %4205 = vadd.xlane.f32.xlu0 %v4204_v40 }
 0x979   :  { %v8007_v24 = vadd.f32 %v3866_v14, %v7589_v42  ;;  %v3946_v46 = vadd.f32 %v6122_v59, %v7961_v53  ;;  %v4213_v48 = vsel %vm283_vm2, %v8001_v55, 0.0 }
 0x97a   :  { %v3940_v15 = vpop.f32.mrf.mxu1  ;;  %4214 = vadd.xlane.f32.xlu1 %v4213_v48 }
 0x97b   :  { %v8013_v26 = vadd.f32 %v3946_v46, %v7595_v44  ;;  %v3941_v35 = vadd.f32 %v3940_v15, %v7964_v54  ;;  %v4210_v22 = vsel %vm283_vm2, %v8007_v24, 0.0 }
 0x97c   :  { %v6129_v47 = vpop.f32.mrf.mxu0  ;;  %4211 = vadd.xlane.f32.xlu0 %v4210_v22 }
 0x97d   :  { %v8019_v42 = vadd.f32 %v3941_v35, %v7601_v3  ;;  %v4021_v50 = vadd.f32 %v6129_v47, %v7961_v53  ;;  %v4219_v60 = vsel %vm283_vm2, %v8013_v26, 0.0 }
 0x97e   :  { %v4015_v63 = vpop.f32.mrf.mxu0  ;;  %4220 = vadd.xlane.f32.xlu1 %v4219_v60 }
 0x97f   :  { %v8025_v44 = vadd.f32 %v4021_v50, %v7607_v41  ;;  %v4016_v27 = vadd.f32 %v4015_v63, %v7964_v54  ;;  %v4216_v0 = vsel %vm283_vm2, %v8019_v42, 0.0 }
 0x980   :  { %v6136_v57 = vpop.f32.mrf.mxu1  ;;  %4217 = vadd.xlane.f32.xlu0 %v4216_v0 }
 0x981   :  { %v8031_v3 = vadd.f32 %v4016_v27, %v7614_v34  ;;  %v4096_v10 = vadd.f32 %v6136_v57, %v7961_v53  ;;  %v4225_v21 = vsel %vm283_vm2, %v8025_v44, 0.0 }
 0x982   :  { %v4090_v58 = vpop.f32.mrf.mxu1  ;;  %4226 = vadd.xlane.f32.xlu1 %v4225_v21 }
 0x983   :  { %v8037_v41 = vadd.f32 %v4096_v10, %v7619_v19  ;;  %v4091_v12 = vadd.f32 %v4090_v58, %v7964_v54  ;;  %v6143_v37 = vpop.f32.mrf.mxu0  ;;  %v4222_v39 = vsel %vm283_vm2, %v8031_v3, 0.0 }
 0x984   :  { %v4171_v34 = vadd.f32 %v6143_v37, %v7961_v53  ;;  %4223 = vadd.xlane.f32.xlu0 %v4222_v39 }
 0x985   :  { %v8044_v36 = vadd.f32 %v4091_v12, %v7625_v51  ;;  %v4165_v61 = vpop.f32.mrf.mxu0  ;;  %v4231_v52 = vsel %vm283_vm2, %v8037_v41, 0.0 }
 0x986   :  { %v8049_v19 = vadd.f32 %v4171_v34, %v7631_v49  ;;  %v4166_v25 = vadd.f32 %v4165_v61, %v7964_v54  ;;  %4232 = vadd.xlane.f32.xlu1 %v4231_v52 }
 0x987   :  { %v4228_v33 = vsel %vm283_vm2, %v8044_v36, 0.0 }
 0x988   :  { %v8055_v13 = vadd.f32 %v4166_v25, %v7637_v8  ;;  %v4237_v51 = vsel %vm283_vm2, %v8049_v19, 0.0  ;;  %4229 = vadd.xlane.f32.xlu0 %v4228_v33 }
 0x98a   :  { %v4234_v53 = vsel %vm283_vm2, %v8055_v13, 0.0  ;;  %4238 = vadd.xlane.f32.xlu1 %v4237_v51 }
 0x98c   :  { %4235 = vadd.xlane.f32.xlu0 %v4234_v53 }
 0x9f0   :  { %v4197_v49 = vpop.xlane.xlu0 %4196 }
 0x9f1   :  { %v4241_v11 = vmul.f32 0.03125, %v4197_v49 }
 0x9f2   :  { %v4194_v56 = vpop.xlane.xlu1 %4193 }
 0x9f3   :  { %v8062_v54 = vsub.f32 %v7967_v2, %v4241_v11  ;;  %v4240_v38 = vmul.f32 0.03125, %v4194_v56 }
 0x9f5   :  { %v8065_v9 = vsub.f32 %v7971_v16, %v4240_v38  ;;  %v4273_v8 = vmul.f32 %v8062_v54, %v8062_v54 }
 0x9f7   :  { %v4291_v45 = vsel %vm283_vm2, %v4273_v8, 0.0  ;;  %v4272_v6 = vmul.f32 %v8065_v9, %v8065_v9 }
 0x9f8   :  { %4292 = vadd.xlane.f32.xlu1 %v4291_v45  ;;  %v4203_v18 = vpop.xlane.xlu1 %4202 }
 0x9f9   :  { %v4243_v20 = vmul.f32 0.03125, %v4203_v18  ;;  %v4288_v29 = vsel %vm283_vm2, %v4272_v6, 0.0 }
 0x9fa   :  { %v4200_v7 = vpop.xlane.xlu0 %4199  ;;  %4289 = vadd.xlane.f32.xlu0 %v4288_v29 }
 0x9fb   :  { %v8074_v32 = vsub.f32 %v7979_v1, %v4243_v20  ;;  %v4242_v28 = vmul.f32 0.03125, %v4200_v7 }
 0x9fd   :  { %v8077_v43 = vsub.f32 %v7983_v31, %v4242_v28  ;;  %v4275_v4 = vmul.f32 %v8074_v32, %v8074_v32 }
 0x9ff   :  { %v4297_v23 = vsel %vm283_vm2, %v4275_v4, 0.0  ;;  %v4274_v30 = vmul.f32 %v8077_v43, %v8077_v43  ;;  %v4209_v5 = vpop.xlane.xlu1 %4208 }
 0xa00   :  { %4298 = vadd.xlane.f32.xlu1 %v4297_v23  ;;  %v4245_v14 = vmul.f32 0.03125, %v4209_v5 }
 0xa01   :  { %v4294_v59 = vsel %vm283_vm2, %v4274_v30, 0.0  ;;  %v4206_v40 = vpop.xlane.xlu0 %4205 }
 0xa02   :  { %4295 = vadd.xlane.f32.xlu0 %v4294_v59  ;;  %v8086_v46 = vsub.f32 %v7991_v62, %v4245_v14  ;;  %v4244_v48 = vmul.f32 0.03125, %v4206_v40 }
 0xa03   :  { %v4215_v15 = vpop.xlane.xlu1 %4214 }
 0xa04   :  { %v8089_v35 = vsub.f32 %v7996_v17, %v4244_v48  ;;  %v4247_v22 = vmul.f32 0.03125, %v4215_v15  ;;  %v4277_v47 = vmul.f32 %v8086_v46, %v8086_v46 }
 0xa05   :  { %v4212_v50 = vpop.xlane.xlu0 %4211 }
 0xa06   :  { %v8094_v60 = vsub.f32 %v8001_v55, %v4247_v22  ;;  %v4246_v63 = vmul.f32 0.03125, %v4212_v50  ;;  %v4303_v27 = vsel %vm283_vm2, %v4277_v47, 0.0  ;;  %v4276_v0 = vmul.f32 %v8089_v35, %v8089_v35  ;;  %v5495_v22 = vld [vmem:[%s8632_s10 + $0x38] sm:$0xff] }
 0xa07   :  { %4304 = vadd.xlane.f32.xlu1 %v4303_v27  ;;  %v4221_v57 = vpop.xlane.xlu1 %4220  ;;  %6144 = vmatprep.subr.mxu1 %v5495_v22 }
 0xa08   :  { %v8100_v10 = vsub.f32 %v8007_v24, %v4246_v63  ;;  %v4249_v21 = vmul.f32 0.03125, %v4221_v57  ;;  %v4300_v58 = vsel %vm283_vm2, %v4276_v0, 0.0  ;;  %v4279_v12 = vmul.f32 %v8094_v60, %v8094_v60  ;;  %6145 = vmatpush3.msra.mxu1 %v5495_v22  ;;  %v5494_v57 = vld [vmem:[%s8632_s10 + $0x30] sm:$0xff] }
 0xa09   :  { %v4218_v37 = vpop.xlane.xlu0 %4217  ;;  %4301 = vadd.xlane.f32.xlu0 %v4300_v58  ;;  %6146 = vmatprep.subr.mxu1 %v5494_v57 }
 0xa0a   :  { %v8106_v39 = vsub.f32 %v8013_v26, %v4249_v21  ;;  %v4248_v34 = vmul.f32 0.03125, %v4218_v37  ;;  %v4309_v61 = vsel %vm283_vm2, %v4279_v12, 0.0  ;;  %v4278_v52 = vmul.f32 %v8100_v10, %v8100_v10  ;;  %6147 = vmatpush3.msra.mxu1 %v5494_v57  ;;  %v5493_v37 = vld [vmem:[%s8632_s10 + $0x28] sm:$0xff] }
 0xa0b   :  { %4310 = vadd.xlane.f32.xlu1 %v4309_v61  ;;  %v4227_v25 = vpop.xlane.xlu1 %4226  ;;  %6148 = vmatprep.subr.mxu1 %v5493_v37 }
 0xa0c   :  { %v8112_v33 = vsub.f32 %v8019_v42, %v4248_v34  ;;  %v4251_v51 = vmul.f32 0.03125, %v4227_v25  ;;  %v4306_v53 = vsel %vm283_vm2, %v4278_v52, 0.0  ;;  %v4281_v49 = vmul.f32 %v8106_v39, %v8106_v39  ;;  %6149 = vmatpush3.msra.mxu1 %v5493_v37  ;;  %v5492_v52 = vld [vmem:[%s8632_s10 + $0x20] sm:$0xff] }
 0xa0d   :  { %v4224_v11 = vpop.xlane.xlu0 %4223  ;;  %4307 = vadd.xlane.f32.xlu0 %v4306_v53  ;;  %6150 = vmatprep.subr.mxu1 %v5492_v52  ;;  %v5527_v53 = vld [vmem:[%s8634_s12 + $0xf0] sm:$0xff] }
 0xa0e   :  { %v8118_v56 = vsub.f32 %v8025_v44, %v4251_v51  ;;  %v4250_v38 = vmul.f32 0.03125, %v4224_v11  ;;  %v4315_v8 = vsel %vm283_vm2, %v4281_v49, 0.0  ;;  %v4280_v45 = vmul.f32 %v8112_v33, %v8112_v33  ;;  %6151 = vmatpush3.msra.mxu1 %v5492_v52  ;;  %v5528_v51 = vld [vmem:[%s8634_s12 + $0xf8] sm:$0xff]  ;;  %v5526_v49 = vld [vmem:[%s8634_s12 + $0xe8] sm:$0xff] }
 0xa0f   :  { %4316 = vadd.xlane.f32.xlu1 %v4315_v8  ;;  %v4233_v6 = vpop.xlane.xlu1 %4232  ;;  %6176 = vmatprep.subr.mxu0 %v5528_v51 }
 0xa10   :  { %v8124_v18 = vsub.f32 %v8031_v3, %v4250_v38  ;;  %v4253_v20 = vmul.f32 0.03125, %v4233_v6  ;;  %v4312_v29 = vsel %vm283_vm2, %v4280_v45, 0.0  ;;  %v4283_v7 = vmul.f32 %v8118_v56, %v8118_v56  ;;  %6177 = vmatpush3.msra.mxu0 %v5528_v51 }
 0xa11   :  { %v4230_v28 = vpop.xlane.xlu0 %4229  ;;  %4313 = vadd.xlane.f32.xlu0 %v4312_v29  ;;  %6178 = vmatprep.subr.mxu0 %v5527_v53 }
 0xa12   :  { %v8130_v4 = vsub.f32 %v8037_v41, %v4253_v20  ;;  %v4252_v23 = vmul.f32 0.03125, %v4230_v28  ;;  %v4321_v30 = vsel %vm283_vm2, %v4283_v7, 0.0  ;;  %v4282_v5 = vmul.f32 %v8124_v18, %v8124_v18  ;;  %6179 = vmatpush3.msra.mxu0 %v5527_v53 }
 0xa13   :  { %4322 = vadd.xlane.f32.xlu1 %v4321_v30  ;;  %v4239_v14 = vpop.xlane.xlu1 %4238  ;;  %6180 = vmatprep.subr.mxu0 %v5526_v49 }
 0xa14   :  { %v8136_v59 = vsub.f32 %v8044_v36, %v4252_v23  ;;  %v4255_v40 = vmul.f32 0.03125, %v4239_v14  ;;  %v4318_v48 = vsel %vm283_vm2, %v4282_v5, 0.0  ;;  %v4285_v15 = vmul.f32 %v8130_v4, %v8130_v4  ;;  %6181 = vmatpush3.msra.mxu0 %v5526_v49 }
 0xa15   :  { %v4236_v47 = vpop.xlane.xlu0 %4235  ;;  %4319 = vadd.xlane.f32.xlu0 %v4318_v48 }
 0xa16   :  { %v8145_v50 = vsub.f32 %v8049_v19, %v4255_v40  ;;  %v4254_v63 = vmul.f32 0.03125, %v4236_v47  ;;  %v4327_v27 = vsel %vm283_vm2, %v4285_v15, 0.0  ;;  %v4284_v0 = vmul.f32 %v8136_v59, %v8136_v59 }
 0xa17   :  { %4328 = vadd.xlane.f32.xlu1 %v4327_v27  ;;  %v8182_v27 = vld [vmem:[%s8630_s8 + $0x1] ss:$0 sm:$0xff] }
 0xa18   :  { %v8154_v21 = vsub.f32 %v8055_v13, %v4254_v63  ;;  %v4324_v58 = vsel %vm283_vm2, %v4284_v0, 0.0  ;;  %v4287_v12 = vmul.f32 %v8145_v50, %v8145_v50 }
 0xa19   :  { %4325 = vadd.xlane.f32.xlu0 %v4324_v58 }
 0xa1a   :  { %v4333_v34 = vsel %vm283_vm2, %v4287_v12, 0.0  ;;  %v4286_v61 = vmul.f32 %v8154_v21, %v8154_v21 }
 0xa1b   :  { %4334 = vadd.xlane.f32.xlu1 %v4333_v34 }
 0xa1c   :  { %v4330_v25 = vsel %vm283_vm2, %v4286_v61, 0.0 }
 0xa1d   :  { %4331 = vadd.xlane.f32.xlu0 %v4330_v25  ;;  %v8189_v25 = vld [vmem:[%s8631_s9 + $0x1] ss:$0 sm:$0xff] }
 0xa81   :  { %v4293_v11 = vpop.xlane.xlu1 %4292 }
 0xa82   :  { %v4337_v38 = vmul.f32 0.03125, %v4293_v11 }
 0xa83   :  { %v4290_v8 = vpop.xlane.xlu0 %4289 }
 0xa84   :  { %v4353_v45 = vadd.f32 1e-05, %v4337_v38  ;;  %v4336_v6 = vmul.f32 0.03125, %v4290_v8 }
 0xa86   :  { %6473 = vrsqrt.f32 %v4353_v45  ;;  %v4352_v20 = vadd.f32 1e-05, %v4336_v6 }
 0xa88   :  { %6475 = vrsqrt.f32 %v4352_v20 }
 0xa89   :  { %v4299_v29 = vpop.xlane.xlu1 %4298 }
 0xa8a   :  { %v4339_v7 = vmul.f32 0.03125, %v4299_v29 }
 0xa8b   :  { %v4296_v28 = vpop.xlane.xlu0 %4295 }
 0xa8c   :  { %v4355_v23 = vadd.f32 1e-05, %v4339_v7  ;;  %v4338_v30 = vmul.f32 0.03125, %v4296_v28 }
 0xa8e   :  { %6477 = vrsqrt.f32 %v4355_v23  ;;  %v4354_v5 = vadd.f32 1e-05, %v4338_v30 }
 0xa90   :  { %6479 = vrsqrt.f32 %v4354_v5  ;;  %v4305_v14 = vpop.xlane.xlu1 %4304 }
 0xa91   :  { %v4341_v40 = vmul.f32 0.03125, %v4305_v14 }
 0xa92   :  { %v4302_v15 = vpop.xlane.xlu0 %4301 }
 0xa93   :  { %v6474_v48 = vpop.eup %6473  ;;  %v4357_v47 = vadd.f32 1e-05, %v4341_v40  ;;  %v4340_v63 = vmul.f32 0.03125, %v4302_v15 }
 0xa94   :  { %v4385_v22 = vmul.f32 %v6474_v48, %v8062_v54  ;;  %v4311_v57 = vpop.xlane.xlu1 %4310 }
 0xa95   :  { %v6476_v0 = vpop.eup %6475  ;;  %6481 = vrsqrt.f32 %v4357_v47  ;;  %v4356_v58 = vadd.f32 1e-05, %v4340_v63  ;;  %v4343_v12 = vmul.f32 0.03125, %v4311_v57 }
 0xa96   :  { %v4384_v37 = vmul.f32 %v6476_v0, %v8065_v9  ;;  %v4308_v34 = vpop.xlane.xlu0 %4307  ;;  %v4405_v61 = vmul.f32 %v8182_v27, %v4385_v22 }
 0xa97   :  { %6483 = vrsqrt.f32 %v4356_v58  ;;  %v4359_v52 = vadd.f32 1e-05, %v4343_v12  ;;  %v4342_v54 = vmul.f32 0.03125, %v4308_v34 }
 0xa98   :  { %v4404_v51 = vmul.f32 %v8182_v27, %v4384_v37  ;;  %v4317_v53 = vpop.xlane.xlu1 %4316  ;;  %v4425_v45 = vadd.f32 %v8189_v25, %v4405_v61 }
 0xa99   :  { %6485 = vrsqrt.f32 %v4359_v52  ;;  %v4358_v49 = vadd.f32 1e-05, %v4342_v54  ;;  %v4345_v11 = vmul.f32 0.03125, %v4317_v53 }
 0xa9a   :  { %v4424_v38 = vadd.f32 %v8189_v25, %v4404_v51  ;;  %v4314_v8 = vpop.xlane.xlu0 %4313 }
 0xa9b   :  { %v6478_v9 = vpop.eup %6477  ;;  %6487 = vrsqrt.f32 %v4358_v49  ;;  %v4361_v6 = vadd.f32 1e-05, %v4345_v11  ;;  %v4344_v20 = vmul.f32 0.03125, %v4314_v8 }
 0xa9c   :  { %6152 = vmatprep.mubr.msk.f32.mxu1 %vm283_vm2, %v4424_v38  ;;  %v4387_v29 = vmul.f32 %v6478_v9, %v8074_v32  ;;  %v4323_v28 = vpop.xlane.xlu1 %4322 }
 0xa9d   :  { %v6480_v7 = vpop.eup %6479  ;;  %6153 = vmatmul.mubr.msk.f32.vlgmr.msra.gmra.mxu1 %vm283_vm2, %v4425_v45  ;;  %6489 = vrsqrt.f32 %v4361_v6  ;;  %v4360_v23 = vadd.f32 1e-05, %v4344_v20  ;;  %v4347_v30 = vmul.f32 0.03125, %v4323_v28 }
 0xa9e   :  { %v4386_v5 = vmul.f32 %v6480_v7, %v8077_v43  ;;  %v4320_v14 = vpop.xlane.xlu0 %4319  ;;  %v4407_v40 = vmul.f32 %v8182_v27, %v4387_v29 }
 0xa9f   :  { %6491 = vrsqrt.f32 %v4360_v23  ;;  %v4363_v48 = vadd.f32 1e-05, %v4347_v30  ;;  %v4346_v15 = vmul.f32 0.03125, %v4320_v14 }
 0xaa0   :  { %v4406_v22 = vmul.f32 %v8182_v27, %v4386_v5  ;;  %v4329_v47 = vpop.xlane.xlu1 %4328  ;;  %v4427_v12 = vadd.f32 %v8189_v25, %v4407_v40 }
 0xaa1   :  { %6493 = vrsqrt.f32 %v4363_v48  ;;  %v4362_v32 = vadd.f32 1e-05, %v4346_v15  ;;  %v4349_v63 = vmul.f32 0.03125, %v4329_v47 }
 0xaa2   :  { %v4426_v0 = vadd.f32 %v8189_v25, %v4406_v22  ;;  %v6482_v57 = vpop.eup %6481  ;;  %v4326_v58 = vpop.xlane.xlu0 %4325 }
 0xaa3   :  { %6495 = vrsqrt.f32 %v4362_v32  ;;  %v4365_v43 = vadd.f32 1e-05, %v4349_v63  ;;  %v4348_v37 = vmul.f32 0.03125, %v4326_v58  ;;  %v4389_v34 = vmul.f32 %v6482_v57, %v8086_v46 }
 0xaa4   :  { %6155 = vmatprep.mubr.msk.f32.mxu1 %vm283_vm2, %v4426_v0  ;;  %v6484_v61 = vpop.eup %6483  ;;  %v4335_v52 = vpop.xlane.xlu1 %4334 }
 0xaa5   :  { %6156 = vmatmul.mubr.msk.f32.gmra.mxu1 %vm283_vm2, %v4427_v12  ;;  %6497 = vrsqrt.f32 %v4365_v43  ;;  %v4364_v54 = vadd.f32 1e-05, %v4348_v37  ;;  %v4351_v51 = vmul.f32 0.03125, %v4335_v52  ;;  %v4388_v53 = vmul.f32 %v6484_v61, %v8089_v35 }
 0xaa6   :  { %v6486_v49 = vpop.eup %6485  ;;  %v4332_v11 = vpop.xlane.xlu0 %4331  ;;  %v4409_v38 = vmul.f32 %v8182_v27, %v4389_v34 }
 0xaa7   :  { %6499 = vrsqrt.f32 %v4364_v54  ;;  %v4367_v9 = vadd.f32 1e-05, %v4351_v51  ;;  %v4350_v8 = vmul.f32 0.03125, %v4332_v11  ;;  %v4408_v45 = vmul.f32 %v8182_v27, %v4388_v53 }
 0xaa8   :  { %v6488_v6 = vpop.eup %6487  ;;  %v4391_v46 = vmul.f32 %v6486_v49, %v8094_v60  ;;  %v4429_v35 = vadd.f32 %v8189_v25, %v4409_v38 }
 0xaa9   :  { %6501 = vrsqrt.f32 %v4367_v9  ;;  %v4366_v20 = vadd.f32 1e-05, %v4350_v8  ;;  %v4428_v29 = vadd.f32 %v8189_v25, %v4408_v45  ;;  %v4390_v7 = vmul.f32 %v6488_v6, %v8100_v10  ;;  %v5522_v9 = vld [vmem:[%s8634_s12 + $0xc8] sm:$0xff]  ;;  %v5521_v8 = vld [vmem:[%s8634_s12 + $0xc0] sm:$0xff]  ;;  %v5520_v45 = vld [vmem:[%s8634_s12 + $0xb8] sm:$0xff] }
 0xaaa   :  { %v6490_v28 = vpop.eup %6489  ;;  %v4411_v23 = vmul.f32 %v8182_v27, %v4391_v46  ;;  %v5519_v6 = vld [vmem:[%s8634_s12 + $0xb0] sm:$0xff]  ;;  %v5518_v46 = vld [vmem:[%s8634_s12 + $0xa8] sm:$0xff] }
 0xaab   :  { %6503 = vrsqrt.f32 %v4366_v20  ;;  %6158 = vmatprep.mubr.msk.f32.mxu1 %vm283_vm2, %v4428_v29  ;;  %v4410_v30 = vmul.f32 %v8182_v27, %v4390_v7  ;;  %v4393_v5 = vmul.f32 %v6490_v28, %v8106_v39  ;;  %v5517_v20 = vld [vmem:[%s8634_s12 + $0xa0] sm:$0xff]  ;;  %v5516_v29 = vld [vmem:[%s8634_s12 + $0x98] sm:$0xff]  ;;  %v5515_v7 = vld [vmem:[%s8634_s12 + $0x90] sm:$0xff] }
 0xaac   :  { %v6492_v14 = vpop.eup %6491  ;;  %6159 = vmatmul.mubr.msk.f32.gmra.mxu1 %vm283_vm2, %v4429_v35  ;;  %v4431_v48 = vadd.f32 %v8189_v25, %v4411_v23  ;;  %v5514_v28 = vld [vmem:[%s8634_s12 + $0x88] sm:$0xff]  ;;  %v5513_v35 = vld [vmem:[%s8634_s12 + $0x80] sm:$0xff] }
 0xaad   :  { %v4430_v60 = vadd.f32 %v8189_v25, %v4410_v30  ;;  %v4392_v40 = vmul.f32 %v6492_v14, %v8112_v33  ;;  %v4413_v15 = vmul.f32 %v8182_v27, %v4393_v5  ;;  %v8294_v23 = vld [vmem:[%s8633_s11 + $0x1] ss:$0 sm:$0xff] }
 0xaae   :  { %v6494_v10 = vpop.eup %6493 }
 0xaaf   :  { %6161 = vmatprep.mubr.msk.f32.mxu1 %vm283_vm2, %v4430_v60  ;;  %v4412_v22 = vmul.f32 %v8182_v27, %v4392_v40  ;;  %v4395_v47 = vmul.f32 %v6494_v10, %v8118_v56  ;;  %v4433_v33 = vadd.f32 %v8189_v25, %v4413_v15 }
 0xab0   :  { %v6496_v32 = vpop.eup %6495  ;;  %6162 = vmatmul.mubr.msk.f32.gmra.mxu1 %vm283_vm2, %v4431_v48 }
 0xab1   :  { %v4432_v39 = vadd.f32 %v8189_v25, %v4412_v22  ;;  %v4394_v63 = vmul.f32 %v6496_v32, %v8124_v18  ;;  %v4415_v57 = vmul.f32 %v8182_v27, %v4395_v47 }
 0xab2   :  { %v6498_v0 = vpop.eup %6497 }
 0xab3   :  { %6164 = vmatprep.mubr.msk.f32.mxu1 %vm283_vm2, %v4432_v39  ;;  %v4414_v58 = vmul.f32 %v8182_v27, %v4394_v63  ;;  %v4397_v12 = vmul.f32 %v6498_v0, %v8130_v4  ;;  %v4435_v18 = vadd.f32 %v8189_v25, %v4415_v57 }
 0xab4   :  { %v6500_v43 = vpop.eup %6499  ;;  %6165 = vmatmul.mubr.msk.f32.gmra.mxu1 %vm283_vm2, %v4433_v33 }
 0xab5   :  { %v4434_v56 = vadd.f32 %v8189_v25, %v4414_v58  ;;  %v4396_v37 = vmul.f32 %v6500_v43, %v8136_v59  ;;  %v4417_v61 = vmul.f32 %v8182_v27, %v4397_v12 }
 0xab6   :  { %v6502_v34 = vpop.eup %6501 }
 0xab7   :  { %6167 = vmatprep.mubr.msk.f32.mxu1 %vm283_vm2, %v4434_v56  ;;  %v4416_v52 = vmul.f32 %v8182_v27, %v4396_v37  ;;  %v4399_v54 = vmul.f32 %v6502_v34, %v8145_v50  ;;  %v4437_v59 = vadd.f32 %v8189_v25, %v4417_v61 }
 0xab8   :  { %v6504_v51 = vpop.eup %6503  ;;  %6168 = vmatmul.mubr.msk.f32.gmra.mxu1 %vm283_vm2, %v4435_v18 }
 0xab9   :  { %v4436_v4 = vadd.f32 %v8189_v25, %v4416_v52  ;;  %v4398_v53 = vmul.f32 %v6504_v51, %v8154_v21  ;;  %v4419_v49 = vmul.f32 %v8182_v27, %v4399_v54  ;;  %v5525_v21 = vld [vmem:[%s8634_s12 + $0xe0] sm:$0xff] }
 0xaba   :  { %6182 = vmatprep.subr.mxu0 %v5525_v21 }
 0xabb   :  { %6170 = vmatprep.mubr.msk.f32.mxu1 %vm283_vm2, %v4436_v4  ;;  %v4418_v11 = vmul.f32 %v8182_v27, %v4398_v53  ;;  %v4439_v50 = vadd.f32 %v8189_v25, %v4419_v49  ;;  %6183 = vmatpush3.msra.mxu0 %v5525_v21  ;;  %v5524_v27 = vld [vmem:[%s8634_s12 + $0xd8] sm:$0xff] }
 0xabc   :  { %6171 = vmatmul.mubr.msk.f32.gmra.mxu1 %vm283_vm2, %v4437_v59  ;;  %6184 = vmatprep.subr.mxu0 %v5524_v27 }
 0xabd   :  { %v4438_v38 = vadd.f32 %v8189_v25, %v4418_v11  ;;  %6185 = vmatpush3.msra.mxu0 %v5524_v27  ;;  %v5523_v25 = vld [vmem:[%s8634_s12 + $0xd0] sm:$0xff] }
 0xabe   :  { %6186 = vmatprep.subr.mxu0 %v5523_v25 }
 0xabf   :  { %6173 = vmatprep.mubr.msk.f32.mxu1 %vm283_vm2, %v4438_v38  ;;  %6187 = vmatpush3.msra.mxu0 %v5523_v25 }
 0xac0   :  { %6174 = vmatmul.mubr.msk.f32.gmra.mxu1 %vm283_vm2, %v4439_v50  ;;  %6188 = vmatprep.subr.mxu0 %v5522_v9 }
 0xac1   :  { %6189 = vmatpush3.msra.mxu0 %v5522_v9 }
 0xac2   :  { %6190 = vmatprep.subr.mxu0 %v5521_v8 }
 0xac3   :  { %6191 = vmatpush3.msra.mxu0 %v5521_v8 }
 0xac4   :  { %6192 = vmatprep.subr.mxu0 %v5520_v45 }
 0xac5   :  { %6193 = vmatpush3.msra.mxu0 %v5520_v45 }
 0xac6   :  { %6194 = vmatprep.subr.mxu0 %v5519_v6 }
 0xac7   :  { %6195 = vmatpush3.msra.mxu0 %v5519_v6 }
 0xac8   :  { %6196 = vmatprep.subr.mxu0 %v5518_v46 }
 0xac9   :  { %6197 = vmatpush3.msra.mxu0 %v5518_v46 }
 0xaca   :  { %6198 = vmatprep.subr.mxu0 %v5517_v20 }
 0xacb   :  { %6199 = vmatpush3.msra.mxu0 %v5517_v20 }
 0xacc   :  { %6200 = vmatprep.subr.mxu0 %v5516_v29 }
 0xacd   :  { %6201 = vmatpush3.msra.mxu0 %v5516_v29 }
 0xace   :  { %6202 = vmatprep.subr.mxu0 %v5515_v7 }
 0xacf   :  { %6203 = vmatpush3.msra.mxu0 %v5515_v7 }
 0xad0   :  { %6204 = vmatprep.subr.mxu0 %v5514_v28 }
 0xad1   :  { %6205 = vmatpush3.msra.mxu0 %v5514_v28 }
 0xad2   :  { %6206 = vmatprep.subr.mxu0 %v5513_v35 }
 0xad3   :  { %6207 = vmatpush3.msra.mxu0 %v5513_v35 }
 0xb5d   :  { %v6154_v30 = vpop.f32.mrf.mxu1 }
 0xb5e   :  { %v4570_v5 = vadd.f32 %v6154_v30, %v8294_v23 }
 0xb5f   :  { %v4564_v14 = vpop.f32.mrf.mxu1 }
 0xb60   :  { %v4660_v60 = vmul.f32 0.70710677, %v4570_v5  ;;  %v4565_v40 = vadd.f32 %v8294_v23, %v4564_v14  ;;  %v4644_v51 = vmul.f32 0.5, %v4570_v5 }
 0xb62   :  { %6505 = verf.f32 %v4660_v60  ;;  %v4659_v10 = vmul.f32 0.70710677, %v4565_v40  ;;  %v4643_v18 = vmul.f32 0.5, %v4565_v40 }
 0xb64   :  { %6507 = verf.f32 %v4659_v10 }
 0xb65   :  { %v6157_v48 = vpop.f32.mrf.mxu1 }
 0xb66   :  { %v4580_v15 = vadd.f32 %v6157_v48, %v8294_v23 }
 0xb67   :  { %v4574_v22 = vpop.f32.mrf.mxu1 }
 0xb68   :  { %v4662_v47 = vmul.f32 0.70710677, %v4580_v15  ;;  %v4575_v32 = vadd.f32 %v8294_v23, %v4574_v22  ;;  %v4646_v35 = vmul.f32 0.5, %v4580_v15 }
 0xb6a   :  { %6509 = verf.f32 %v4662_v47  ;;  %v4661_v39 = vmul.f32 0.70710677, %v4575_v32  ;;  %v4645_v29 = vmul.f32 0.5, %v4575_v32 }
 0xb6c   :  { %6511 = verf.f32 %v4661_v39  ;;  %v6160_v63 = vpop.f32.mrf.mxu1 }
 0xb6d   :  { %v8301_v0 = vadd.f32 %v6160_v63, %v8294_v23 }
 0xb6e   :  { %v4584_v57 = vpop.f32.mrf.mxu1 }
 0xb6f   :  { %v6506_v33 = vpop.eup %6505  ;;  %v4664_v58 = vmul.f32 0.70710677, %v8301_v0  ;;  %v4585_v12 = vadd.f32 %v8294_v23, %v4584_v57 }
 0xb70   :  { %v6163_v56 = vpop.f32.mrf.mxu1  ;;  %v4692_v37 = vadd.f32 1.0, %v6506_v33 }
 0xb71   :  { %v6508_v43 = vpop.eup %6507  ;;  %6513 = verf.f32 %v4664_v58  ;;  %v4663_v34 = vmul.f32 0.70710677, %v4585_v12  ;;  %v8306_v61 = vadd.f32 %v6163_v56, %v8294_v23  ;;  %v4647_v56 = vmul.f32 0.5, %v4585_v12 }
 0xb72   :  { %v4594_v52 = vpop.f32.mrf.mxu1  ;;  %v4691_v54 = vadd.f32 1.0, %v6508_v43  ;;  %v4708_v11 = vmul.f32 %v4692_v37, %v4644_v51  ;;  %v4648_v43 = vmul.f32 0.5, %v8301_v0 }
 0xb73   :  { %6515 = verf.f32 %v4663_v34  ;;  %v4595_v4 = vadd.f32 %v8294_v23, %v4594_v52  ;;  %v4666_v53 = vmul.f32 0.70710677, %v8306_v61  ;;  %v4650_v0 = vmul.f32 0.5, %v8306_v61 }
 0xb74   :  { %v6166_v59 = vpop.f32.mrf.mxu1  ;;  %v4707_v49 = vmul.f32 %v4691_v54, %v4643_v18 }
 0xb75   :  { %v4665_v38 = vmul.f32 0.70710677, %v4595_v4  ;;  %v8311_v50 = vadd.f32 %v6166_v59, %v8294_v23  ;;  %6517 = verf.f32 %v4666_v53  ;;  %v4649_v53 = vmul.f32 0.5, %v4595_v4 }
 0xb76   :  { %v4604_v27 = vpop.f32.mrf.mxu1  ;;  %6208 = vmatprep.mubr.f32.mxu0 %v4707_v49 }
 0xb77   :  { %v6510_v21 = vpop.eup %6509  ;;  %6519 = verf.f32 %v4665_v38  ;;  %v4668_v25 = vmul.f32 0.70710677, %v8311_v50  ;;  %v4605_v9 = vadd.f32 %v8294_v23, %v4604_v27  ;;  %6209 = vmatmul.mubr.f32.vlgmr.msra.gmra.mxu0 %v4708_v11 }
 0xb78   :  { %v6169_v45 = vpop.f32.mrf.mxu1  ;;  %v4694_v20 = vadd.f32 1.0, %v6510_v21 }
 0xb79   :  { %v6512_v8 = vpop.eup %6511  ;;  %6521 = verf.f32 %v4668_v25  ;;  %v4667_v6 = vmul.f32 0.70710677, %v4605_v9  ;;  %v8316_v46 = vadd.f32 %v6169_v45, %v8294_v23 }
 0xb7a   :  { %v4614_v7 = vpop.f32.mrf.mxu1  ;;  %v4693_v28 = vadd.f32 1.0, %v6512_v8  ;;  %v4710_v48 = vmul.f32 %v4694_v20, %v4646_v35  ;;  %v4651_v8 = vmul.f32 0.5, %v4605_v9  ;;  %v4652_v20 = vmul.f32 0.5, %v8311_v50 }
 0xb7b   :  { %6523 = verf.f32 %v4667_v6  ;;  %v4670_v30 = vmul.f32 0.70710677, %v8316_v46  ;;  %v4615_v5 = vadd.f32 %v8294_v23, %v4614_v7 }
 0xb7c   :  { %v6172_v14 = vpop.f32.mrf.mxu1  ;;  %v4709_v60 = vmul.f32 %v4693_v28, %v4645_v29 }
 0xb7d   :  { %6525 = verf.f32 %v4670_v30  ;;  %v4669_v40 = vmul.f32 0.70710677, %v4615_v5  ;;  %v8321_v10 = vadd.f32 %v6172_v14, %v8294_v23  ;;  %v4653_v28 = vmul.f32 0.5, %v4615_v5 }
 0xb7e   :  { %v6514_v22 = vpop.eup %6513  ;;  %v4624_v47 = vpop.f32.mrf.mxu1  ;;  %6211 = vmatprep.mubr.f32.mxu0 %v4709_v60  ;;  %v4654_v60 = vmul.f32 0.5, %v8316_v46 }
 0xb7f   :  { %6527 = verf.f32 %v4669_v40  ;;  %v4672_v32 = vmul.f32 0.70710677, %v8321_v10  ;;  %v4625_v15 = vadd.f32 %v8294_v23, %v4624_v47  ;;  %6212 = vmatmul.mubr.f32.gmra.mxu0 %v4710_v48  ;;  %v4696_v33 = vadd.f32 1.0, %v6514_v22 }
 0xb80   :  { %v6516_v39 = vpop.eup %6515  ;;  %v6175_v63 = vpop.f32.mrf.mxu1 }
 0xb81   :  { %6529 = verf.f32 %v4672_v32  ;;  %v4671_v57 = vmul.f32 0.70710677, %v4625_v15  ;;  %v4640_v58 = vadd.f32 %v6175_v63, %v8294_v23  ;;  %v4695_v34 = vadd.f32 1.0, %v6516_v39 }
 0xb82   :  { %v4634_v37 = vpop.f32.mrf.mxu1  ;;  %v6518_v18 = vpop.eup %6517  ;;  %v4712_v49 = vmul.f32 %v4696_v33, %v4648_v43  ;;  %v4655_v48 = vmul.f32 0.5, %v4625_v15  ;;  %v4656_v39 = vmul.f32 0.5, %v8321_v10 }
 0xb83   :  { %6531 = verf.f32 %v4671_v57  ;;  %v4674_v52 = vmul.f32 0.70710677, %v4640_v58  ;;  %v4635_v54 = vadd.f32 %v8294_v23, %v4634_v37  ;;  %v4711_v59 = vmul.f32 %v4695_v34, %v4647_v56 }
 0xb84   :  { %v6520_v51 = vpop.eup %6519  ;;  %v4698_v21 = vadd.f32 1.0, %v6518_v18  ;;  %v4658_v46 = vmul.f32 0.5, %v4640_v58  ;;  %v8335_v18 = vld [vmem:[%s8635_s13 + $0x1] ss:$0 sm:$0xff] }
 0xb85   :  { %6533 = verf.f32 %v4674_v52  ;;  %v4673_v11 = vmul.f32 0.70710677, %v4635_v54  ;;  %v4697_v38 = vadd.f32 1.0, %v6520_v51  ;;  %6214 = vmatprep.mubr.f32.mxu0 %v4711_v59  ;;  %v4657_v33 = vmul.f32 0.5, %v4635_v54 }
 0xb86   :  { %v6522_v27 = vpop.eup %6521  ;;  %6215 = vmatmul.mubr.f32.gmra.mxu0 %v4712_v49  ;;  %v4714_v45 = vmul.f32 %v4698_v21, %v4650_v0 }
 0xb87   :  { %6535 = verf.f32 %v4673_v11  ;;  %v4713_v12 = vmul.f32 %v4697_v38, %v4649_v53  ;;  %v4700_v6 = vadd.f32 1.0, %v6522_v27 }
 0xb88   :  { %v6524_v25 = vpop.eup %6523 }
 0xb89   :  { %6217 = vmatprep.mubr.f32.mxu0 %v4713_v12  ;;  %v4699_v23 = vadd.f32 1.0, %v6524_v25  ;;  %v4716_v35 = vmul.f32 %v4700_v6, %v4652_v20 }
 0xb8a   :  { %v6526_v4 = vpop.eup %6525  ;;  %6218 = vmatmul.mubr.f32.gmra.mxu0 %v4714_v45 }
 0xb8b   :  { %v4715_v29 = vmul.f32 %v4699_v23, %v4651_v8  ;;  %v4702_v61 = vadd.f32 1.0, %v6526_v4 }
 0xb8c   :  { %v6528_v7 = vpop.eup %6527 }
 0xb8d   :  { %6220 = vmatprep.mubr.f32.mxu0 %v4715_v29  ;;  %v4701_v30 = vadd.f32 1.0, %v6528_v7  ;;  %v4718_v22 = vmul.f32 %v4702_v61, %v4654_v60 }
 0xb8e   :  { %v6530_v14 = vpop.eup %6529  ;;  %6221 = vmatmul.mubr.f32.gmra.mxu0 %v4716_v35 }
 0xb8f   :  { %v4717_v9 = vmul.f32 %v4701_v30, %v4653_v28  ;;  %v4704_v32 = vadd.f32 1.0, %v6530_v14 }
 0xb90   :  { %v6532_v40 = vpop.eup %6531 }
 0xb91   :  { %6223 = vmatprep.mubr.f32.mxu0 %v4717_v9  ;;  %v4703_v47 = vadd.f32 1.0, %v6532_v40  ;;  %v4720_v57 = vmul.f32 %v4704_v32, %v4656_v39 }
 0xb92   :  { %v6534_v50 = vpop.eup %6533  ;;  %6224 = vmatmul.mubr.f32.gmra.mxu0 %v4718_v22 }
 0xb93   :  { %v4719_v5 = vmul.f32 %v4703_v47, %v4655_v48  ;;  %v4706_v56 = vadd.f32 1.0, %v6534_v50 }
 0xb94   :  { %v6536_v63 = vpop.eup %6535 }
 0xb95   :  { %6226 = vmatprep.mubr.f32.mxu0 %v4719_v5  ;;  %v4705_v43 = vadd.f32 1.0, %v6536_v63  ;;  %v4722_v15 = vmul.f32 %v4706_v56, %v4658_v46 }
 0xb96   :  { %6227 = vmatmul.mubr.f32.gmra.mxu0 %v4720_v57 }
 0xb97   :  { %v4721_v37 = vmul.f32 %v4705_v43, %v4657_v33 }
 0xb99   :  { %6229 = vmatprep.mubr.f32.mxu0 %v4721_v37 }
 0xb9a   :  { %6230 = vmatmul.mubr.f32.gmra.mxu0 %v4722_v15 }
 0xc37   :  { %v6210_v34 = vpop.f32.mrf.mxu0 }
 0xc38   :  { %v4886_v10 = vadd.f32 %v6210_v34, %v7967_v2 }
 0xc39   :  { %v4806_v52 = vpop.f32.mrf.mxu0 }
 0xc3a   :  { %v8339_v54 = vadd.f32 %v8335_v18, %v4886_v10  ;;  %v4885_v51 = vadd.f32 %v4806_v52, %v7971_v16 }
 0xc3c   :  { %v8343_v58 = vadd.f32 %v8335_v18, %v4885_v51  ;;  %v4927_v53 = vsel %vm283_vm2, %v8339_v54, 0.0 }
 0xc3d   :  { %4928 = vadd.xlane.f32.xlu1 %v4927_v53 }
 0xc3e   :  { %v4924_v59 = vsel %vm283_vm2, %v8343_v58, 0.0 }
 0xc3f   :  { %4925 = vadd.xlane.f32.xlu0 %v4924_v59  ;;  %v6213_v49 = vpop.f32.mrf.mxu0 }
 0xc40   :  { %v4888_v2 = vadd.f32 %v6213_v49, %v7979_v1 }
 0xc41   :  { %v4816_v11 = vpop.f32.mrf.mxu0 }
 0xc42   :  { %v8351_v38 = vadd.f32 %v8335_v18, %v4888_v2  ;;  %v4887_v16 = vadd.f32 %v4816_v11, %v7983_v31 }
 0xc44   :  { %v8355_v21 = vadd.f32 %v8335_v18, %v4887_v16  ;;  %v4933_v27 = vsel %vm283_vm2, %v8351_v38, 0.0 }
 0xc45   :  { %4934 = vadd.xlane.f32.xlu1 %v4933_v27 }
 0xc46   :  { %v4930_v0 = vsel %vm283_vm2, %v8355_v21, 0.0  ;;  %v6216_v12 = vpop.f32.mrf.mxu0 }
 0xc47   :  { %4931 = vadd.xlane.f32.xlu0 %v4930_v0  ;;  %v4890_v1 = vadd.f32 %v6216_v12, %v7991_v62 }
 0xc48   :  { %v4826_v25 = vpop.f32.mrf.mxu0 }
 0xc49   :  { %v8363_v8 = vadd.f32 %v8335_v18, %v4890_v1  ;;  %v4889_v31 = vadd.f32 %v4826_v25, %v7996_v17 }
 0xc4a   :  { %v6219_v45 = vpop.f32.mrf.mxu0 }
 0xc4b   :  { %v8367_v23 = vadd.f32 %v8335_v18, %v4889_v31  ;;  %v4892_v6 = vadd.f32 %v6219_v45, %v8001_v55  ;;  %v4939_v4 = vsel %vm283_vm2, %v8363_v8, 0.0 }
 0xc4c   :  { %4940 = vadd.xlane.f32.xlu1 %v4939_v4  ;;  %v4836_v20 = vpop.f32.mrf.mxu0 }
 0xc4d   :  { %v8373_v29 = vadd.f32 %v8335_v18, %v4892_v6  ;;  %v4891_v62 = vadd.f32 %v4836_v20, %v8007_v24  ;;  %v4936_v7 = vsel %vm283_vm2, %v8367_v23, 0.0 }
 0xc4e   :  { %4937 = vadd.xlane.f32.xlu0 %v4936_v7  ;;  %v6222_v17 = vpop.f32.mrf.mxu0 }
 0xc4f   :  { %v8379_v28 = vadd.f32 %v8335_v18, %v4891_v62  ;;  %v4894_v55 = vadd.f32 %v6222_v17, %v8013_v26  ;;  %v4945_v35 = vsel %vm283_vm2, %v8373_v29, 0.0 }
 0xc50   :  { %4946 = vadd.xlane.f32.xlu1 %v4945_v35  ;;  %v4846_v30 = vpop.f32.mrf.mxu0 }
 0xc51   :  { %v8385_v61 = vadd.f32 %v8335_v18, %v4894_v55  ;;  %v4893_v24 = vadd.f32 %v4846_v30, %v8019_v42  ;;  %v4942_v14 = vsel %vm283_vm2, %v8379_v28, 0.0 }
 0xc52   :  { %4943 = vadd.xlane.f32.xlu0 %v4942_v14  ;;  %v6225_v60 = vpop.f32.mrf.mxu0 }
 0xc53   :  { %v8391_v9 = vadd.f32 %v8335_v18, %v4893_v24  ;;  %v4896_v26 = vadd.f32 %v6225_v60, %v8025_v44  ;;  %v4951_v40 = vsel %vm283_vm2, %v8385_v61, 0.0 }
 0xc54   :  { %4952 = vadd.xlane.f32.xlu1 %v4951_v40  ;;  %v4856_v48 = vpop.f32.mrf.mxu0 }
 0xc55   :  { %v8397_v22 = vadd.f32 %v8335_v18, %v4896_v26  ;;  %v4895_v42 = vadd.f32 %v4856_v48, %v8031_v3  ;;  %v4948_v47 = vsel %vm283_vm2, %v8391_v9, 0.0 }
 0xc56   :  { %4949 = vadd.xlane.f32.xlu0 %v4948_v47  ;;  %v6228_v32 = vpop.f32.mrf.mxu0 }
 0xc57   :  { %v8403_v50 = vadd.f32 %v8335_v18, %v4895_v42  ;;  %v4898_v44 = vadd.f32 %v6228_v32, %v8037_v41  ;;  %v4957_v39 = vsel %vm283_vm2, %v8397_v22, 0.0 }
 0xc58   :  { %4958 = vadd.xlane.f32.xlu1 %v4957_v39  ;;  %v4866_v5 = vpop.f32.mrf.mxu0 }
 0xc59   :  { %v8409_v63 = vadd.f32 %v8335_v18, %v4898_v44  ;;  %v4897_v3 = vadd.f32 %v4866_v5, %v8044_v36  ;;  %v4954_v33 = vsel %vm283_vm2, %v8403_v50, 0.0 }
 0xc5a   :  { %4955 = vadd.xlane.f32.xlu0 %v4954_v33  ;;  %v6231_v57 = vpop.f32.mrf.mxu0 }
 0xc5b   :  { %v8415_v43 = vadd.f32 %v8335_v18, %v4897_v3  ;;  %v4900_v41 = vadd.f32 %v6231_v57, %v8049_v19  ;;  %v4963_v56 = vsel %vm283_vm2, %v8409_v63, 0.0 }
 0xc5c   :  { %4964 = vadd.xlane.f32.xlu1 %v4963_v56  ;;  %v4876_v46 = vpop.f32.mrf.mxu0 }
 0xc5d   :  { %v8421_v37 = vadd.f32 %v8335_v18, %v4900_v41  ;;  %v4899_v36 = vadd.f32 %v4876_v46, %v8055_v13  ;;  %v4960_v15 = vsel %vm283_vm2, %v8415_v43, 0.0 }
 0xc5e   :  { %4961 = vadd.xlane.f32.xlu0 %v4960_v15 }
 0xc5f   :  { %v8427_v34 = vadd.f32 %v8335_v18, %v4899_v36  ;;  %v4969_v19 = vsel %vm283_vm2, %v8421_v37, 0.0 }
 0xc60   :  { %4970 = vadd.xlane.f32.xlu1 %v4969_v19 }
 0xc61   :  { %v4966_v10 = vsel %vm283_vm2, %v8427_v34, 0.0 }
 0xc62   :  { %4967 = vadd.xlane.f32.xlu0 %v4966_v10 }
 0xcc6   :  { %v4929_v52 = vpop.xlane.xlu1 %4928 }
 0xcc7   :  { %v4973_v51 = vmul.f32 0.03125, %v4929_v52 }
 0xcc8   :  { %v4926_v53 = vpop.xlane.xlu0 %4925 }
 0xcc9   :  { %v8434_v13 = vsub.f32 %v8339_v54, %v4973_v51  ;;  %v4972_v59 = vmul.f32 0.03125, %v4926_v53 }
 0xccb   :  { %v8437_v49 = vsub.f32 %v8343_v58, %v4972_v59  ;;  %v5005_v18 = vmul.f32 %v8434_v13, %v8434_v13 }
 0xccd   :  { %v5023_v2 = vsel %vm283_vm2, %v5005_v18, 0.0  ;;  %v5004_v11 = vmul.f32 %v8437_v49, %v8437_v49 }
 0xcce   :  { %5024 = vadd.xlane.f32.xlu1 %v5023_v2  ;;  %v4935_v16 = vpop.xlane.xlu1 %4934 }
 0xccf   :  { %v4975_v27 = vmul.f32 0.03125, %v4935_v16  ;;  %v5020_v0 = vsel %vm283_vm2, %v5004_v11, 0.0 }
 0xcd0   :  { %v4932_v12 = vpop.xlane.xlu0 %4931  ;;  %5021 = vadd.xlane.f32.xlu0 %v5020_v0 }
 0xcd1   :  { %v8446_v54 = vsub.f32 %v8351_v38, %v4975_v27  ;;  %v4974_v58 = vmul.f32 0.03125, %v4932_v12 }
 0xcd3   :  { %v8449_v1 = vsub.f32 %v8355_v21, %v4974_v58  ;;  %v5007_v25 = vmul.f32 %v8446_v54, %v8446_v54 }
 0xcd5   :  { %v5029_v31 = vsel %vm283_vm2, %v5007_v25, 0.0  ;;  %v5006_v45 = vmul.f32 %v8449_v1, %v8449_v1  ;;  %v4941_v6 = vpop.xlane.xlu1 %4940 }
 0xcd6   :  { %5030 = vadd.xlane.f32.xlu1 %v5029_v31  ;;  %v4977_v4 = vmul.f32 0.03125, %v4941_v6 }
 0xcd7   :  { %v5026_v20 = vsel %vm283_vm2, %v5006_v45, 0.0  ;;  %v4938_v62 = vpop.xlane.xlu0 %4937 }
 0xcd8   :  { %5027 = vadd.xlane.f32.xlu0 %v5026_v20  ;;  %v8458_v38 = vsub.f32 %v8363_v8, %v4977_v4  ;;  %v4976_v21 = vmul.f32 0.03125, %v4938_v62  ;;  %v6592_v20 = vmov 0.0   ;;  %v5259_v62 = vld [vmem:[%s8638_s16 + $0x10] sm:$0xff] }
 0xcd9   :  { %v4947_v7 = vpop.xlane.xlu1 %4946  ;;  %6232 = vmatprep.subr.mxu1 %v6592_v20  ;;  %6240 = vmatprep.mubr.msk.f32.mxu1 %vm6593_vm4, %v6592_v20 }
 0xcda   :  { %v8461_v17 = vsub.f32 %v8367_v23, %v4976_v21  ;;  %v4979_v55 = vmul.f32 0.03125, %v4947_v7  ;;  %v5009_v35 = vmul.f32 %v8458_v38, %v8458_v38  ;;  %v5258_v21 = vld [vmem:[%s8638_s16 + $0x8] sm:$0xff]  ;;  %v5257_v7 = vld [vmem:[%s8638_s16] sm:$0xff] }
 0xcdb   :  { %v4944_v30 = vpop.xlane.xlu0 %4943 }
 0xcdc   :  { %v8466_v24 = vsub.f32 %v8373_v29, %v4979_v55  ;;  %v4978_v14 = vmul.f32 0.03125, %v4944_v30  ;;  %v5035_v60 = vsel %vm283_vm2, %v5009_v35, 0.0  ;;  %v5008_v8 = vmul.f32 %v8461_v17, %v8461_v17 }
 0xcdd   :  { %5036 = vadd.xlane.f32.xlu1 %v5035_v60  ;;  %v4953_v26 = vpop.xlane.xlu1 %4952 }
 0xcde   :  { %v8472_v40 = vsub.f32 %v8379_v28, %v4978_v14  ;;  %v4981_v23 = vmul.f32 0.03125, %v4953_v26  ;;  %v5032_v48 = vsel %vm283_vm2, %v5008_v8, 0.0  ;;  %v5011_v42 = vmul.f32 %v8466_v24, %v8466_v24 }
 0xcdf   :  { %v4950_v47 = vpop.xlane.xlu0 %4949  ;;  %5033 = vadd.xlane.f32.xlu0 %v5032_v48 }
 0xce0   :  { %v8478_v29 = vsub.f32 %v8385_v61, %v4981_v23  ;;  %v4980_v32 = vmul.f32 0.03125, %v4950_v47  ;;  %v5041_v44 = vsel %vm283_vm2, %v5011_v42, 0.0  ;;  %v5010_v39 = vmul.f32 %v8472_v40, %v8472_v40 }
 0xce1   :  { %5042 = vadd.xlane.f32.xlu1 %v5041_v44  ;;  %v4959_v28 = vpop.xlane.xlu1 %4958 }
 0xce2   :  { %v8484_v5 = vsub.f32 %v8391_v9, %v4980_v32  ;;  %v4983_v3 = vmul.f32 0.03125, %v4959_v28  ;;  %v5038_v33 = vsel %vm283_vm2, %v5010_v39, 0.0  ;;  %v5013_v57 = vmul.f32 %v8478_v29, %v8478_v29 }
 0xce3   :  { %v4956_v41 = vpop.xlane.xlu0 %4955  ;;  %5039 = vadd.xlane.f32.xlu0 %v5038_v33 }
 0xce4   :  { %v8490_v61 = vsub.f32 %v8397_v22, %v4983_v3  ;;  %v4982_v56 = vmul.f32 0.03125, %v4956_v41  ;;  %v5047_v46 = vsel %vm283_vm2, %v5013_v57, 0.0  ;;  %v5012_v36 = vmul.f32 %v8484_v5, %v8484_v5 }
 0xce5   :  { %5048 = vadd.xlane.f32.xlu1 %v5047_v46  ;;  %v4965_v9 = vpop.xlane.xlu1 %4964 }
 0xce6   :  { %v8496_v15 = vsub.f32 %v8403_v50, %v4982_v56  ;;  %v4985_v19 = vmul.f32 0.03125, %v4965_v9  ;;  %v5044_v10 = vsel %vm283_vm2, %v5012_v36, 0.0  ;;  %v5015_v52 = vmul.f32 %v8490_v61, %v8490_v61 }
 0xce7   :  { %v4962_v51 = vpop.xlane.xlu0 %4961  ;;  %5045 = vadd.xlane.f32.xlu0 %v5044_v10 }
 0xce8   :  { %v8502_v22 = vsub.f32 %v8409_v63, %v4985_v19  ;;  %v4984_v53 = vmul.f32 0.03125, %v4962_v51  ;;  %v5053_v59 = vsel %vm283_vm2, %v5015_v52, 0.0  ;;  %v5014_v18 = vmul.f32 %v8496_v15, %v8496_v15 }
 0xce9   :  { %5054 = vadd.xlane.f32.xlu1 %v5053_v59  ;;  %v4971_v50 = vpop.xlane.xlu1 %4970 }
 0xcea   :  { %v8508_v2 = vsub.f32 %v8415_v43, %v4984_v53  ;;  %v4987_v11 = vmul.f32 0.03125, %v4971_v50  ;;  %v5050_v16 = vsel %vm283_vm2, %v5014_v18, 0.0  ;;  %v5017_v27 = vmul.f32 %v8502_v22, %v8502_v22 }
 0xceb   :  { %5051 = vadd.xlane.f32.xlu0 %v5050_v16  ;;  %v4968_v63 = vpop.xlane.xlu0 %4967 }
 0xcec   :  { %v8514_v0 = vsub.f32 %v8421_v37, %v4987_v11  ;;  %v4986_v12 = vmul.f32 0.03125, %v4968_v63  ;;  %v5059_v58 = vsel %vm283_vm2, %v5017_v27, 0.0  ;;  %v5016_v25 = vmul.f32 %v8508_v2, %v8508_v2 }
 0xced   :  { %5060 = vadd.xlane.f32.xlu1 %v5059_v58 }
 0xcee   :  { %v8520_v43 = vsub.f32 %v8427_v34, %v4986_v12  ;;  %v5056_v31 = vsel %vm283_vm2, %v5016_v25, 0.0  ;;  %v5019_v45 = vmul.f32 %v8514_v0, %v8514_v0  ;;  %v5260_v34 = vld [vmem:[%s8638_s16 + $0x18] sm:$0xff] }
 0xcef   :  { %5057 = vadd.xlane.f32.xlu0 %v5056_v31  ;;  %6233 = vmatpush3.msra.mxu1 %v5260_v34  ;;  %v8547_v31 = vld [vmem:[%s8636_s14] ss:$0 sm:$0xff] }
 0xcf0   :  { %v5065_v6 = vsel %vm283_vm2, %v5019_v45, 0.0  ;;  %v5018_v37 = vmul.f32 %v8520_v43, %v8520_v43  ;;  %6234 = vmatprep.subr.mxu1 %v6592_v20 }
 0xcf1   :  { %5066 = vadd.xlane.f32.xlu1 %v5065_v6  ;;  %6235 = vmatpush3.msra.mxu1 %v5259_v62  ;;  %v8556_v62 = vld [vmem:[%s8637_s15] ss:$0 sm:$0xff] }
 0xcf2   :  { %v5062_v4 = vsel %vm283_vm2, %v5018_v37, 0.0  ;;  %6236 = vmatprep.subr.mxu1 %v6592_v20 }
 0xcf3   :  { %5063 = vadd.xlane.f32.xlu0 %v5062_v4  ;;  %6237 = vmatpush3.msra.mxu1 %v5258_v21 }
 0xcf4   :  { %6238 = vmatprep.subr.mxu1 %v6592_v20 }
 0xcf5   :  { %6239 = vmatpush3.msra.mxu1 %v5257_v7 }
 0xd57   :  { %v5025_v35 = vpop.xlane.xlu1 %5024 }
 0xd58   :  { %v5069_v14 = vmul.f32 0.03125, %v5025_v35 }
 0xd59   :  { %v5022_v55 = vpop.xlane.xlu0 %5021 }
 0xd5a   :  { %v5068_v30 = vmul.f32 0.03125, %v5022_v55  ;;  %v5085_v23 = vadd.f32 1e-05, %v5069_v14 }
 0xd5c   :  { %v5084_v60 = vadd.f32 1e-05, %v5068_v30 }
 0xd5e   :  { %6537 = vrsqrt.f32 %v5084_v60 }
 0xd5f   :  { %v5031_v8 = vpop.xlane.xlu1 %5030 }
 0xd60   :  { %v5071_v26 = vmul.f32 0.03125, %v5031_v8 }
 0xd61   :  { %v5028_v48 = vpop.xlane.xlu0 %5027 }
 0xd62   :  { %v5087_v42 = vadd.f32 1e-05, %v5071_v26  ;;  %v5070_v47 = vmul.f32 0.03125, %v5028_v48 }
 0xd64   :  { %6539 = vrsqrt.f32 %v5087_v42  ;;  %v5086_v32 = vadd.f32 1e-05, %v5070_v47 }
 0xd65   :  { %6541 = vrsqrt.f32 %v5085_v23 }
 0xd66   :  { %6543 = vrsqrt.f32 %v5086_v32  ;;  %v5037_v44 = vpop.xlane.xlu1 %5036 }
 0xd67   :  { %v5073_v39 = vmul.f32 0.03125, %v5037_v44 }
 0xd68   :  { %v5034_v28 = vpop.xlane.xlu0 %5033 }
 0xd69   :  { %v5089_v3 = vadd.f32 1e-05, %v5073_v39  ;;  %v5072_v33 = vmul.f32 0.03125, %v5034_v28 }
 0xd6a   :  { %v5043_v57 = vpop.xlane.xlu1 %5042 }
 0xd6b   :  { %6545 = vrsqrt.f32 %v5089_v3  ;;  %v5088_v41 = vadd.f32 1e-05, %v5072_v33  ;;  %v5075_v56 = vmul.f32 0.03125, %v5043_v57  ;;  %v6538_v10 = vpop.eup %6537 }
 0xd6c   :  { %v5040_v46 = vpop.xlane.xlu0 %5039  ;;  %v5116_v16 = vmul.f32 %v6538_v10, %v8437_v49 }
 0xd6d   :  { %6547 = vrsqrt.f32 %v5088_v41  ;;  %v5074_v36 = vmul.f32 0.03125, %v5040_v46  ;;  %v5091_v9 = vadd.f32 1e-05, %v5075_v56 }
 0xd6e   :  { %v5049_v19 = vpop.xlane.xlu1 %5048 }
 0xd6f   :  { %v5090_v52 = vadd.f32 1e-05, %v5074_v36  ;;  %v5077_v51 = vmul.f32 0.03125, %v5049_v19  ;;  %6549 = vrsqrt.f32 %v5091_v9 }
 0xd70   :  { %v5046_v59 = vpop.xlane.xlu0 %5045 }
 0xd71   :  { %v6540_v53 = vpop.eup %6539  ;;  %6551 = vrsqrt.f32 %v5090_v52  ;;  %v5093_v50 = vadd.f32 1e-05, %v5077_v51  ;;  %v5076_v63 = vmul.f32 0.03125, %v5046_v59 }
 0xd72   :  { %v6542_v18 = vpop.eup %6541  ;;  %v5119_v27 = vmul.f32 %v6540_v53, %v8446_v54  ;;  %v5055_v12 = vpop.xlane.xlu1 %5054  ;;  %v5138_v54 = vmul.f32 %v8547_v31, %v5116_v16 }
 0xd73   :  { %v6544_v11 = vpop.eup %6543  ;;  %6553 = vrsqrt.f32 %v5093_v50  ;;  %v5079_v25 = vmul.f32 0.03125, %v5055_v12  ;;  %v5117_v45 = vmul.f32 %v6542_v18, %v8434_v13  ;;  %v5092_v6 = vadd.f32 1e-05, %v5076_v63 }
 0xd74   :  { %v5118_v58 = vmul.f32 %v6544_v11, %v8449_v1  ;;  %v5052_v37 = vpop.xlane.xlu0 %5051  ;;  %v5141_v20 = vmul.f32 %v8547_v31, %v5119_v27  ;;  %v5160_v26 = vadd.f32 %v8556_v62, %v5138_v54 }
 0xd75   :  { %v5095_v49 = vadd.f32 1e-05, %v5079_v25  ;;  %v5078_v34 = vmul.f32 0.03125, %v5052_v37  ;;  %6555 = vrsqrt.f32 %v5092_v6  ;;  %v5139_v7 = vmul.f32 %v8547_v31, %v5117_v45 }
 0xd76   :  { %v5140_v4 = vmul.f32 %v8547_v31, %v5118_v58  ;;  %v5061_v1 = vpop.xlane.xlu1 %5060  ;;  %v5163_v23 = vadd.f32 %v8556_v62, %v5141_v20  ;;  %v5176_v36 = vsel %vm283_vm2, %v5160_v26, 0.0 }
 0xd77   :  { %6557 = vrsqrt.f32 %v5095_v49  ;;  %v5094_v21 = vadd.f32 1e-05, %v5078_v34  ;;  %v5081_v35 = vmul.f32 0.03125, %v5061_v1  ;;  %v5161_v28 = vadd.f32 %v8556_v62, %v5139_v7 }
 0xd78   :  { %v6546_v13 = vpop.eup %6545  ;;  %v5162_v55 = vadd.f32 %v8556_v62, %v5140_v4  ;;  %v5058_v30 = vpop.xlane.xlu0 %5057  ;;  %v5186_v19 = vsel %vm283_vm2, %v5163_v23, 0.0 }
 0xd79   :  { %v5121_v14 = vmul.f32 %v6546_v13, %v8458_v38  ;;  %6559 = vrsqrt.f32 %v5094_v21  ;;  %v5080_v60 = vmul.f32 0.03125, %v5058_v30  ;;  %v5097_v48 = vadd.f32 1e-05, %v5081_v35 }
 0xd7a   :  { %v6548_v8 = vpop.eup %6547  ;;  %v5067_v42 = vpop.xlane.xlu1 %5066  ;;  %v5185_v3 = vsel %vm283_vm2, %v5162_v55, 0.0  ;;  %v5177_v53 = vsel %vm283_vm2, %v5161_v28, 0.0 }
 0xd7b   :  { %v5143_v47 = vmul.f32 %v8547_v31, %v5121_v14  ;;  %v5120_v32 = vmul.f32 %v6548_v8, %v8461_v17  ;;  %v5096_v44 = vadd.f32 1e-05, %v5080_v60  ;;  %v5083_v39 = vmul.f32 0.03125, %v5067_v42 }
 0xd7c   :  { %6561 = vrsqrt.f32 %v5097_v48  ;;  %v5064_v38 = vpop.xlane.xlu0 %5063  ;;  %v6550_v33 = vpop.eup %6549  ;;  %v5187_v59 = vadd.f32 %v5186_v19, %v5185_v3  ;;  %v5178_v63 = vadd.f32 %v5177_v53, %v5176_v36 }
 0xd7d   :  { %v5165_v57 = vadd.f32 %v8556_v62, %v5143_v47  ;;  %v5142_v41 = vmul.f32 %v8547_v31, %v5120_v32  ;;  %6563 = vrsqrt.f32 %v5096_v44  ;;  %v5099_v56 = vadd.f32 1e-05, %v5083_v39 }
 0xd7e   :  { %v6552_v46 = vpop.eup %6551  ;;  %v5123_v17 = vmul.f32 %v6550_v33, %v8466_v24  ;;  %v5082_v9 = vmul.f32 0.03125, %v5064_v38  ;;  %v5188_v37 = vrot.slane %v5187_v59, 4  ;;  %v5179_v1 = vrot.slane %v5178_v63, 4 }
 0xd7f   :  { %v5164_v10 = vadd.f32 %v8556_v62, %v5142_v41  ;;  %v5122_v52 = vmul.f32 %v6552_v46, %v8472_v40  ;;  %6565 = vrsqrt.f32 %v5099_v56  ;;  %v5195_v11 = vsel %vm283_vm2, %v5165_v57, 0.0 }
 0xd80   :  { %v6554_v51 = vpop.eup %6553  ;;  %v5145_v18 = vmul.f32 %v8547_v31, %v5123_v17  ;;  %v5098_v50 = vadd.f32 1e-05, %v5082_v9  ;;  %v5189_v30 = vadd.f32 %v5188_v37, %v5187_v59  ;;  %v5180_v48 = vadd.f32 %v5179_v1, %v5178_v63 }
 0xd81   :  { %v5194_v16 = vsel %vm283_vm2, %v5164_v10, 0.0  ;;  %v5144_v24 = vmul.f32 %v8547_v31, %v5122_v52  ;;  %v5125_v27 = vmul.f32 %v6554_v51, %v8478_v29 }
 0xd82   :  { %v5196_v12 = vadd.f32 %v5195_v11, %v5194_v16  ;;  %v5167_v40 = vadd.f32 %v8556_v62, %v5145_v18  ;;  %6567 = vrsqrt.f32 %v5098_v50  ;;  %v6556_v58 = vpop.eup %6555  ;;  %v5190_v38 = vrot.slane %v5189_v30, 2 }
 0xd83   :  { %v5166_v25 = vadd.f32 %v8556_v62, %v5144_v24  ;;  %v5147_v45 = vmul.f32 %v8547_v31, %v5125_v27  ;;  %v5124_v49 = vmul.f32 %v6556_v58, %v8484_v5  ;;  %v5181_v17 = vrot.slane %v5180_v48, 2 }
 0xd84   :  { %v6558_v6 = vpop.eup %6557  ;;  %v5197_v4 = vrot.slane %v5196_v12, 4  ;;  %v5204_v34 = vsel %vm283_vm2, %v5167_v40, 0.0  ;;  %v5191_v59 = vadd.f32 %v5190_v38, %v5189_v30 }
 0xd85   :  { %v5203_v54 = vsel %vm283_vm2, %v5166_v25, 0.0  ;;  %v5127_v29 = vmul.f32 %v6558_v6, %v8490_v61  ;;  %v5169_v13 = vadd.f32 %v8556_v62, %v5147_v45  ;;  %v5146_v7 = vmul.f32 %v8547_v31, %v5124_v49 }
 0xd86   :  { %v6560_v20 = vpop.eup %6559  ;;  %v5205_v21 = vadd.f32 %v5204_v34, %v5203_v54  ;;  %v5198_v14 = vadd.f32 %v5197_v4, %v5196_v12  ;;  %v5182_v58 = vadd.f32 %v5181_v17, %v5180_v48  ;;  %v5192_v4 = vrot.slane %v5191_v59, 1 }
 0xd87   :  { %v5149_v55 = vmul.f32 %v8547_v31, %v5127_v29  ;;  %v5126_v35 = vmul.f32 %v6560_v20, %v8496_v15  ;;  %v5168_v60 = vadd.f32 %v8556_v62, %v5146_v7  ;;  %v5213_v42 = vsel %vm283_vm2, %v5169_v13, 0.0 }
 0xd88   :  { %v5206_v5 = vrot.slane %v5205_v21, 4  ;;  %v5199_v33 = vrot.slane %v5198_v14, 2  ;;  %v5183_v1 = vrot.slane %v5182_v58, 1 }
 0xd89   :  { %v6562_v8 = vpop.eup %6561  ;;  %v5171_v26 = vadd.f32 %v8556_v62, %v5149_v55  ;;  %v5148_v61 = vmul.f32 %v8547_v31, %v5126_v35  ;;  %v5212_v47 = vsel %vm283_vm2, %v5168_v60, 0.0  ;;  %v5193_v55 = vadd.f32 %v5192_v4, %v5191_v59 }
 0xd8a   :  { %v6564_v23 = vpop.eup %6563  ;;  %v5129_v32 = vmul.f32 %v6562_v8, %v8502_v22  ;;  %v5207_v44 = vadd.f32 %v5206_v5, %v5205_v21  ;;  %v5214_v15 = vadd.f32 %v5213_v42, %v5212_v47  ;;  %v5200_v11 = vadd.f32 %v5199_v33, %v5198_v14 }
 0xd8b   :  { %v5170_v39 = vadd.f32 %v8556_v62, %v5148_v61  ;;  %v5128_v28 = vmul.f32 %v6564_v23, %v8508_v2  ;;  %v5222_v57 = vsel %vm283_vm2, %v5171_v26, 0.0  ;;  %v5184_v5 = vadd.f32 %v5183_v1, %v5182_v58 }
 0xd8c   :  { %v6566_v3 = vpop.eup %6565  ;;  %v5151_v41 = vmul.f32 %v8547_v31, %v5129_v32  ;;  %v5215_v56 = vrot.slane %v5214_v15, 4  ;;  %v5208_v51 = vrot.slane %v5207_v44, 2  ;;  %v5201_v49 = vrot.slane %v5200_v11, 1 }
 0xd8d   :  { %v5221_v46 = vsel %vm283_vm2, %v5170_v39, 0.0  ;;  %v5150_v36 = vmul.f32 %v8547_v31, %v5128_v28  ;;  %v5131_v22 = vmul.f32 %v6566_v3, %v8514_v0  ;;  %v5250_v42 = vmul.f32 0.0625, %v5193_v55 }
 0xd8e   :  { %v5223_v9 = vadd.f32 %v5222_v57, %v5221_v46  ;;  %v5173_v19 = vadd.f32 %v8556_v62, %v5151_v41  ;;  %v5216_v53 = vadd.f32 %v5215_v56, %v5214_v15  ;;  %v5209_v25 = vadd.f32 %v5208_v51, %v5207_v44 }
 0xd8f   :  { %v6568_v10 = vpop.eup %6567  ;;  %v5172_v2 = vadd.f32 %v8556_v62, %v5150_v36  ;;  %v5153_v52 = vmul.f32 %v8547_v31, %v5131_v22  ;;  %v5249_v15 = vmul.f32 0.0625, %v5184_v5 }
 0xd90   :  { %v5130_v18 = vmul.f32 %v6568_v10, %v8520_v43  ;;  %v5224_v50 = vrot.slane %v5223_v9, 4  ;;  %v5231_v16 = vsel %vm283_vm2, %v5173_v19, 0.0  ;;  %v5217_v24 = vrot.slane %v5216_v53, 2  ;;  %v5532_v10 = vld [vmem:[%s8639_s17] ss:$0 sm:$0xff] }
 0xd91   :  { %v5230_v0 = vsel %vm283_vm2, %v5172_v2, 0.0  ;;  %v5175_v27 = vadd.f32 %v8556_v62, %v5153_v52  ;;  %v5210_v21 = vrot.slane %v5209_v25, 1  ;;  %v5277_v33 = vsel %vm5276_vm5, %v5250_v42, %v5249_v15 }
 0xd92   :  { %v5152_v63 = vmul.f32 %v8547_v31, %v5130_v18  ;;  %v5225_v12 = vadd.f32 %v5224_v50, %v5223_v9  ;;  %v5232_v40 = vadd.f32 %v5231_v16, %v5230_v0  ;;  %v5218_v6 = vadd.f32 %v5217_v24, %v5216_v53 }
 0xd93   :  { %v5240_v20 = vsel %vm283_vm2, %v5175_v27, 0.0  ;;  %v5211_v60 = vadd.f32 %v5210_v21, %v5209_v25 }
 0xd94   :  { %v5174_v45 = vadd.f32 %v8556_v62, %v5152_v63  ;;  %v5226_v37 = vrot.slane %v5225_v12, 2  ;;  %v5233_v43 = vrot.slane %v5232_v40, 4  ;;  %v5219_v13 = vrot.slane %v5218_v6, 1 }
 0xd95   :  { %v5202_v62 = vadd.f32 %v5201_v49, %v5200_v11  ;;  %v5252_v39 = vmul.f32 0.0625, %v5211_v60 }
 0xd96   :  { %v5227_v34 = vadd.f32 %v5226_v37, %v5225_v12  ;;  %v5234_v54 = vadd.f32 %v5233_v43, %v5232_v40  ;;  %v5239_v29 = vsel %vm283_vm2, %v5174_v45, 0.0  ;;  %v5220_v26 = vadd.f32 %v5219_v13, %v5218_v6 }
 0xd97   :  { %v5241_v31 = vadd.f32 %v5240_v20, %v5239_v29  ;;  %v5251_v32 = vmul.f32 0.0625, %v5202_v62 }
 0xd98   :  { %v5235_v7 = vrot.slane %v5234_v54, 2  ;;  %v5228_v35 = vrot.slane %v5227_v34, 1  ;;  %v5253_v28 = vmul.f32 0.0625, %v5220_v26 }
 0xd99   :  { %v5242_v30 = vrot.slane %v5241_v31, 4  ;;  %v5279_v41 = vsel %vm5278_vm6, %v5251_v32, %v5277_v33 }
 0xd9a   :  { %v5236_v14 = vadd.f32 %v5235_v7, %v5234_v54  ;;  %v5229_v23 = vadd.f32 %v5228_v35, %v5227_v34  ;;  %v5281_v46 = vsel %vm5280_vm7, %v5252_v39, %v5279_v41 }
 0xd9b   :  { %v5243_v8 = vadd.f32 %v5242_v30, %v5241_v31  ;;  %v5283_v36 = vsel %vm5282_vm8, %v5253_v28, %v5281_v46 }
 0xd9c   :  { %v5237_v61 = vrot.slane %v5236_v14, 1  ;;  %v5254_v38 = vmul.f32 0.0625, %v5229_v23 }
 0xd9d   :  { %v5244_v48 = vrot.slane %v5243_v8, 2 }
 0xd9e   :  { %v5238_v47 = vadd.f32 %v5237_v61, %v5236_v14  ;;  %v5285_v17 = vsel %vm5284_vm9, %v5254_v38, %v5283_v36 }
 0xd9f   :  { %v5245_v44 = vadd.f32 %v5244_v48, %v5243_v8 }
 0xda0   :  { %v5255_v57 = vmul.f32 0.0625, %v5238_v47 }
 0xda1   :  { %v5246_v3 = vrot.slane %v5245_v44, 1 }
 0xda2   :  { %v5287_v9 = vsel %vm5286_vm10, %v5255_v57, %v5285_v17 }
 0xda3   :  { %v5247_v56 = vadd.f32 %v5246_v3, %v5245_v44 }
 0xda5   :  { %v5256_v22 = vmul.f32 0.0625, %v5247_v56 }
 0xda7   :  { %v5289_v19 = vsel %vm5288_vm11, %v5256_v22, %v5287_v9 }
 0xda8   :  { %6241 = vmatmul.mubr.msk.f32.vlgmr.msra.gmra.mxu1 %vm283_vm2, %v5289_v19 }
 0xe68   :  { %v5358_v2 = vpop.f32.mrf.mxu1 }
 0xe69   :  { %v5359_v52 = vadd.f32 %v5532_v10, %v5358_v2 }
 0xe6a   :  { %v6242_v51 = vpop.f32.mrf.mxu1 }
 0xe6b   :  { %5362 = vst [vmem:[#allocation2] sm:$0xff] %v5359_v52 }
 0xe6c   :  { %6580 = shalt.err (!%p6577_p4)
}
 0xe6d   :  { %5372 = dma.vmem_to_hbm [thread:$0]  %s5370_s7, 128, %s8640_s18, [#allocation3]  }
 0xe6e   :  { %6589 = dma.done.wait [#allocation3], 128  }
 0xe6f   :  { %6590 = vsyncadd [#allocation3], 4294967168 }
 0xe70   :  { %5376 = vsyncpa [#allocation3], 1 }

</bundles_post_ra>
